<compile_context>
chip_gen: v7x
topology: tpu7x:2x2x1
jax: 0.10.0
libtpu: 0.0.40
codegen_flags: <defaults>
</compile_context>

<pallas_src>
import functools

import jax
import jax.numpy as jnp
from jax.experimental import pallas as pl
from jax.experimental.pallas import tpu as pltpu


_ENC_DIMS = [(4, 64), (64, 64), (64, 64), (64, 128), (128, 1024)]
_DEC_DIMS = [(1088, 512), (512, 256), (256, 128), (128, 128), (128, 2)]
_OUT_PAD = 8          # dconv5 output channels padded 2 -> 8 (wrapper slices [:, :, :2])


# ----------------------------------------------------------------------------
# Kernels
# ----------------------------------------------------------------------------
def _encoder_kernel(
    x_ref,                                   # [1, tile_n, 4]   (bf16)
    w1, b1, w2, b2, w3, b3, w4, b4, w5, b5,  # folded conv+BN (w: bf16, b: f32)
    g_ref,                                   # [1, 1, 1, 1024]  f32 partial max
    *, tile_n, n_actual, tiles_per_split, padded,
):
    bf16 = jnp.bfloat16
    f32 = jnp.float32
    h_idx = pl.program_id(1)                 # encoder split (v7x second parallel axis)
    t = pl.program_id(2)                     # reduction axis (last in grid)

    def lin_relu(h, w, b):
        return jnp.maximum(
            jnp.dot(h.astype(bf16), w[...], preferred_element_type=f32) + b[...],
            0.0,
        )

    x = x_ref[0]                             # [tile_n, 4]
    h1 = lin_relu(x, w1, b1)                 # [tile_n, 64]
    h2 = lin_relu(h1, w2, b2)                # [tile_n, 64]
    h3 = lin_relu(h2, w3, b3)                # [tile_n, 64]
    h4 = lin_relu(h3, w4, b4)                # [tile_n, 128]
    h5 = lin_relu(h4, w5, b5)                # [tile_n, 1024] f32

    @pl.when(t == 0)
    def _():
        # Zero-init is only valid because conv5 is followed by ReLU (h5 >= 0), so
        # zeros (and zero-masked padded rows below) never beat a real per-channel max.
        g_ref[...] = jnp.zeros_like(g_ref)

    if not padded:
        # No padded points anywhere in this pass: plain per-tile max.
        g_ref[0, 0] = jnp.maximum(g_ref[0, 0], jnp.max(h5, axis=0, keepdims=True))
    else:
        tile_start = (h_idx * tiles_per_split + t) * tile_n
        is_full = (tile_start + tile_n) <= n_actual

        @pl.when(is_full)
        def _():
            # Clean tile: skip the [tile_n, 1024] select entirely.
            g_ref[0, 0] = jnp.maximum(g_ref[0, 0], jnp.max(h5, axis=0, keepdims=True))

        @pl.when(jnp.logical_not(is_full))
        def _():
            # Boundary / fully-padded tile: zero the padded rows before the max.
            row = jax.lax.broadcasted_iota(jnp.int32, (tile_n, 1), 0)
            valid = (tile_start + row) < n_actual
            h5m = jnp.where(valid, h5, 0.0)
            g_ref[0, 0] = jnp.maximum(g_ref[0, 0], jnp.max(h5m, axis=0, keepdims=True))


def _decoder_kernel(
    x_ref,                                   # [1, tile_n, 4]  (bf16)
    gb1_ref,                                 # [1, 1, 512]     f32: g @ dW1[64:] + b1
    w1, b1, w2, b2,                          # encoder layers 1-2 (skip recompute)
    dw1a, dw2, db2, dw3, db3, dw4, db4, dw5, db5,
    o_ref,                                   # [1, tile_n, _OUT_PAD] f32
):
    bf16 = jnp.bfloat16
    f32 = jnp.float32

    def lin(h, w, b):
        return jnp.dot(h.astype(bf16), w[...], preferred_element_type=f32) + b[...]

    def lin_relu(h, w, b):
        return jnp.maximum(lin(h, w, b), 0.0)

    x = x_ref[0]                             # [tile_n, 4]

    # Recompute the cheap skip features (4->64->64) instead of caching h2 in HBM.
    h1 = lin_relu(x, w1, b1)
    h2 = lin_relu(h1, w2, b2)                # [tile_n, 64]

    # d1 = relu(concat(h2, g) @ dW1 + b1); the global-feature half (g @ dW1[64:] + b1)
    # is hoisted to the wrapper and arrives pre-reduced as gb1 (constant over the tile).
    d1 = jnp.maximum(
        jnp.dot(h2.astype(bf16), dw1a[...], preferred_element_type=f32) + gb1_ref[0],
        0.0,
    )                                        # [tile_n, 512]
    d2 = lin_relu(d1, dw2, db2)              # [tile_n, 256]
    d3 = lin_relu(d2, dw3, db3)              # [tile_n, 128]
    d4 = lin_relu(d3, dw4, db4)              # [tile_n, 128]

    o_ref[0] = lin(d4, dw5, db5)             # [tile_n, _OUT_PAD] ([:, :2] meaningful)


# ----------------------------------------------------------------------------
# Parameter construction (deterministic, synthetic) + BN folding (glue).
# ----------------------------------------------------------------------------
def init_params(key):
    params = {}
    ks = jax.random.split(key, 64)
    ki = iter(range(64))

    def conv(cin, cout):
        w = 0.1 * jax.random.normal(ks[next(ki)], (cout, cin), jnp.float32)
        b = 0.1 * jax.random.normal(ks[next(ki)], (cout,), jnp.float32)
        return w, b

    def bn(c):
        gamma = 1.0 + 0.1 * jax.random.normal(ks[next(ki)], (c,), jnp.float32)
        beta = 0.1 * jax.random.normal(ks[next(ki)], (c,), jnp.float32)
        mean = 0.1 * jax.random.normal(ks[next(ki)], (c,), jnp.float32)
        var = jnp.abs(jax.random.normal(ks[next(ki)], (c,), jnp.float32)) + 0.5
        return gamma, beta, mean, var

    for i, (cin, cout) in enumerate(_ENC_DIMS, start=1):
        params[f"conv{i}"] = conv(cin, cout)
        params[f"bn{i}"] = bn(cout)
    for i, (cin, cout) in enumerate(_DEC_DIMS, start=1):
        params[f"dconv{i}"] = conv(cin, cout)
        if i <= 4:
            params[f"dbn{i}"] = bn(cout)
    return params


def _fold_bn(w, b, gamma, beta, mean, var, eps=1e-5):
    """Fold eval-mode BatchNorm into a 1x1 conv. Returns (W[C_in,C_out], b[1,C_out])."""
    s = gamma / jnp.sqrt(var + eps)
    wf = (w * s[:, None]).T
    bf = (b - mean) * s + beta
    return wf, bf.reshape(1, -1)


def _prepare_folded(params):
    """Returns (enc_flat, dec_flat, gmix). Weights bf16 (MXU operands), biases f32.

    gmix = (dW1[64:] bf16, b1 f32) is used by the wrapper to precompute the
    global-feature contribution gb1 = g @ dW1[64:] + b1 once per batch element.
    """
    bf16 = jnp.bfloat16
    f32 = jnp.float32

    enc = []
    for i in range(1, 6):
        w, b = params[f"conv{i}"]
        wf, bfold = _fold_bn(w, b, *params[f"bn{i}"])
        enc += [wf.astype(bf16), bfold.astype(f32)]

    # Decoder re-uses conv1/conv2 (for the skip-feature recompute).
    dec = [enc[0], enc[1], enc[2], enc[3]]

    # dconv1 split: rows 0..63 act on out2 (skip), rows 64..1087 on the global feature.
    w, b = params["dconv1"]
    wf, bfold = _fold_bn(w, b, *params["dbn1"])
    dec += [wf[:64, :].astype(bf16)]                       # dw1a (in-kernel)
    gmix = (wf[64:, :].astype(bf16), bfold.astype(f32))    # (dw1b, db1) -> wrapper

    for i in range(2, 5):
        w, b = params[f"dconv{i}"]
        wf, bfold = _fold_bn(w, b, *params[f"dbn{i}"])
        dec += [wf.astype(bf16), bfold.astype(f32)]

    # dconv5 (no BN): zero-pad 2 -> _OUT_PAD output channels.
    w5, b5 = params["dconv5"]
    w5p = jnp.zeros((128, _OUT_PAD), f32).at[:, :2].set(w5.T)
    b5p = jnp.zeros((1, _OUT_PAD), f32).at[:, :2].set(b5)
    dec += [w5p.astype(bf16), b5p]

    return tuple(enc), tuple(dec), gmix


# ----------------------------------------------------------------------------
# Small runtime configuration helpers.
# ----------------------------------------------------------------------------
@functools.lru_cache(maxsize=1)
def _buffered_weights_supported():
    """pl.Buffered(1) disables double-buffering for constant (weight) blocks, which
    is pure VMEM savings.  Probe once with a tiny kernel; fall back to the default
    pipeline mode if this JAX/Mosaic build rejects buffer_count=1."""
    def _copy(x_ref, o_ref):
        o_ref[...] = x_ref[...]

    try:
        probe = pl.pallas_call(
            _copy,
            out_shape=jax.ShapeDtypeStruct((8, 128), jnp.float32),
            grid=(2,),
            in_specs=[pl.BlockSpec((8, 128), lambda i: (0, 0),
                                   pipeline_mode=pl.Buffered(1))],
            out_specs=pl.BlockSpec((8, 128), lambda i: (0, 0)),
        )
        jax.block_until_ready(probe(jnp.zeros((8, 128), jnp.float32)))
        return True
    except Exception:      # any failure -> just use default double buffering
        return False


def _default_tile_n():
    """512 fits v5e's 16 MiB scoped-VMEM default; v6e/v7x (32 MiB scoped) take 1024
    for better MXU duty cycle and 2x fewer grid steps.  No vmem_limit override used."""
    try:
        kind = jax.devices()[0].device_kind.lower()
    except Exception:
        return 512
    if ("v6" in kind) or ("v7" in kind) or ("tpu7" in kind):
        return 1024
    return 512


def _const_spec(a, index_map, wmode):
    """BlockSpec for a weight/bias fetched once (constant index map)."""
    if wmode is not None:
        return pl.BlockSpec(a.shape, index_map, pipeline_mode=wmode)
    return pl.BlockSpec(a.shape, index_map)


# ----------------------------------------------------------------------------
# Wrapper
# ----------------------------------------------------------------------------
def pointnet_instance_seg(pts, enc_flat, dec_flat, gmix, *, tile_n=None):
    """pts: [bs, 4, n] (PyTorch NCW). Returns logits [bs, n, 2] (seg_pred)."""
    if tile_n is None:
        tile_n = _default_tile_n()
    use_buffered = _buffered_weights_supported()   # probed outside jit
    return _forward(pts, enc_flat, dec_flat, gmix, int(tile_n), bool(use_buffered))


@functools.partial(jax.jit, static_argnums=(4, 5))
def _forward(pts, enc_flat, dec_flat, gmix, tile_n, use_buffered):
    bs, cin, n = pts.shape
    assert cin == 4
    f32 = jnp.float32
    bf16 = jnp.bfloat16

    # [bs, n, 4], bf16 (matmul operand dtype).  Channels stay at 4 in HBM.
    x = jnp.transpose(pts, (0, 2, 1)).astype(bf16)

    if n < tile_n:
        tile_n = max(16, ((n + 15) // 16) * 16)    # bf16 sublane packing: multiple of 16
    num_tiles = pl.cdiv(n, tile_n)
    # Second parallel axis for the encoder so both v7x TensorCores are busy at small bs.
    enc_splits = 2 if num_tiles >= 2 else 1
    tiles_per_split = pl.cdiv(num_tiles, enc_splits)
    n_pad_enc = enc_splits * tiles_per_split * tile_n
    n_pad_dec = num_tiles * tile_n
    if n_pad_enc != n:
        x = jnp.pad(x, ((0, 0), (0, n_pad_enc - n), (0, 0)))
    padded = n_pad_enc != n

    wmode = pl.Buffered(1) if use_buffered else None

    # ---- Pass 1: encoder + per-split global max feature -----------------------
    enc_mults = sum(ci * co for ci, co in _ENC_DIMS)
    enc_w_bytes = sum(int(a.size) * a.dtype.itemsize for a in enc_flat)
    enc_cost = pl.CostEstimate(
        flops=2 * bs * n_pad_enc * enc_mults,
        transcendentals=0,
        bytes_accessed=int(x.size) * 2 + enc_w_bytes + bs * enc_splits * 1024 * 4,
    )
    g_parts = pl.pallas_call(
        functools.partial(
            _encoder_kernel,
            tile_n=tile_n, n_actual=n,
            tiles_per_split=tiles_per_split, padded=padded,
        ),
        out_shape=jax.ShapeDtypeStruct((bs, enc_splits, 1, 1024), f32),
        grid_spec=pltpu.PrefetchScalarGridSpec(
            num_scalar_prefetch=0,
            grid=(bs, enc_splits, tiles_per_split),
            in_specs=[pl.BlockSpec(
                (1, tile_n, 4),
                lambda b, h, t: (b, h * tiles_per_split + t, 0))]
            + [_const_spec(a, lambda b, h, t, _nd=a.ndim: (0,) * _nd, wmode)
               for a in enc_flat],
            out_specs=pl.BlockSpec((1, 1, 1, 1024), lambda b, h, t: (b, h, 0, 0)),
        ),
        compiler_params=pltpu.CompilerParams(
            dimension_semantics=("parallel", "parallel", "arbitrary"),
        ),
        cost_estimate=enc_cost,
    )(x, *enc_flat)

    # Reduce the per-split partial maxes -> g[bs, 1, 1024], then hoist the
    # global-feature half of dconv1 out of the decoder: gb1 = g @ dW1[64:] + b1.
    g = jnp.max(g_parts, axis=1)                                   # [bs, 1, 1024]
    dw1b, db1 = gmix
    gb1 = (
        jnp.einsum("bok,kc->boc", g.astype(bf16), dw1b, preferred_element_type=f32)
        + db1
    )                                                              # [bs, 1, 512]

    # ---- Pass 2: decoder (fully parallel over (bs, n_tiles)) ------------------
    dec_mults = (4 * 64 + 64 * 64 + 64 * 512 + 512 * 256 + 256 * 128
                 + 128 * 128 + 128 * _OUT_PAD)
    dec_w_bytes = sum(int(a.size) * a.dtype.itemsize for a in dec_flat)
    dec_cost = pl.CostEstimate(
        flops=2 * bs * n_pad_dec * dec_mults,
        transcendentals=0,
        bytes_accessed=(bs * n_pad_dec * 4 * 2 + dec_w_bytes + bs * 512 * 4
                        + bs * n_pad_dec * _OUT_PAD * 4),
    )
    out = pl.pallas_call(
        _decoder_kernel,
        out_shape=jax.ShapeDtypeStruct((bs, n_pad_dec, _OUT_PAD), f32),
        grid_spec=pltpu.PrefetchScalarGridSpec(
            num_scalar_prefetch=0,
            grid=(bs, num_tiles),
            in_specs=[
                pl.BlockSpec((1, tile_n, 4), lambda b, t: (b, t, 0)),
                pl.BlockSpec((1, 1, 512), lambda b, t: (b, 0, 0)),
            ]
            + [_const_spec(a, lambda b, t, _nd=a.ndim: (0,) * _nd, wmode)
               for a in dec_flat],
            out_specs=pl.BlockSpec((1, tile_n, _OUT_PAD), lambda b, t: (b, t, 0)),
        ),
        compiler_params=pltpu.CompilerParams(
            dimension_semantics=("parallel", "parallel"),
        ),
        cost_estimate=dec_cost,
    )(x, gb1, *dec_flat)

    # Strip point padding and the channel padding -> [bs, n, 2]. sigma=False -> identity.
    return out[:, :n, :2]


# ----------------------------------------------------------------------------
# Pure-JAX reference (mirrors the kernel's bf16-operand / f32-accumulate math).
# ----------------------------------------------------------------------------
def _ref_forward(pts, enc_flat, dec_flat, gmix):
    bf16 = jnp.bfloat16
    f32 = jnp.float32
    (w1, b1, w2, b2, w3, b3, w4, b4, w5, b5) = enc_flat
    (_, _, _, _, dw1a, dw2, db2, dw3, db3, dw4, db4, dw5, db5) = dec_flat
    dw1b, db1 = gmix

    x = jnp.transpose(pts, (0, 2, 1)).astype(bf16)

    def lin(h, w, b):
        return jnp.dot(h.astype(bf16), w, preferred_element_type=f32) + b

    def lr(h, w, b):
        return jnp.maximum(lin(h, w, b), 0.0)

    h1 = lr(x, w1, b1)
    h2 = lr(h1, w2, b2)
    h3 = lr(h2, w3, b3)
    h4 = lr(h3, w4, b4)
    h5 = lr(h4, w5, b5)
    g = jnp.max(h5, axis=1, keepdims=True)                          # [bs, 1, 1024]
    gb1 = jnp.dot(g.astype(bf16), dw1b, preferred_element_type=f32) + db1
    d1 = jnp.maximum(
        jnp.dot(h2.astype(bf16), dw1a, preferred_element_type=f32) + gb1, 0.0)
    d2 = lr(d1, dw2, db2)
    d3 = lr(d2, dw3, db3)
    d4 = lr(d3, dw4, db4)
    return lin(d4, dw5, db5)[..., :2]


if __name__ == "__main__":
    key = jax.random.PRNGKey(0)
    k_param, k_data = jax.random.split(key)

    params = init_params(k_param)
    enc_flat, dec_flat, gmix = _prepare_folded(params)

    # (bs, n, tile_n): first exercises multi-tile + 2-way encoder split + partial
    # last tile; second uses the auto tile size (device-dependent) with a ragged n.
    configs = [(2, 200, 128), (1, 1500, None)]
    for bs, n, tile in configs:
        pts = jax.random.normal(jax.random.fold_in(k_data, n), (bs, 4, n), jnp.float32)
        out = pointnet_instance_seg(pts, enc_flat, dec_flat, gmix, tile_n=tile)
        out = jax.block_until_ready(out)

        ref = _ref_forward(pts, enc_flat, dec_flat, gmix)
        assert out.shape == (bs, n, 2), out.shape
        max_err = float(jnp.max(jnp.abs(out - ref)))
        assert jnp.allclose(out, ref, atol=2e-2, rtol=2e-2), (bs, n, tile, max_err)

    print("KERNEL_OK")
</pallas_src>

<mosaic_0001>
module attributes {stable_mosaic.version = 11 : i64} {
  func.func @_copy(%arg0: i32, %arg1: memref<8x128xf32, #tpu.memory_space<vmem>>, %arg2: memref<8x128xf32, #tpu.memory_space<vmem>>) attributes {dimension_semantics = [#tpu.dimension_semantics<arbitrary>], iteration_bounds = array<i64: 2>, scalar_prefetch = 0 : i64, scratch_operands = 0 : i64, tpu.core_type = #tpu.core_type<tc>, window_params = [{pipeline_mode = #tpu.pipeline_mode<synchronous>, transform_indices = @transform_0, window_bounds = array<i64: 8, 128>}, {pipeline_mode = #tpu.pipeline_mode<synchronous>, transform_indices = @transform_1, window_bounds = array<i64: 8, 128>}]} {
    %c0 = arith.constant 0 : index
    %c0_0 = arith.constant 0 : index
    %0 = vector.load %arg1[%c0, %c0_0] : memref<8x128xf32, #tpu.memory_space<vmem>>, vector<8x128xf32>
    %c0_1 = arith.constant 0 : index
    %c0_2 = arith.constant 0 : index
    %1 = vector.load %arg2[%c0_1, %c0_2] : memref<8x128xf32, #tpu.memory_space<vmem>>, vector<8x128xf32>
    tpu.vector_store %arg2[%c0_1, %c0_2], %0 {strides = array<i32>} : memref<8x128xf32, #tpu.memory_space<vmem>>, vector<8x128xf32>,
    return
  }
  func.func @transform_0(%arg0: i32) -> (i32, i32) {
    %c0_i32 = arith.constant 0 : i32
    %c0_i32_0 = arith.constant 0 : i32
    %c0_i32_1 = arith.constant 0 : i32
    return %c0_i32, %c0_i32_0 : i32, i32
  }
  func.func @transform_1(%arg0: i32) -> (i32, i32) {
    %c0_i32 = arith.constant 0 : i32
    %c0_i32_0 = arith.constant 0 : i32
    %c0_i32_1 = arith.constant 0 : i32
    return %c0_i32, %c0_i32_0 : i32, i32
  }
}

module attributes {stable_mosaic.version = 11 : i64} {
  func.func @_encoder_kernel(%arg0: i32, %arg1: i32, %arg2: i32, %arg3: memref<1x128x4xbf16, #tpu.memory_space<vmem>>, %arg4: memref<4x64xbf16, #tpu.memory_space<vmem>>, %arg5: memref<1x64xf32, #tpu.memory_space<vmem>>, %arg6: memref<64x64xbf16, #tpu.memory_space<vmem>>, %arg7: memref<1x64xf32, #tpu.memory_space<vmem>>, %arg8: memref<64x64xbf16, #tpu.memory_space<vmem>>, %arg9: memref<1x64xf32, #tpu.memory_space<vmem>>, %arg10: memref<64x128xbf16, #tpu.memory_space<vmem>>, %arg11: memref<1x128xf32, #tpu.memory_space<vmem>>, %arg12: memref<128x1024xbf16, #tpu.memory_space<vmem>>, %arg13: memref<1x1024xf32, #tpu.memory_space<vmem>>, %arg14: memref<1x1x1x1024xf32, #tpu.memory_space<vmem>>) attributes {dimension_semantics = [#tpu.dimension_semantics<parallel>, #tpu.dimension_semantics<parallel>, #tpu.dimension_semantics<arbitrary>], iteration_bounds = array<i64: 2, 2, 1>, scalar_prefetch = 0 : i64, scratch_operands = 0 : i64, tpu.core_type = #tpu.core_type<tc>, window_params = [{transform_indices = @transform_0, window_bounds = array<i64: 1, 128, 4>}, {pipeline_mode = #tpu.pipeline_mode<synchronous>, transform_indices = @transform_1, window_bounds = array<i64: 4, 64>}, {pipeline_mode = #tpu.pipeline_mode<synchronous>, transform_indices = @transform_2, window_bounds = array<i64: 1, 64>}, {pipeline_mode = #tpu.pipeline_mode<synchronous>, transform_indices = @transform_3, window_bounds = array<i64: 64, 64>}, {pipeline_mode = #tpu.pipeline_mode<synchronous>, transform_indices = @transform_4, window_bounds = array<i64: 1, 64>}, {pipeline_mode = #tpu.pipeline_mode<synchronous>, transform_indices = @transform_5, window_bounds = array<i64: 64, 64>}, {pipeline_mode = #tpu.pipeline_mode<synchronous>, transform_indices = @transform_6, window_bounds = array<i64: 1, 64>}, {pipeline_mode = #tpu.pipeline_mode<synchronous>, transform_indices = @transform_7, window_bounds = array<i64: 64, 128>}, {pipeline_mode = #tpu.pipeline_mode<synchronous>, transform_indices = @transform_8, window_bounds = array<i64: 1, 128>}, {pipeline_mode = #tpu.pipeline_mode<synchronous>, transform_indices = @transform_9, window_bounds = array<i64: 128, 1024>}, {pipeline_mode = #tpu.pipeline_mode<synchronous>, transform_indices = @transform_10, window_bounds = array<i64: 1, 1024>}, {transform_indices = @transform_11, window_bounds = array<i64: 1, 1, 1, 1024>}]} {
    %c0 = arith.constant 0 : index
    %c0_0 = arith.constant 0 : index
    %c0_1 = arith.constant 0 : index
    %0 = vector.load %arg3[%c0, %c0_0, %c0_1] : memref<1x128x4xbf16, #tpu.memory_space<vmem>>, vector<1x128x4xbf16>
    %1 = vector.shape_cast %0 : vector<1x128x4xbf16> to vector<128x4xbf16>
    %c0_2 = arith.constant 0 : index
    %c0_3 = arith.constant 0 : index
    %2 = vector.load %arg4[%c0_2, %c0_3] : memref<4x64xbf16, #tpu.memory_space<vmem>>, vector<4x64xbf16>
    %cst = arith.constant dense<0.000000e+00> : vector<128x64xf32>
    %3 = tpu.matmul %1, %2, %cst {dimension_numbers = #tpu.dot_dimension_numbers<[1], [0], [0], [1], [0, 0, 1, 1], [], []>} : vector<128x4xbf16>, vector<4x64xbf16>, vector<128x64xf32> -> vector<128x64xf32>
    %c0_4 = arith.constant 0 : index
    %c0_5 = arith.constant 0 : index
    %4 = vector.load %arg5[%c0_4, %c0_5] : memref<1x64xf32, #tpu.memory_space<vmem>>, vector<1x64xf32>
    %5 = vector.broadcast %4 : vector<1x64xf32> to vector<128x64xf32>
    %6 = arith.addf %3, %5 : vector<128x64xf32>
    %cst_6 = arith.constant 0.000000e+00 : f32
    %7 = vector.broadcast %cst_6 : f32 to vector<128x64xf32>
    %8 = arith.maximumf %6, %7 : vector<128x64xf32>
    %9 = arith.truncf %8 : vector<128x64xf32> to vector<128x64xbf16>
    %c0_7 = arith.constant 0 : index
    %c0_8 = arith.constant 0 : index
    %10 = vector.load %arg6[%c0_7, %c0_8] : memref<64x64xbf16, #tpu.memory_space<vmem>>, vector<64x64xbf16>
    %cst_9 = arith.constant dense<0.000000e+00> : vector<128x64xf32>
    %11 = tpu.matmul %9, %10, %cst_9 {dimension_numbers = #tpu.dot_dimension_numbers<[1], [0], [0], [1], [0, 0, 1, 1], [], []>} : vector<128x64xbf16>, vector<64x64xbf16>, vector<128x64xf32> -> vector<128x64xf32>
    %c0_10 = arith.constant 0 : index
    %c0_11 = arith.constant 0 : index
    %12 = vector.load %arg7[%c0_10, %c0_11] : memref<1x64xf32, #tpu.memory_space<vmem>>, vector<1x64xf32>
    %13 = vector.broadcast %12 : vector<1x64xf32> to vector<128x64xf32>
    %14 = arith.addf %11, %13 : vector<128x64xf32>
    %cst_12 = arith.constant 0.000000e+00 : f32
    %15 = vector.broadcast %cst_12 : f32 to vector<128x64xf32>
    %16 = arith.maximumf %14, %15 : vector<128x64xf32>
    %17 = arith.truncf %16 : vector<128x64xf32> to vector<128x64xbf16>
    %c0_13 = arith.constant 0 : index
    %c0_14 = arith.constant 0 : index
    %18 = vector.load %arg8[%c0_13, %c0_14] : memref<64x64xbf16, #tpu.memory_space<vmem>>, vector<64x64xbf16>
    %cst_15 = arith.constant dense<0.000000e+00> : vector<128x64xf32>
    %19 = tpu.matmul %17, %18, %cst_15 {dimension_numbers = #tpu.dot_dimension_numbers<[1], [0], [0], [1], [0, 0, 1, 1], [], []>} : vector<128x64xbf16>, vector<64x64xbf16>, vector<128x64xf32> -> vector<128x64xf32>
    %c0_16 = arith.constant 0 : index
    %c0_17 = arith.constant 0 : index
    %20 = vector.load %arg9[%c0_16, %c0_17] : memref<1x64xf32, #tpu.memory_space<vmem>>, vector<1x64xf32>
    %21 = vector.broadcast %20 : vector<1x64xf32> to vector<128x64xf32>
    %22 = arith.addf %19, %21 : vector<128x64xf32>
    %cst_18 = arith.constant 0.000000e+00 : f32
    %23 = vector.broadcast %cst_18 : f32 to vector<128x64xf32>
    %24 = arith.maximumf %22, %23 : vector<128x64xf32>
    %25 = arith.truncf %24 : vector<128x64xf32> to vector<128x64xbf16>
    %c0_19 = arith.constant 0 : index
    %c0_20 = arith.constant 0 : index
    %26 = vector.load %arg10[%c0_19, %c0_20] : memref<64x128xbf16, #tpu.memory_space<vmem>>, vector<64x128xbf16>
    %cst_21 = arith.constant dense<0.000000e+00> : vector<128x128xf32>
    %27 = tpu.matmul %25, %26, %cst_21 {dimension_numbers = #tpu.dot_dimension_numbers<[1], [0], [0], [1], [0, 0, 1, 1], [], []>} : vector<128x64xbf16>, vector<64x128xbf16>, vector<128x128xf32> -> vector<128x128xf32>
    %c0_22 = arith.constant 0 : index
    %c0_23 = arith.constant 0 : index
    %28 = vector.load %arg11[%c0_22, %c0_23] : memref<1x128xf32, #tpu.memory_space<vmem>>, vector<1x128xf32>
    %29 = vector.broadcast %28 : vector<1x128xf32> to vector<128x128xf32>
    %30 = arith.addf %27, %29 : vector<128x128xf32>
    %cst_24 = arith.constant 0.000000e+00 : f32
    %31 = vector.broadcast %cst_24 : f32 to vector<128x128xf32>
    %32 = arith.maximumf %30, %31 : vector<128x128xf32>
    %33 = arith.truncf %32 : vector<128x128xf32> to vector<128x128xbf16>
    %c0_25 = arith.constant 0 : index
    %c0_26 = arith.constant 0 : index
    %34 = vector.load %arg12[%c0_25, %c0_26] : memref<128x1024xbf16, #tpu.memory_space<vmem>>, vector<128x1024xbf16>
    %cst_27 = arith.constant dense<0.000000e+00> : vector<128x1024xf32>
    %35 = tpu.matmul %33, %34, %cst_27 {dimension_numbers = #tpu.dot_dimension_numbers<[1], [0], [0], [1], [0, 0, 1, 1], [], []>} : vector<128x128xbf16>, vector<128x1024xbf16>, vector<128x1024xf32> -> vector<128x1024xf32>
    %c0_28 = arith.constant 0 : index
    %c0_29 = arith.constant 0 : index
    %36 = vector.load %arg13[%c0_28, %c0_29] : memref<1x1024xf32, #tpu.memory_space<vmem>>, vector<1x1024xf32>
    %37 = vector.broadcast %36 : vector<1x1024xf32> to vector<128x1024xf32>
    %38 = arith.addf %35, %37 : vector<128x1024xf32>
    %cst_30 = arith.constant 0.000000e+00 : f32
    %39 = vector.broadcast %cst_30 : f32 to vector<128x1024xf32>
    %40 = arith.maximumf %38, %39 : vector<128x1024xf32>
    %c0_i32 = arith.constant 0 : i32
    %41 = arith.cmpi eq, %arg2, %c0_i32 : i32
    %42 = arith.extui %41 : i1 to i32
    %c0_i32_31 = arith.constant 0 : i32
    %43 = arith.cmpi ne, %42, %c0_i32_31 : i32
    scf.if %43 {
      %cst_35 = arith.constant 0.000000e+00 : f32
      %54 = vector.broadcast %cst_35 : f32 to vector<1x1x1x1024xf32>
      %c0_36 = arith.constant 0 : index
      %c0_37 = arith.constant 0 : index
      %c0_38 = arith.constant 0 : index
      %c0_39 = arith.constant 0 : index
      %55 = vector.load %arg14[%c0_36, %c0_37, %c0_38, %c0_39] : memref<1x1x1x1024xf32, #tpu.memory_space<vmem>>, vector<1x1x1x1024xf32>
      tpu.vector_store %arg14[%c0_36, %c0_37, %c0_38, %c0_39], %54 {strides = array<i32>} : memref<1x1x1x1024xf32, #tpu.memory_space<vmem>>, vector<1x1x1x1024xf32>,
    } else {
    }
    %c1_i32 = arith.constant 1 : i32
    %44 = arith.muli %arg1, %c1_i32 : i32
    %45 = arith.addi %44, %arg2 : i32
    %c128_i32 = arith.constant 128 : i32
    %46 = arith.muli %45, %c128_i32 : i32
    %c128_i32_32 = arith.constant 128 : i32
    %47 = arith.addi %46, %c128_i32_32 : i32
    %c200_i32 = arith.constant 200 : i32
    %48 = arith.cmpi sle, %47, %c200_i32 : i32
    %49 = arith.extui %48 : i1 to i32
    %c0_i32_33 = arith.constant 0 : i32
    %50 = arith.cmpi ne, %49, %c0_i32_33 : i32
    scf.if %50 {
      %c0_35 = arith.constant 0 : index
      %c0_36 = arith.constant 0 : index
      %c0_37 = arith.constant 0 : index
      %c0_38 = arith.constant 0 : index
      %54 = vector.load %arg14[%c0_35, %c0_36, %c0_37, %c0_38] : memref<1x1x1x1024xf32, #tpu.memory_space<vmem>>, vector<1x1x1x1024xf32>
      %55 = vector.shape_cast %54 : vector<1x1x1x1024xf32> to vector<1x1024xf32>
      %cst_39 = arith.constant dense<0xFF800000> : vector<1024xf32>
      %56 = vector.multi_reduction <maximumf>, %40, %cst_39 [0] : vector<128x1024xf32> to vector<1024xf32>
      %57 = vector.shape_cast %56 : vector<1024xf32> to vector<1x1024xf32>
      %58 = arith.maximumf %55, %57 : vector<1x1024xf32>
      %c0_40 = arith.constant 0 : index
      %c0_41 = arith.constant 0 : index
      %c0_42 = arith.constant 0 : index
      %c0_43 = arith.constant 0 : index
      %59 = vector.load %arg14[%c0_40, %c0_41, %c0_42, %c0_43] : memref<1x1x1x1024xf32, #tpu.memory_space<vmem>>, vector<1x1x1x1024xf32>
      %60 = vector.shape_cast %59 : vector<1x1x1x1024xf32> to vector<1x1024xf32>
      %61 = vector.shape_cast %58 : vector<1x1024xf32> to vector<1x1x1x1024xf32>
      tpu.vector_store %arg14[%c0_40, %c0_41, %c0_42, %c0_43], %61 {strides = array<i32>} : memref<1x1x1x1024xf32, #tpu.memory_space<vmem>>, vector<1x1x1x1024xf32>,
    } else {
    }
    %true = arith.constant true
    %51 = arith.xori %48, %true : i1
    %52 = arith.extui %51 : i1 to i32
    %c0_i32_34 = arith.constant 0 : i32
    %53 = arith.cmpi ne, %52, %c0_i32_34 : i32
    scf.if %53 {
      %54 = tpu.iota {dimensions = array<i32: 0>} : vector<128x1xi32>
      %55 = vector.broadcast %46 : i32 to vector<128x1xi32>
      %56 = arith.addi %55, %54 : vector<128x1xi32>
      %c200_i32_35 = arith.constant 200 : i32
      %57 = vector.broadcast %c200_i32_35 : i32 to vector<128x1xi32>
      %58 = arith.cmpi slt, %56, %57 : vector<128x1xi32>
      %cst_36 = arith.constant 0.000000e+00 : f32
      %59 = vector.shape_cast %58 : vector<128x1xi1> to vector<128x1xi1>
      %60 = vector.broadcast %59 : vector<128x1xi1> to vector<128x1024xi1>
      %61 = vector.broadcast %cst_36 : f32 to vector<128x1024xf32>
      %62 = arith.select %60, %40, %61 : vector<128x1024xi1>, vector<128x1024xf32>
      %c0_37 = arith.constant 0 : index
      %c0_38 = arith.constant 0 : index
      %c0_39 = arith.constant 0 : index
      %c0_40 = arith.constant 0 : index
      %63 = vector.load %arg14[%c0_37, %c0_38, %c0_39, %c0_40] : memref<1x1x1x1024xf32, #tpu.memory_space<vmem>>, vector<1x1x1x1024xf32>
      %64 = vector.shape_cast %63 : vector<1x1x1x1024xf32> to vector<1x1024xf32>
      %cst_41 = arith.constant dense<0xFF800000> : vector<1024xf32>
      %65 = vector.multi_reduction <maximumf>, %62, %cst_41 [0] : vector<128x1024xf32> to vector<1024xf32>
      %66 = vector.shape_cast %65 : vector<1024xf32> to vector<1x1024xf32>
      %67 = arith.maximumf %64, %66 : vector<1x1024xf32>
      %c0_42 = arith.constant 0 : index
      %c0_43 = arith.constant 0 : index
      %c0_44 = arith.constant 0 : index
      %c0_45 = arith.constant 0 : index
      %68 = vector.load %arg14[%c0_42, %c0_43, %c0_44, %c0_45] : memref<1x1x1x1024xf32, #tpu.memory_space<vmem>>, vector<1x1x1x1024xf32>
      %69 = vector.shape_cast %68 : vector<1x1x1x1024xf32> to vector<1x1024xf32>
      %70 = vector.shape_cast %67 : vector<1x1024xf32> to vector<1x1x1x1024xf32>
      tpu.vector_store %arg14[%c0_42, %c0_43, %c0_44, %c0_45], %70 {strides = array<i32>} : memref<1x1x1x1024xf32, #tpu.memory_space<vmem>>, vector<1x1x1x1024xf32>,
    } else {
    }
    return
  }
  func.func @transform_0(%arg0: i32, %arg1: i32, %arg2: i32) -> (i32, i32, i32) {
    %c1_i32 = arith.constant 1 : i32
    %0 = arith.muli %arg1, %c1_i32 : i32
    %1 = arith.addi %0, %arg2 : i32
    %c0_i32 = arith.constant 0 : i32
    %c0_i32_0 = arith.constant 0 : i32
    return %arg0, %1, %c0_i32 : i32, i32, i32
  }
  func.func @transform_1(%arg0: i32, %arg1: i32, %arg2: i32) -> (i32, i32) {
    %c0_i32 = arith.constant 0 : i32
    %c0_i32_0 = arith.constant 0 : i32
    %c0_i32_1 = arith.constant 0 : i32
    return %c0_i32, %c0_i32_0 : i32, i32
  }
  func.func @transform_2(%arg0: i32, %arg1: i32, %arg2: i32) -> (i32, i32) {
    %c0_i32 = arith.constant 0 : i32
    %c0_i32_0 = arith.constant 0 : i32
    %c0_i32_1 = arith.constant 0 : i32
    return %c0_i32, %c0_i32_0 : i32, i32
  }
  func.func @transform_3(%arg0: i32, %arg1: i32, %arg2: i32) -> (i32, i32) {
    %c0_i32 = arith.constant 0 : i32
    %c0_i32_0 = arith.constant 0 : i32
    %c0_i32_1 = arith.constant 0 : i32
    return %c0_i32, %c0_i32_0 : i32, i32
  }
  func.func @transform_4(%arg0: i32, %arg1: i32, %arg2: i32) -> (i32, i32) {
    %c0_i32 = arith.constant 0 : i32
    %c0_i32_0 = arith.constant 0 : i32
    %c0_i32_1 = arith.constant 0 : i32
    return %c0_i32, %c0_i32_0 : i32, i32
  }
  func.func @transform_5(%arg0: i32, %arg1: i32, %arg2: i32) -> (i32, i32) {
    %c0_i32 = arith.constant 0 : i32
    %c0_i32_0 = arith.constant 0 : i32
    %c0_i32_1 = arith.constant 0 : i32
    return %c0_i32, %c0_i32_0 : i32, i32
  }
  func.func @transform_6(%arg0: i32, %arg1: i32, %arg2: i32) -> (i32, i32) {
    %c0_i32 = arith.constant 0 : i32
    %c0_i32_0 = arith.constant 0 : i32
    %c0_i32_1 = arith.constant 0 : i32
    return %c0_i32, %c0_i32_0 : i32, i32
  }
  func.func @transform_7(%arg0: i32, %arg1: i32, %arg2: i32) -> (i32, i32) {
    %c0_i32 = arith.constant 0 : i32
    %c0_i32_0 = arith.constant 0 : i32
    %c0_i32_1 = arith.constant 0 : i32
    return %c0_i32, %c0_i32_0 : i32, i32
  }
  func.func @transform_8(%arg0: i32, %arg1: i32, %arg2: i32) -> (i32, i32) {
    %c0_i32 = arith.constant 0 : i32
    %c0_i32_0 = arith.constant 0 : i32
    %c0_i32_1 = arith.constant 0 : i32
    return %c0_i32, %c0_i32_0 : i32, i32
  }
  func.func @transform_9(%arg0: i32, %arg1: i32, %arg2: i32) -> (i32, i32) {
    %c0_i32 = arith.constant 0 : i32
    %c0_i32_0 = arith.constant 0 : i32
    %c0_i32_1 = arith.constant 0 : i32
    return %c0_i32, %c0_i32_0 : i32, i32
  }
  func.func @transform_10(%arg0: i32, %arg1: i32, %arg2: i32) -> (i32, i32) {
    %c0_i32 = arith.constant 0 : i32
    %c0_i32_0 = arith.constant 0 : i32
    %c0_i32_1 = arith.constant 0 : i32
    return %c0_i32, %c0_i32_0 : i32, i32
  }
  func.func @transform_11(%arg0: i32, %arg1: i32, %arg2: i32) -> (i32, i32, i32, i32) {
    %c0_i32 = arith.constant 0 : i32
    %c0_i32_0 = arith.constant 0 : i32
    %c0_i32_1 = arith.constant 0 : i32
    return %arg0, %arg1, %c0_i32, %c0_i32_0 : i32, i32, i32, i32
  }
}

module attributes {stable_mosaic.version = 11 : i64} {
  func.func @_decoder_kernel(%arg0: i32, %arg1: i32, %arg2: memref<1x128x4xbf16, #tpu.memory_space<vmem>>, %arg3: memref<1x1x512xf32, #tpu.memory_space<vmem>>, %arg4: memref<4x64xbf16, #tpu.memory_space<vmem>>, %arg5: memref<1x64xf32, #tpu.memory_space<vmem>>, %arg6: memref<64x64xbf16, #tpu.memory_space<vmem>>, %arg7: memref<1x64xf32, #tpu.memory_space<vmem>>, %arg8: memref<64x512xbf16, #tpu.memory_space<vmem>>, %arg9: memref<512x256xbf16, #tpu.memory_space<vmem>>, %arg10: memref<1x256xf32, #tpu.memory_space<vmem>>, %arg11: memref<256x128xbf16, #tpu.memory_space<vmem>>, %arg12: memref<1x128xf32, #tpu.memory_space<vmem>>, %arg13: memref<128x128xbf16, #tpu.memory_space<vmem>>, %arg14: memref<1x128xf32, #tpu.memory_space<vmem>>, %arg15: memref<128x8xbf16, #tpu.memory_space<vmem>>, %arg16: memref<1x8xf32, #tpu.memory_space<vmem>>, %arg17: memref<1x128x8xf32, #tpu.memory_space<vmem>>) attributes {dimension_semantics = [#tpu.dimension_semantics<parallel>, #tpu.dimension_semantics<parallel>], iteration_bounds = array<i64: 2, 2>, scalar_prefetch = 0 : i64, scratch_operands = 0 : i64, tpu.core_type = #tpu.core_type<tc>, window_params = [{transform_indices = @transform_0, window_bounds = array<i64: 1, 128, 4>}, {transform_indices = @transform_1, window_bounds = array<i64: 1, 1, 512>}, {pipeline_mode = #tpu.pipeline_mode<synchronous>, transform_indices = @transform_2, window_bounds = array<i64: 4, 64>}, {pipeline_mode = #tpu.pipeline_mode<synchronous>, transform_indices = @transform_3, window_bounds = array<i64: 1, 64>}, {pipeline_mode = #tpu.pipeline_mode<synchronous>, transform_indices = @transform_4, window_bounds = array<i64: 64, 64>}, {pipeline_mode = #tpu.pipeline_mode<synchronous>, transform_indices = @transform_5, window_bounds = array<i64: 1, 64>}, {pipeline_mode = #tpu.pipeline_mode<synchronous>, transform_indices = @transform_6, window_bounds = array<i64: 64, 512>}, {pipeline_mode = #tpu.pipeline_mode<synchronous>, transform_indices = @transform_7, window_bounds = array<i64: 512, 256>}, {pipeline_mode = #tpu.pipeline_mode<synchronous>, transform_indices = @transform_8, window_bounds = array<i64: 1, 256>}, {pipeline_mode = #tpu.pipeline_mode<synchronous>, transform_indices = @transform_9, window_bounds = array<i64: 256, 128>}, {pipeline_mode = #tpu.pipeline_mode<synchronous>, transform_indices = @transform_10, window_bounds = array<i64: 1, 128>}, {pipeline_mode = #tpu.pipeline_mode<synchronous>, transform_indices = @transform_11, window_bounds = array<i64: 128, 128>}, {pipeline_mode = #tpu.pipeline_mode<synchronous>, transform_indices = @transform_12, window_bounds = array<i64: 1, 128>}, {pipeline_mode = #tpu.pipeline_mode<synchronous>, transform_indices = @transform_13, window_bounds = array<i64: 128, 8>}, {pipeline_mode = #tpu.pipeline_mode<synchronous>, transform_indices = @transform_14, window_bounds = array<i64: 1, 8>}, {transform_indices = @transform_15, window_bounds = array<i64: 1, 128, 8>}]} {
    %c0 = arith.constant 0 : index
    %c0_0 = arith.constant 0 : index
    %c0_1 = arith.constant 0 : index
    %0 = vector.load %arg2[%c0, %c0_0, %c0_1] : memref<1x128x4xbf16, #tpu.memory_space<vmem>>, vector<1x128x4xbf16>
    %1 = vector.shape_cast %0 : vector<1x128x4xbf16> to vector<128x4xbf16>
    %c0_2 = arith.constant 0 : index
    %c0_3 = arith.constant 0 : index
    %2 = vector.load %arg4[%c0_2, %c0_3] : memref<4x64xbf16, #tpu.memory_space<vmem>>, vector<4x64xbf16>
    %cst = arith.constant dense<0.000000e+00> : vector<128x64xf32>
    %3 = tpu.matmul %1, %2, %cst {dimension_numbers = #tpu.dot_dimension_numbers<[1], [0], [0], [1], [0, 0, 1, 1], [], []>} : vector<128x4xbf16>, vector<4x64xbf16>, vector<128x64xf32> -> vector<128x64xf32>
    %c0_4 = arith.constant 0 : index
    %c0_5 = arith.constant 0 : index
    %4 = vector.load %arg5[%c0_4, %c0_5] : memref<1x64xf32, #tpu.memory_space<vmem>>, vector<1x64xf32>
    %5 = vector.broadcast %4 : vector<1x64xf32> to vector<128x64xf32>
    %6 = arith.addf %3, %5 : vector<128x64xf32>
    %cst_6 = arith.constant 0.000000e+00 : f32
    %7 = vector.broadcast %cst_6 : f32 to vector<128x64xf32>
    %8 = arith.maximumf %6, %7 : vector<128x64xf32>
    %9 = arith.truncf %8 : vector<128x64xf32> to vector<128x64xbf16>
    %c0_7 = arith.constant 0 : index
    %c0_8 = arith.constant 0 : index
    %10 = vector.load %arg6[%c0_7, %c0_8] : memref<64x64xbf16, #tpu.memory_space<vmem>>, vector<64x64xbf16>
    %cst_9 = arith.constant dense<0.000000e+00> : vector<128x64xf32>
    %11 = tpu.matmul %9, %10, %cst_9 {dimension_numbers = #tpu.dot_dimension_numbers<[1], [0], [0], [1], [0, 0, 1, 1], [], []>} : vector<128x64xbf16>, vector<64x64xbf16>, vector<128x64xf32> -> vector<128x64xf32>
    %c0_10 = arith.constant 0 : index
    %c0_11 = arith.constant 0 : index
    %12 = vector.load %arg7[%c0_10, %c0_11] : memref<1x64xf32, #tpu.memory_space<vmem>>, vector<1x64xf32>
    %13 = vector.broadcast %12 : vector<1x64xf32> to vector<128x64xf32>
    %14 = arith.addf %11, %13 : vector<128x64xf32>
    %cst_12 = arith.constant 0.000000e+00 : f32
    %15 = vector.broadcast %cst_12 : f32 to vector<128x64xf32>
    %16 = arith.maximumf %14, %15 : vector<128x64xf32>
    %17 = arith.truncf %16 : vector<128x64xf32> to vector<128x64xbf16>
    %c0_13 = arith.constant 0 : index
    %c0_14 = arith.constant 0 : index
    %18 = vector.load %arg8[%c0_13, %c0_14] : memref<64x512xbf16, #tpu.memory_space<vmem>>, vector<64x512xbf16>
    %cst_15 = arith.constant dense<0.000000e+00> : vector<128x512xf32>
    %19 = tpu.matmul %17, %18, %cst_15 {dimension_numbers = #tpu.dot_dimension_numbers<[1], [0], [0], [1], [0, 0, 1, 1], [], []>} : vector<128x64xbf16>, vector<64x512xbf16>, vector<128x512xf32> -> vector<128x512xf32>
    %c0_16 = arith.constant 0 : index
    %c0_17 = arith.constant 0 : index
    %c0_18 = arith.constant 0 : index
    %20 = vector.load %arg3[%c0_16, %c0_17, %c0_18] : memref<1x1x512xf32, #tpu.memory_space<vmem>>, vector<1x1x512xf32>
    %21 = vector.shape_cast %20 : vector<1x1x512xf32> to vector<1x512xf32>
    %22 = vector.broadcast %21 : vector<1x512xf32> to vector<128x512xf32>
    %23 = arith.addf %19, %22 : vector<128x512xf32>
    %cst_19 = arith.constant 0.000000e+00 : f32
    %24 = vector.broadcast %cst_19 : f32 to vector<128x512xf32>
    %25 = arith.maximumf %23, %24 : vector<128x512xf32>
    %26 = arith.truncf %25 : vector<128x512xf32> to vector<128x512xbf16>
    %c0_20 = arith.constant 0 : index
    %c0_21 = arith.constant 0 : index
    %27 = vector.load %arg9[%c0_20, %c0_21] : memref<512x256xbf16, #tpu.memory_space<vmem>>, vector<512x256xbf16>
    %cst_22 = arith.constant dense<0.000000e+00> : vector<128x256xf32>
    %28 = tpu.matmul %26, %27, %cst_22 {dimension_numbers = #tpu.dot_dimension_numbers<[1], [0], [0], [1], [0, 0, 1, 1], [], []>} : vector<128x512xbf16>, vector<512x256xbf16>, vector<128x256xf32> -> vector<128x256xf32>
    %c0_23 = arith.constant 0 : index
    %c0_24 = arith.constant 0 : index
    %29 = vector.load %arg10[%c0_23, %c0_24] : memref<1x256xf32, #tpu.memory_space<vmem>>, vector<1x256xf32>
    %30 = vector.broadcast %29 : vector<1x256xf32> to vector<128x256xf32>
    %31 = arith.addf %28, %30 : vector<128x256xf32>
    %cst_25 = arith.constant 0.000000e+00 : f32
    %32 = vector.broadcast %cst_25 : f32 to vector<128x256xf32>
    %33 = arith.maximumf %31, %32 : vector<128x256xf32>
    %34 = arith.truncf %33 : vector<128x256xf32> to vector<128x256xbf16>
    %c0_26 = arith.constant 0 : index
    %c0_27 = arith.constant 0 : index
    %35 = vector.load %arg11[%c0_26, %c0_27] : memref<256x128xbf16, #tpu.memory_space<vmem>>, vector<256x128xbf16>
    %cst_28 = arith.constant dense<0.000000e+00> : vector<128x128xf32>
    %36 = tpu.matmul %34, %35, %cst_28 {dimension_numbers = #tpu.dot_dimension_numbers<[1], [0], [0], [1], [0, 0, 1, 1], [], []>} : vector<128x256xbf16>, vector<256x128xbf16>, vector<128x128xf32> -> vector<128x128xf32>
    %c0_29 = arith.constant 0 : index
    %c0_30 = arith.constant 0 : index
    %37 = vector.load %arg12[%c0_29, %c0_30] : memref<1x128xf32, #tpu.memory_space<vmem>>, vector<1x128xf32>
    %38 = vector.broadcast %37 : vector<1x128xf32> to vector<128x128xf32>
    %39 = arith.addf %36, %38 : vector<128x128xf32>
    %cst_31 = arith.constant 0.000000e+00 : f32
    %40 = vector.broadcast %cst_31 : f32 to vector<128x128xf32>
    %41 = arith.maximumf %39, %40 : vector<128x128xf32>
    %42 = arith.truncf %41 : vector<128x128xf32> to vector<128x128xbf16>
    %c0_32 = arith.constant 0 : index
    %c0_33 = arith.constant 0 : index
    %43 = vector.load %arg13[%c0_32, %c0_33] : memref<128x128xbf16, #tpu.memory_space<vmem>>, vector<128x128xbf16>
    %cst_34 = arith.constant dense<0.000000e+00> : vector<128x128xf32>
    %44 = tpu.matmul %42, %43, %cst_34 {dimension_numbers = #tpu.dot_dimension_numbers<[1], [0], [0], [1], [0, 0, 1, 1], [], []>} : vector<128x128xbf16>, vector<128x128xbf16>, vector<128x128xf32> -> vector<128x128xf32>
    %c0_35 = arith.constant 0 : index
    %c0_36 = arith.constant 0 : index
    %45 = vector.load %arg14[%c0_35, %c0_36] : memref<1x128xf32, #tpu.memory_space<vmem>>, vector<1x128xf32>
    %46 = vector.broadcast %45 : vector<1x128xf32> to vector<128x128xf32>
    %47 = arith.addf %44, %46 : vector<128x128xf32>
    %cst_37 = arith.constant 0.000000e+00 : f32
    %48 = vector.broadcast %cst_37 : f32 to vector<128x128xf32>
    %49 = arith.maximumf %47, %48 : vector<128x128xf32>
    %50 = arith.truncf %49 : vector<128x128xf32> to vector<128x128xbf16>
    %c0_38 = arith.constant 0 : index
    %c0_39 = arith.constant 0 : index
    %51 = vector.load %arg15[%c0_38, %c0_39] : memref<128x8xbf16, #tpu.memory_space<vmem>>, vector<128x8xbf16>
    %cst_40 = arith.constant dense<0.000000e+00> : vector<128x8xf32>
    %52 = tpu.matmul %50, %51, %cst_40 {dimension_numbers = #tpu.dot_dimension_numbers<[1], [0], [0], [1], [0, 0, 1, 1], [], []>} : vector<128x128xbf16>, vector<128x8xbf16>, vector<128x8xf32> -> vector<128x8xf32>
    %c0_41 = arith.constant 0 : index
    %c0_42 = arith.constant 0 : index
    %53 = vector.load %arg16[%c0_41, %c0_42] : memref<1x8xf32, #tpu.memory_space<vmem>>, vector<1x8xf32>
    %54 = vector.broadcast %53 : vector<1x8xf32> to vector<128x8xf32>
    %55 = arith.addf %52, %54 : vector<128x8xf32>
    %c0_43 = arith.constant 0 : index
    %c0_44 = arith.constant 0 : index
    %c0_45 = arith.constant 0 : index
    %56 = vector.load %arg17[%c0_43, %c0_44, %c0_45] : memref<1x128x8xf32, #tpu.memory_space<vmem>>, vector<1x128x8xf32>
    %57 = vector.shape_cast %56 : vector<1x128x8xf32> to vector<128x8xf32>
    %58 = vector.shape_cast %55 : vector<128x8xf32> to vector<1x128x8xf32>
    tpu.vector_store %arg17[%c0_43, %c0_44, %c0_45], %58 {strides = array<i32>} : memref<1x128x8xf32, #tpu.memory_space<vmem>>, vector<1x128x8xf32>,
    return
  }
  func.func @transform_0(%arg0: i32, %arg1: i32) -> (i32, i32, i32) {
    %c0_i32 = arith.constant 0 : i32
    %c0_i32_0 = arith.constant 0 : i32
    return %arg0, %arg1, %c0_i32 : i32, i32, i32
  }
  func.func @transform_1(%arg0: i32, %arg1: i32) -> (i32, i32, i32) {
    %c0_i32 = arith.constant 0 : i32
    %c0_i32_0 = arith.constant 0 : i32
    %c0_i32_1 = arith.constant 0 : i32
    return %arg0, %c0_i32, %c0_i32_0 : i32, i32, i32
  }
  func.func @transform_2(%arg0: i32, %arg1: i32) -> (i32, i32) {
    %c0_i32 = arith.constant 0 : i32
    %c0_i32_0 = arith.constant 0 : i32
    %c0_i32_1 = arith.constant 0 : i32
    return %c0_i32, %c0_i32_0 : i32, i32
  }
  func.func @transform_3(%arg0: i32, %arg1: i32) -> (i32, i32) {
    %c0_i32 = arith.constant 0 : i32
    %c0_i32_0 = arith.constant 0 : i32
    %c0_i32_1 = arith.constant 0 : i32
    return %c0_i32, %c0_i32_0 : i32, i32
  }
  func.func @transform_4(%arg0: i32, %arg1: i32) -> (i32, i32) {
    %c0_i32 = arith.constant 0 : i32
    %c0_i32_0 = arith.constant 0 : i32
    %c0_i32_1 = arith.constant 0 : i32
    return %c0_i32, %c0_i32_0 : i32, i32
  }
  func.func @transform_5(%arg0: i32, %arg1: i32) -> (i32, i32) {
    %c0_i32 = arith.constant 0 : i32
    %c0_i32_0 = arith.constant 0 : i32
    %c0_i32_1 = arith.constant 0 : i32
    return %c0_i32, %c0_i32_0 : i32, i32
  }
  func.func @transform_6(%arg0: i32, %arg1: i32) -> (i32, i32) {
    %c0_i32 = arith.constant 0 : i32
    %c0_i32_0 = arith.constant 0 : i32
    %c0_i32_1 = arith.constant 0 : i32
    return %c0_i32, %c0_i32_0 : i32, i32
  }
  func.func @transform_7(%arg0: i32, %arg1: i32) -> (i32, i32) {
    %c0_i32 = arith.constant 0 : i32
    %c0_i32_0 = arith.constant 0 : i32
    %c0_i32_1 = arith.constant 0 : i32
    return %c0_i32, %c0_i32_0 : i32, i32
  }
  func.func @transform_8(%arg0: i32, %arg1: i32) -> (i32, i32) {
    %c0_i32 = arith.constant 0 : i32
    %c0_i32_0 = arith.constant 0 : i32
    %c0_i32_1 = arith.constant 0 : i32
    return %c0_i32, %c0_i32_0 : i32, i32
  }
  func.func @transform_9(%arg0: i32, %arg1: i32) -> (i32, i32) {
    %c0_i32 = arith.constant 0 : i32
    %c0_i32_0 = arith.constant 0 : i32
    %c0_i32_1 = arith.constant 0 : i32
    return %c0_i32, %c0_i32_0 : i32, i32
  }
  func.func @transform_10(%arg0: i32, %arg1: i32) -> (i32, i32) {
    %c0_i32 = arith.constant 0 : i32
    %c0_i32_0 = arith.constant 0 : i32
    %c0_i32_1 = arith.constant 0 : i32
    return %c0_i32, %c0_i32_0 : i32, i32
  }
  func.func @transform_11(%arg0: i32, %arg1: i32) -> (i32, i32) {
    %c0_i32 = arith.constant 0 : i32
    %c0_i32_0 = arith.constant 0 : i32
    %c0_i32_1 = arith.constant 0 : i32
    return %c0_i32, %c0_i32_0 : i32, i32
  }
  func.func @transform_12(%arg0: i32, %arg1: i32) -> (i32, i32) {
    %c0_i32 = arith.constant 0 : i32
    %c0_i32_0 = arith.constant 0 : i32
    %c0_i32_1 = arith.constant 0 : i32
    return %c0_i32, %c0_i32_0 : i32, i32
  }
  func.func @transform_13(%arg0: i32, %arg1: i32) -> (i32, i32) {
    %c0_i32 = arith.constant 0 : i32
    %c0_i32_0 = arith.constant 0 : i32
    %c0_i32_1 = arith.constant 0 : i32
    return %c0_i32, %c0_i32_0 : i32, i32
  }
  func.func @transform_14(%arg0: i32, %arg1: i32) -> (i32, i32) {
    %c0_i32 = arith.constant 0 : i32
    %c0_i32_0 = arith.constant 0 : i32
    %c0_i32_1 = arith.constant 0 : i32
    return %c0_i32, %c0_i32_0 : i32, i32
  }
  func.func @transform_15(%arg0: i32, %arg1: i32) -> (i32, i32, i32) {
    %c0_i32 = arith.constant 0 : i32
    %c0_i32_0 = arith.constant 0 : i32
    return %arg0, %arg1, %c0_i32 : i32, i32, i32
  }
}

</mosaic_0001>

<bundles_post_ra>
// kernel: tpu_custom_call.1
= control target key start
LH: loop header
LB: loop body
LE: loop exit
PB: predicated region body
PF: predicated region fallthrough
CT: control target
= control target key end

     0   :  { %6 = vsyncpa [#allocation3], 0  ;;  %s340_s0 = inlined_call_operand.hbm [shape: f32[8,128], index: 0, kind: input, shape index: {}]   ;;  %s341_s1 = inlined_call_operand.hbm [shape: f32[8,128], index: 1, kind: output, shape index: {}]  }
   0x1   :  { %7 = vsyncpa [#allocation4], 0  ;;  %s261_s6 = smov 0  }
   0x2 LB: > { %s144_s7 = sadd.s32 4294967295, %s247_s6   ;;  %p145_p0 = scmp.ge.s32.totalorder %s247_s6, 1  ;;  %s247_s6 = sphi %s261_s6, %s13_s6  }
   0x3   : > { %p60_p1 = scmp.lt.s32.totalorder %s247_s6, 3  ;;  %p275_p3 = scmp.eq.s32.totalorder %s144_s7, 0 }
   0x4   : > { %s249_s10 = smov [#allocation2]   ;;  %s179_s15 = scalar_lea.hbm %s340_s0, 128 }
   0x5   : > { %p269_p2 = pnand %p145_p0, %p60_p1  ;;  %s73_s11 = sshll.u32 %s249_s10, 4  ;;  %s74_s11 = int_to_ptr.vmem [resolvable:$true] %s73_s11 }
   0x6   : > { %s346_s9 = scalar_select %p275_p3, 1, 0 }
   0x7   : > { %s345_s8 = scalar_select %p269_p2, 1, 0 }
   0x8   : > { %p161_p4 = pneg %p269_p2  ;;  %p180_p6 = scmp.ne.s32.totalorder %s340_s0, %s179_s15 }
   0x9   : > { %p186_p10 = scmp.lt.u32.totalorder %s179_s15, %s340_s0 }
   0xa   : > { %p283_p5 = pnand %p275_p3, %p161_p4 }
   0xc   : > { %p181_p7 = pneg %p283_p5 }
   0xe   : > { %p182_p8 = pnand %p181_p7, %p180_p6 }
  0x10   : > { %p183_p9 = pneg %p182_p8 }
  0x12   : > { %p188_p11 = pnand %p186_p10, %p183_p9 }
  0x14   : > { %191 = shalt.err (!%p188_p11)
}
  0x15   : > { %s192_s20 = scalar_lea.vmem %s74_s11, 128  ;;  %p200_p1 = scmp.lt.s32.totalorder %s74_s11, %s74_s11 }
  0x16   : > { %p193_p12 = scmp.ne.s32.totalorder %s74_s11, %s192_s20  ;;  %p201_p4 = scmp.lt.s32.totalorder %s192_s20, %s192_s20 }
  0x18   : > { %p195_p13 = pnand %p193_p12, %p181_p7  ;;  %p202_p3 = por %p201_p4, %p200_p1 }
  0x1a   : > { %p196_p0 = pneg %p195_p13 }
  0x1c   : > { %p203_p2 = pnand %p202_p3, %p196_p0 }
  0x1e   : > { %206 = shalt.err (!%p203_p2)
}
  0x1f   : > { %164 = dma.hbm_to_vmem [thread:$0]  (!%p283_p5), %s340_s0, 128, %s74_s11, [#allocation3]  }
  0x20   : > { %p348_p6 = scmp.ne.s32.totalorder %s345_s8, 0 }
  0x21   : > { %p349_p8 = scmp.ne.s32.totalorder (!%p348_p6), %s346_s9, 0 }
  0x22   : > { %86 = sbr.rel (%p348_p6) target bundleno = 67 (0x43), region = 24 }
  0x29   : > { %238 = dma.done.wait (%p349_p8), [#allocation3], 128  }
  0x2a   : > { %240 = vsyncadd (%p349_p8), [#allocation3], 4294967168  ;;  %s250_s23 = smov [#allocation5]   ;;  %p311_p2 = scmp.eq.s32.totalorder %s144_s7, 1  ;;  %v96_v0 = vld [vmem:[#allocation2] sm:$0xff] }
  0x2b   : > { %s105_s24 = sshll.u32 %s250_s23, 4  ;;  %97 = vst [vmem:[#allocation5] sm:$0xff] %v96_v0  ;;  %s106_s24 = int_to_ptr.vmem [resolvable:$true] %s105_s24 }
  0x2c   : > { %s207_s26 = scalar_lea.vmem %s106_s24, 128  ;;  %p214_p9 = scmp.lt.s32.totalorder %s106_s24, %s106_s24 }
  0x2d   : > { %p208_p3 = scmp.ne.s32.totalorder %s106_s24, %s207_s26  ;;  %p215_p10 = scmp.lt.s32.totalorder %s207_s26, %s207_s26 }
  0x2f   : > { %p209_p5 = pnand %p208_p3, %p311_p2  ;;  %p216_p11 = por %p215_p10, %p214_p9 }
  0x31   : > { %p210_p7 = pneg %p209_p5 }
  0x33   : > { %p217_p12 = pnand %p216_p11, %p210_p7 }
  0x35   : > { %220 = shalt.err (!%p217_p12)
}
  0x36   : > { %s221_s29 = scalar_lea.hbm %s341_s1, 128 }
  0x37   : > { %p222_p13 = scmp.ne.s32.totalorder %s341_s1, %s221_s29  ;;  %p227_p4 = scmp.lt.u32.totalorder %s221_s29, %s341_s1 }
  0x39   : > { %p223_p0 = pnand %p222_p13, %p311_p2 }
  0x3b   : > { %p224_p1 = pneg %p223_p0 }
  0x3d   : > { %p229_p6 = pnand %p227_p4, %p224_p1 }
  0x3f   : > { %232 = shalt.err (!%p229_p6)
}
  0x40   : > { %158 = dma.vmem_to_hbm [thread:$0]  (%p311_p2), %s106_s24, 128, %s341_s1, [#allocation4]  }
  0x41   : > { %242 = dma.done.wait (%p311_p2), [#allocation4], 128  }
  0x42   : > { %244 = vsyncadd (%p311_p2), [#allocation4], 4294967168 }
  0x43 PF: > { %s13_s6 = sadd.s32 1, %s247_s6  }
  0x44   : > { %p10_p8 = scmp.ge.s32.totalorder %s13_s6, 4  }
  0x46   :  { %12 = sbr.rel (!%p10_p8) target bundleno = 2 (0x2), region = 53 }
  0x4d   :  { %118 = vsyncpa [#allocation3], 1 }
  0x4e   :  { %120 = vsyncpa [#allocation3 + $0x1], 1 }
  0x4f   :  { %121 = vsyncpa [#allocation4], 1 }
  0x50   :  { %123 = vsyncpa [#allocation4 + $0x1], 1 }

// kernel: _forward.3
= control target key start
LH: loop header
LB: loop body
LE: loop exit
PB: predicated region body
PF: predicated region fallthrough
CT: control target
= control target key end

     0   :  { %s3609_s18 = smov 0   ;;  %s3611_s19 = smov 0   ;;  %s4337_s0 = inlined_call_operand.vmem [shape: bf16[2,256,4], index: 0, kind: input, shape index: {}]   ;;  %s4338_s1 = inlined_call_operand.vmem [shape: f32[2,1,512], index: 1, kind: input, shape index: {}]   ;;  %s4339_s2 = inlined_call_operand.vmem [shape: bf16[4,64], index: 2, kind: input, shape index: {}]   ;;  %s4340_s3 = inlined_call_operand.vmem [shape: f32[1,64], index: 3, kind: input, shape index: {}]   ;;  %s4341_s4 = inlined_call_operand.vmem [shape: bf16[64,64], index: 4, kind: input, shape index: {}]   ;;  %s4342_s5 = inlined_call_operand.vmem [shape: f32[1,64], index: 5, kind: input, shape index: {}]   ;;  %s4343_s6 = inlined_call_operand.vmem [shape: bf16[64,512], index: 6, kind: input, shape index: {}]   ;;  %s4344_s7 = inlined_call_operand.vmem [shape: bf16[512,256], index: 7, kind: input, shape index: {}]   ;;  %s4345_s8 = inlined_call_operand.vmem [shape: f32[1,256], index: 8, kind: input, shape index: {}]   ;;  %s4346_s9 = inlined_call_operand.vmem [shape: bf16[256,128], index: 9, kind: input, shape index: {}]   ;;  %s4347_s10 = inlined_call_operand.vmem [shape: f32[1,128], index: 10, kind: input, shape index: {}]   ;;  %s4348_s11 = inlined_call_operand.vmem [shape: bf16[128,128], index: 11, kind: input, shape index: {}]   ;;  %s4349_s12 = inlined_call_operand.vmem [shape: f32[1,128], index: 12, kind: input, shape index: {}]   ;;  %s4350_s13 = inlined_call_operand.vmem [shape: bf16[128,8], index: 13, kind: input, shape index: {}]   ;;  %s4351_s14 = inlined_call_operand.vmem [shape: f32[1,8], index: 14, kind: input, shape index: {}]   ;;  %s4352_s15 = inlined_call_operand.vmem [shape: f32[2,256,8], index: 15, kind: output, shape index: {}]  }
   0x1   :  { %4353 = sst [smem:[#allocation3_spill]] %s4339_s2  ;;  %s3613_s20 = smov 0  }
   0x2   :  { %s3615_s21 = smov 0   ;;  %s3617_s22 = smov 0  }
   0x3 LB: > { %s34_s23 = sadd.s32 1, %s3518_s20  ;;  %s37_s24 = sadd.s32 1, %s3522_s21  ;;  %s3526_s22 = sphi %s3617_s22, %s25_s22   ;;  %s3522_s21 = sphi %s3615_s21, %s4360_s21   ;;  %s3518_s20 = sphi %s3613_s20, %s4359_s20   ;;  %s3514_s19 = sphi %s3611_s19, %s4358_s19   ;;  %s3510_s18 = sphi %s3609_s18, %s4357_s18  }
   0x4   : > { %p35_p0 = scmp.ge.s32.totalorder %s34_s23, 2  ;;  %p2824_p1 = scmp.ge.s32.totalorder %s3526_s22, 1 }
   0x5   : > { %p467_p2 = scmp.lt.s32.totalorder %s3526_s22, 5 }
   0x6   : > { %s4362_s23 = smov (%p35_p0, %s34_s23), 0  ;;  %s4364_s24 = smov (!%p35_p0, %s37_s24), %s3522_s21 }
   0x7   : > { %p468_p3 = pnand %p2824_p1, %p467_p2  ;;  %p39_p4 = scmp.ge.s32.totalorder %s4364_s24, 2 }
   0x8   : > { %s4355_s2 = sld [smem:[#allocation3_spill]] (!%p468_p3)  ;;  %vm641_vm0 = vcmask (!%p468_p3), 1041408   ;;  %s2825_s27 = sshll.u32 (!%p468_p3), %s3510_s18, 4  ;;  %v3332_v2 = vld [vmem:[%s4341_s4] sm:$0xff] (!%p468_p3)   ;;  %v3333_v3 = vld [vmem:[%s4341_s4 + $0x8] sm:$0xff] (!%p468_p3)   ;;  %vm616_vm1 = vcmask (!%p468_p3), 31744  }
   0x9   : > { %s4366_s24 = smov (%p39_p4, %s4364_s24), 0  ;;  %471 = sbr.rel (%p468_p3) target bundleno = 1693 (0x69d), region = 80 }
   0xa   : > { %4354 = sst [smem:[#allocation2_spill]] %s4366_s24  ;;  %p528_p5 = scmp.lt.s32.totalorder (!%p468_p3), %s3514_s19, 1  ;;  %3130 = vmatprep.subr.bf16.mxu1 (!%p468_p3), %v3332_v2  ;;  %v3334_v12 = vld [vmem:[%s4341_s4 + $0x10] sm:$0xff] (!%p468_p3)   ;;  %v3335_v13 = vld [vmem:[%s4341_s4 + $0x18] sm:$0xff] (!%p468_p3)   ;;  %v3695_v21 = vld [vmem:[%s4340_s3] ss:$0 sm:$0xff] (!%p468_p3) }
   0xb   : > { %p530_p6 = scmp.lt.s32.totalorder (!%p468_p3), %s2825_s27, 31  ;;  %3131 = vmatpush3.bf16.msra.mxu1 (!%p468_p3), %v3332_v2  ;;  %v3336_v14 = vld [vmem:[%s4343_s6] ss:$16 sps:$4 sm:$0xff] (!%p468_p3)   ;;  %v3338_v15 = vld [vmem:[%s4343_s6 + $0x4] ss:$16 sps:$4 sm:$0xff] (!%p468_p3)   ;;  %vm805_vm2 = vcmask (!%p468_p3), 523264  }
   0xc   : > { %3132 = vmatprep.subr.bf16.mxu1 (!%p468_p3), %v3333_v3  ;;  %v3341_v16 = vld [vmem:[%s4343_s6 + $0x24] ss:$16 sps:$4 sm:$0xff] (!%p468_p3)   ;;  %v3347_v17 = vld [vmem:[%s4343_s6 + $0xc] ss:$16 sps:$4 sm:$0xff] (!%p468_p3)   ;;  %v3339_v18 = vld [vmem:[%s4343_s6 + $0x20] ss:$16 sps:$4 sm:$0xff] (!%p468_p3)  }
   0xd   : > { %v3344_v19 = vld [vmem:[%s4343_s6 + $0x44] ss:$16 sps:$4 sm:$0xff] (!%p468_p3)   ;;  %v3342_v20 = vld [vmem:[%s4343_s6 + $0x40] ss:$16 sps:$4 sm:$0xff] (!%p468_p3)   ;;  %v3345_v37 = vld [vmem:[%s4343_s6 + $0x8] ss:$16 sps:$4 sm:$0xff] (!%p468_p3)  }
   0xe   : > { %v568_v0 = vld [vmem:[%s4355_s2] sm:$0x3] (!%p468_p3)  ;;  %v3350_v40 = vld [vmem:[%s4343_s6 + $0x2c] ss:$16 sps:$4 sm:$0xff] (!%p468_p3)   ;;  %v3348_v48 = vld [vmem:[%s4343_s6 + $0x28] ss:$16 sps:$4 sm:$0xff] (!%p468_p3)  }
   0xf   : > { %3282 = vmatprep.subr.msk.bf16.mxu0 (!%p468_p3), %vm641_vm0, %v568_v0  ;;  %v643_v1 = vsel (!%p468_p3), %vm641_vm0, %v568_v0, 0  ;;  %3133 = vmatpush3.bf16.msra.mxu1 (!%p468_p3), %v3333_v3  ;;  %vm2701_vm3 = vcmask (!%p468_p3), 64512  }
  0x10   : > { %3113 = vmatpush3.bf16.msra.mxu0 %v643_v1  ;;  %s4368_s19 = smov (!%p528_p5, %s3514_s19), 1  ;;  %s4370_s27 = smov (!%p530_p6, %s2825_s27), 31  ;;  %3134 = vmatprep.subr.bf16.mxu1 %v3334_v12 }
  0x11   : > { %s2826_s17 = sshll.u32 %s4368_s19, 5  ;;  %1093 = vmatprep.subr.bf16.mxu0 %v3338_v15 }
  0x12   : > { %s3651_s18 = sadd.s32 %s2826_s17, %s4370_s27  ;;  %s2828_s17 = sshll.u32 %s4368_s19, 2 }
  0x13   : > { %s2827_s25 = sshll.u32 %s3651_s18, 2  ;;  %3135 = vmatpush3.bf16.msra.mxu1 %v3334_v12  ;;  %s540_s26 = scalar_lea.vmem %s4338_s1, %s2828_s17 }
  0x14   : > { %s535_s24 = scalar_lea.vmem %s4337_s0, %s2827_s25  ;;  %3136 = vmatprep.subr.bf16.mxu1 %v3335_v13  ;;  %s2831_s19 = sshll.u32 %s3651_s18, 3 }
  0x15   : > { %v3324_v4 = vld [vmem:[%s535_s24] sm:$0xff]   ;;  %v3325_v5 = vld [vmem:[%s535_s24 + $0x8] sm:$0xff]   ;;  %v3326_v6 = vld [vmem:[%s535_s24 + $0x10] sm:$0xff]   ;;  %s4288_s30 = scalar_lea.vmem %s4352_s15, %s2831_s19 }
  0x16   : > { %3114 = vmatprep.mubr.msk.bf16.mxu0 %vm616_vm1, %v3324_v4  ;;  %v3327_v7 = vld [vmem:[%s535_s24 + $0x18] sm:$0xff]   ;;  %v3328_v8 = vld [vmem:[%s535_s24 + $0x20] sm:$0xff]   ;;  %v3329_v9 = vld [vmem:[%s535_s24 + $0x28] sm:$0xff]  }
  0x17   : > { %3115 = vmatmul.mubr.msk.bf16.vlgmr.msra.gmra.mrb[0].mxu0 %vm616_vm1, %v3325_v5  ;;  %v3330_v10 = vld [vmem:[%s535_s24 + $0x30] sm:$0xff]   ;;  %v3331_v11 = vld [vmem:[%s535_s24 + $0x38] sm:$0xff]   ;;  %3137 = vmatpush3.bf16.msra.mxu1 %v3335_v13 }
  0x18   : > { %3118 = vmatprep.mubr.msk.bf16.mxu0 %vm616_vm1, %v3326_v6  ;;  %1094 = vmatpush1.bf16.msra.mxu0 %v3336_v14 }
  0x19   : > { %1095 = vmatprep.subr.bf16.mxu0 %v3341_v16  ;;  %1206 = vmatprep.subr.bf16.mxu1 %v3347_v17  ;;  %v3356_v17 = vld [vmem:[%s4343_s6 + $0x4c] ss:$16 sps:$4 sm:$0xff]  }
  0x1c   : > { %1096 = vmatpush1.bf16.msra.mxu0 %v3339_v18  ;;  %v3354_v18 = vld [vmem:[%s4343_s6 + $0x48] ss:$16 sps:$4 sm:$0xff]  }
  0x1d   : > { %1097 = vmatprep.subr.bf16.mxu0 %v3344_v19  ;;  %v3351_v19 = vld [vmem:[%s4343_s6 + $0x60] ss:$16 sps:$4 sm:$0xff]  }
  0x1f   : > { %3119 = vmatmul.mubr.msk.bf16.gmra.mrb[4].mxu0 %vm616_vm1, %v3327_v7 }
  0x20   : > { %3122 = vmatprep.mubr.msk.bf16.mxu0 %vm616_vm1, %v3328_v8  ;;  %1098 = vmatpush1.bf16.msra.mxu0 %v3342_v20  ;;  %v3353_v20 = vld [vmem:[%s4343_s6 + $0x64] ss:$16 sps:$4 sm:$0xff]  }
  0x21   : > { %1099 = vmatprep.subr.bf16.mxu0 %v3353_v20 }
  0x24   : > { %1100 = vmatpush1.bf16.msra.mxu0 %v3351_v19 }
  0x27   : > { %3123 = vmatmul.mubr.msk.bf16.gmra.mrb[8].mxu0 %vm616_vm1, %v3329_v9 }
  0x28   : > { %3126 = vmatprep.mubr.msk.bf16.mxu0 %vm616_vm1, %v3330_v10 }
  0x2f   : > { %3127 = vmatmul.mubr.msk.bf16.gmra.mrb[12].mxu0 %vm616_vm1, %v3331_v11 }
  0xea   : > { %v3116_v22 = vpop.f32.mrb[0].mxu0 }
  0xeb   : > { %v688_v23 = vadd.f32 %v3116_v22, %v3695_v21  ;;  %v679_v24 = vpop.f32.mrb[1].mxu0  ;;  %v3357_v22 = vld [vmem:[%s4343_s6 + $0x68] ss:$16 sps:$4 sm:$0xff]  }
  0xec   : > { %v680_v25 = vadd.f32 %v3695_v21, %v679_v24  ;;  %v3117_v26 = vpop.f32.mrb[2].mxu0  ;;  %v3362_v24 = vld [vmem:[%s4344_s7 + $0x4] ss:$8 sps:$4 sm:$0xff]  }
  0xed   : > { %v691_v27 = vadd.f32 %v3117_v26, %v3695_v21  ;;  %v682_v28 = vpop.f32.mrb[3].mxu0  ;;  %v744_v30 = vmax.f32 %v688_v23, 0.0  ;;  %v3528_v23 = vmov 0   ;;  %1811 = vmatprep.subr.bf16.mxu0 %v3362_v24 }
  0xee   : > { %v683_v29 = vadd.f32 %v3695_v21, %v682_v28  ;;  %v742_v32 = vmax.f32 %v680_v25, 0.0  ;;  %1125 = vmatprep.mubr.bf16.mxu0 %v3528_v23  ;;  %v3756_v25 = vld [vmem:[%s4342_s5] ss:$0 sm:$0xff] }
  0xef   : > { %v745_v31 = vmax.f32 %v691_v27, 0.0 }
  0xf0   : > { %v743_v33 = vmax.f32 %v683_v29, 0.0 }
  0xf1   : > { %v759_v34 = vpack.c.bf16 %v745_v31, %v744_v30 }
  0xf2   : > { %v3120_v35 = vpop.f32.mrb[4].mxu0  ;;  %v758_v36 = vpack.c.bf16 %v743_v33, %v742_v32 }
  0xf3   : > { %v704_v38 = vadd.f32 %v3120_v35, %v3695_v21  ;;  %v695_v39 = vpop.f32.mrb[5].mxu0 }
  0xf4   : > { %v696_v41 = vadd.f32 %v3695_v21, %v695_v39  ;;  %3138 = vmatprep.mubr.msk.bf16.mxu1 %vm805_vm2, %v758_v36  ;;  %v3121_v42 = vpop.f32.mrb[6].mxu0 }
  0xf5   : > { %v748_v43 = vmax.f32 %v704_v38, 0.0  ;;  %v707_v44 = vadd.f32 %v3121_v42, %v3695_v21  ;;  %3139 = vmatmul.mubr.msk.bf16.vlgmr.msra.gmra.mrb[0].mxu1 %vm805_vm2, %v759_v34  ;;  %v698_v45 = vpop.f32.mrb[7].mxu0 }
  0xf6   : > { %v746_v46 = vmax.f32 %v696_v41, 0.0  ;;  %v699_v47 = vadd.f32 %v3695_v21, %v698_v45  ;;  %1207 = vmatpush1.bf16.msra.mxu1 %v3345_v37  ;;  %v3360_v41 = vld [vmem:[%s4344_s7] ss:$8 sps:$4 sm:$0xff]  }
  0xf7   : > { %v749_v49 = vmax.f32 %v707_v44, 0.0  ;;  %1208 = vmatprep.subr.bf16.mxu1 %v3350_v40  ;;  %v3365_v44 = vld [vmem:[%s4344_s7 + $0x14] ss:$8 sps:$4 sm:$0xff]  }
  0xf8   : > { %v747_v50 = vmax.f32 %v699_v47, 0.0 }
  0xf9   : > { %v761_v51 = vpack.c.bf16 %v749_v49, %v748_v43 }
  0xfa   : > { %v760_v52 = vpack.c.bf16 %v747_v50, %v746_v46  ;;  %v3124_v53 = vpop.f32.mrb[8].mxu0  ;;  %1209 = vmatpush1.bf16.msra.mxu1 %v3348_v48 }
  0xfb   : > { %v720_v54 = vadd.f32 %v3124_v53, %v3695_v21  ;;  %v711_v55 = vpop.f32.mrb[9].mxu0  ;;  %1210 = vmatprep.subr.bf16.mxu1 %v3356_v17 }
  0xfc   : > { %3142 = vmatprep.mubr.msk.bf16.mxu1 %vm805_vm2, %v760_v52  ;;  %v712_v56 = vadd.f32 %v3695_v21, %v711_v55  ;;  %v3125_v57 = vpop.f32.mrb[10].mxu0  ;;  %v3363_v52 = vld [vmem:[%s4344_s7 + $0x10] ss:$8 sps:$4 sm:$0xff]  }
  0xfd   : > { %3143 = vmatmul.mubr.msk.bf16.gmra.mrb[4].mxu1 %vm805_vm2, %v761_v51  ;;  %v752_v58 = vmax.f32 %v720_v54, 0.0  ;;  %v723_v59 = vadd.f32 %v3125_v57, %v3695_v21  ;;  %v714_v60 = vpop.f32.mrb[11].mxu0  ;;  %v3368_v54 = vld [vmem:[%s4344_s7 + $0x24] ss:$8 sps:$4 sm:$0xff]  }
  0xfe   : > { %v750_v61 = vmax.f32 %v712_v56, 0.0  ;;  %v715_v62 = vadd.f32 %v3695_v21, %v714_v60  ;;  %1211 = vmatpush1.bf16.msra.mxu1 %v3354_v18 }
  0xff   : > { %v753_v63 = vmax.f32 %v723_v59, 0.0  ;;  %v3366_v59 = vld [vmem:[%s4344_s7 + $0x20] ss:$8 sps:$4 sm:$0xff]  }
 0x100   : > { %v751_v0 = vmax.f32 %v715_v62, 0.0  ;;  %v3371_v62 = vld [vmem:[%s4344_s7 + $0x34] ss:$8 sps:$4 sm:$0xff]  }
 0x101   : > { %v763_v1 = vpack.c.bf16 %v753_v63, %v752_v58 }
 0x102   : > { %v762_v2 = vpack.c.bf16 %v751_v0, %v750_v61  ;;  %v3128_v3 = vpop.f32.mrb[12].mxu0 }
 0x103   : > { %v736_v4 = vadd.f32 %v3128_v3, %v3695_v21  ;;  %v727_v5 = vpop.f32.mrb[13].mxu0 }
 0x104   : > { %3146 = vmatprep.mubr.msk.bf16.mxu1 %vm805_vm2, %v762_v2  ;;  %v728_v6 = vadd.f32 %v3695_v21, %v727_v5  ;;  %v3129_v7 = vpop.f32.mrb[14].mxu0 }
 0x105   : > { %3147 = vmatmul.mubr.msk.bf16.gmra.mrb[8].mxu1 %vm805_vm2, %v763_v1  ;;  %v756_v8 = vmax.f32 %v736_v4, 0.0  ;;  %v739_v9 = vadd.f32 %v3129_v7, %v3695_v21  ;;  %v730_v10 = vpop.f32.mrb[15].mxu0 }
 0x106   : > { %v754_v11 = vmax.f32 %v728_v6, 0.0  ;;  %v731_v12 = vadd.f32 %v3695_v21, %v730_v10  ;;  %v3359_v21 = vld [vmem:[%s4343_s6 + $0x6c] ss:$16 sps:$4 sm:$0xff]   ;;  %v3369_v6 = vld [vmem:[%s4344_s7 + $0x30] ss:$8 sps:$4 sm:$0xff]  }
 0x107   : > { %v757_v13 = vmax.f32 %v739_v9, 0.0  ;;  %1212 = vmatprep.subr.bf16.mxu1 %v3359_v21 }
 0x108   : > { %v755_v14 = vmax.f32 %v731_v12, 0.0  ;;  %1213 = vmatpush1.bf16.msra.mxu1 %v3357_v22 }
 0x109   : > { %v765_v15 = vpack.c.bf16 %v757_v13, %v756_v8  ;;  %v3374_v8 = vld [vmem:[%s4344_s7 + $0x44] ss:$8 sps:$4 sm:$0xff]   ;;  %v3372_v13 = vld [vmem:[%s4344_s7 + $0x40] ss:$8 sps:$4 sm:$0xff]  }
 0x10a   : > { %v764_v16 = vpack.c.bf16 %v755_v14, %v754_v11 }
 0x10c   : > { %3150 = vmatprep.mubr.msk.bf16.mxu1 %vm805_vm2, %v764_v16  ;;  %v3377_v16 = vld [vmem:[%s4344_s7 + $0x54] ss:$8 sps:$4 sm:$0xff]  }
 0x10d   : > { %3151 = vmatmul.mubr.msk.bf16.gmra.mrb[12].mxu1 %vm805_vm2, %v765_v15 }
 0x10e   : > { %1238 = vmatprep.mubr.bf16.mxu1 %v3528_v23 }
 0x1c8   : > { %v3140_v26 = vpop.f32.mrb[0].mxu1 }
 0x1c9   : > { %v873_v27 = vadd.f32 %v3140_v26, %v3756_v25  ;;  %v864_v28 = vpop.f32.mrb[1].mxu1  ;;  %v3375_v26 = vld [vmem:[%s4344_s7 + $0x50] ss:$8 sps:$4 sm:$0xff]  }
 0x1ca   : > { %v865_v29 = vadd.f32 %v3756_v25, %v864_v28  ;;  %v3141_v30 = vpop.f32.mrb[2].mxu1  ;;  %v3380_v28 = vld [vmem:[%s4344_s7 + $0x64] ss:$8 sps:$4 sm:$0xff]  }
 0x1cb   : > { %v876_v31 = vadd.f32 %v3141_v30, %v3756_v25  ;;  %v867_v32 = vpop.f32.mrb[3].mxu1  ;;  %v929_v34 = vmax.f32 %v873_v27, 0.0 }
 0x1cc   : > { %v868_v33 = vadd.f32 %v3756_v25, %v867_v32  ;;  %v927_v36 = vmax.f32 %v865_v29, 0.0  ;;  %v3378_v32 = vld [vmem:[%s4344_s7 + $0x60] ss:$8 sps:$4 sm:$0xff]  }
 0x1cd   : > { %v930_v35 = vmax.f32 %v876_v31, 0.0 }
 0x1ce   : > { %v928_v37 = vmax.f32 %v868_v33, 0.0  ;;  %v3381_v33 = vld [vmem:[%s4344_s7 + $0x70] ss:$8 sps:$4 sm:$0xff]  }
 0x1cf   : > { %v944_v38 = vpack.c.bf16 %v930_v35, %v929_v34  ;;  %v3386_v34 = vld [vmem:[%s4344_s7 + $0x84] ss:$8 sps:$4 sm:$0xff]   ;;  %v3384_v35 = vld [vmem:[%s4344_s7 + $0x80] ss:$8 sps:$4 sm:$0xff]  }
 0x1d0   : > { %v943_v39 = vpack.c.bf16 %v928_v37, %v927_v36  ;;  %v3144_v40 = vpop.f32.mrb[4].mxu1  ;;  %v3389_v36 = vld [vmem:[%s4344_s7 + $0x94] ss:$8 sps:$4 sm:$0xff]   ;;  %v3387_v37 = vld [vmem:[%s4344_s7 + $0x90] ss:$8 sps:$4 sm:$0xff]  }
 0x1d1   : > { %v889_v42 = vadd.f32 %v3144_v40, %v3756_v25  ;;  %v880_v43 = vpop.f32.mrb[5].mxu1  ;;  %v3395_v40 = vld [vmem:[%s4344_s7 + $0xb4] ss:$8 sps:$4 sm:$0xff]  }
 0x1d2   : > { %v881_v45 = vadd.f32 %v3756_v25, %v880_v43  ;;  %2878 = vmatmul.mubr.msk.bf16.vlgmr.msra.gmra.mrb[16].mxu0 %vm805_vm2, %v943_v39  ;;  %2886 = vmatmul.mubr.msk.bf16.vlgmr.msra.gmra.mrb[16].mxu1 %vm805_vm2, %v943_v39  ;;  %v3145_v46 = vpop.f32.mrb[6].mxu1  ;;  %v3390_v39 = vld [vmem:[%s4344_s7 + $0xa0] ss:$8 sps:$4 sm:$0xff]  }
 0x1d3   : > { %v933_v47 = vmax.f32 %v889_v42, 0.0  ;;  %v892_v48 = vadd.f32 %v3145_v46, %v3756_v25  ;;  %v883_v49 = vpop.f32.mrb[7].mxu1  ;;  %1135 = vmatprep.mubr.bf16.mxu0 %v3528_v23  ;;  %1248 = vmatprep.mubr.bf16.mxu1 %v3528_v23  ;;  %v3398_v42 = vld [vmem:[%s4344_s7 + $0xc4] ss:$8 sps:$4 sm:$0xff]   ;;  %v3396_v43 = vld [vmem:[%s4344_s7 + $0xc0] ss:$8 sps:$4 sm:$0xff]  }
 0x1d4   : > { %v931_v50 = vmax.f32 %v881_v45, 0.0  ;;  %v884_v51 = vadd.f32 %v3756_v25, %v883_v49  ;;  %1812 = vmatpush1.bf16.msra.mxu0 %v3360_v41  ;;  %v3393_v41 = vld [vmem:[%s4344_s7 + $0xb0] ss:$8 sps:$4 sm:$0xff]   ;;  %v3404_v46 = vld [vmem:[%s4344_s7 + $0xe4] ss:$8 sps:$4 sm:$0xff]  }
 0x1d5   : > { %v934_v53 = vmax.f32 %v892_v48, 0.0  ;;  %1813 = vmatprep.subr.bf16.mxu0 %v3365_v44  ;;  %v3401_v44 = vld [vmem:[%s4344_s7 + $0xd4] ss:$8 sps:$4 sm:$0xff]   ;;  %v3399_v45 = vld [vmem:[%s4344_s7 + $0xd0] ss:$8 sps:$4 sm:$0xff]  }
 0x1d6   : > { %v932_v55 = vmax.f32 %v884_v51, 0.0  ;;  %v3405_v48 = vld [vmem:[%s4344_s7 + $0xf0] ss:$8 sps:$4 sm:$0xff]   ;;  %v3410_v49 = vld [vmem:[%s4344_s7 + $0x104] ss:$8 sps:$4 sm:$0xff]  }
 0x1d7   : > { %v946_v56 = vpack.c.bf16 %v934_v53, %v933_v47  ;;  %v3407_v47 = vld [vmem:[%s4344_s7 + $0xf4] ss:$8 sps:$4 sm:$0xff]  }
 0x1d8   : > { %v945_v57 = vpack.c.bf16 %v932_v55, %v931_v50  ;;  %v3148_v58 = vpop.f32.mrb[8].mxu1  ;;  %1814 = vmatpush1.bf16.msra.mxu0 %v3363_v52  ;;  %v969_v50 = vlaneseq }
 0x1d9   : > { %v905_v60 = vadd.f32 %v3148_v58, %v3756_v25  ;;  %v896_v61 = vpop.f32.mrb[9].mxu1  ;;  %1815 = vmatprep.subr.bf16.mxu0 %v3368_v54  ;;  %v967_v54 = vld [vmem:[%s540_s26] sm:$0xf] }
 0x1da   : > { %2879 = vmatmul.mubr.msk.bf16.gmra.mrb[20].mxu0 %vm805_vm2, %v944_v38  ;;  %2887 = vmatmul.mubr.msk.bf16.gmra.mrb[20].mxu1 %vm805_vm2, %v944_v38  ;;  %v897_v63 = vadd.f32 %v3756_v25, %v896_v61  ;;  %v3149_v0 = vpop.f32.mrb[10].mxu1  ;;  %v3392_v38 = vld [vmem:[%s4344_s7 + $0xa4] ss:$8 sps:$4 sm:$0xff]   ;;  %v3901_v51 = vshrl.u32 %v969_v50, 7  ;;  %v3411_v50 = vld [vmem:[%s4344_s7 + $0x110] ss:$8 sps:$4 sm:$0xff]  }
 0x1db   : > { %v937_v1 = vmax.f32 %v905_v60, 0.0  ;;  %1145 = vmatprep.mubr.bf16.mxu0 %v3528_v23  ;;  %1258 = vmatprep.mubr.bf16.mxu1 %v3528_v23  ;;  %v908_v2 = vadd.f32 %v3149_v0, %v3756_v25  ;;  %v899_v3 = vpop.f32.mrb[11].mxu1 }
 0x1dc   : > { %v935_v4 = vmax.f32 %v897_v63, 0.0  ;;  %v900_v5 = vadd.f32 %v3756_v25, %v899_v3  ;;  %1816 = vmatpush1.bf16.msra.mxu0 %v3366_v59  ;;  %v971_v52 = vsub.s32 0, %v3901_v51  ;;  %v979_v53 = vsub.s32 2, %v3901_v51 }
 0x1dd   : > { %v938_v7 = vmax.f32 %v908_v2, 0.0  ;;  %1817 = vmatprep.subr.bf16.mxu0 %v3371_v62  ;;  %v975_v55 = vsub.s32 1, %v3901_v51 }
 0x1de   : > { %v936_v9 = vmax.f32 %v900_v5, 0.0  ;;  %v3914_v58 = vrot.slane %v967_v54, %v979_v53 }
 0x1df   : > { %v948_v10 = vpack.c.bf16 %v938_v7, %v937_v1  ;;  %v3918_v59 = vrot.slane %v967_v54, %v975_v55 }
 0x1e0   : > { %v947_v11 = vpack.c.bf16 %v936_v9, %v935_v4  ;;  %v3152_v12 = vpop.f32.mrb[12].mxu1  ;;  %1818 = vmatpush1.bf16.msra.mxu0 %v3369_v6 }
 0x1e1   : > { %v921_v14 = vadd.f32 %v3152_v12, %v3756_v25  ;;  %v912_v15 = vpop.f32.mrb[13].mxu1  ;;  %1819 = vmatprep.subr.bf16.mxu0 %v3374_v8  ;;  %v3457_v12 = vld [vmem:[%s4346_s9] sm:$0xff]  }
 0x1e2   : > { %2880 = vmatmul.mubr.msk.bf16.gmra.mrb[24].mxu0 %vm805_vm2, %v945_v57  ;;  %2888 = vmatmul.mubr.msk.bf16.gmra.mrb[24].mxu1 %vm805_vm2, %v945_v57  ;;  %v913_v17 = vadd.f32 %v3756_v25, %v912_v15  ;;  %v3153_v18 = vpop.f32.mrb[14].mxu1  ;;  %v3912_v57 = vrot.slane %v967_v54, %v971_v52  ;;  %v3458_v15 = vld [vmem:[%s4346_s9 + $0x48] sm:$0xff]  }
 0x1e3   : > { %1155 = vmatprep.mubr.bf16.mxu0 %v3528_v23  ;;  %1268 = vmatprep.mubr.bf16.mxu1 %v3528_v23  ;;  %v941_v19 = vmax.f32 %v921_v14, 0.0  ;;  %v924_v20 = vadd.f32 %v3153_v18, %v3756_v25  ;;  %v915_v21 = vpop.f32.mrb[15].mxu1 }
 0x1e4   : > { %v939_v22 = vmax.f32 %v913_v17, 0.0  ;;  %v916_v24 = vadd.f32 %v3756_v25, %v915_v21  ;;  %1820 = vmatpush1.bf16.msra.mxu0 %v3372_v13  ;;  %v3383_v25 = vld [vmem:[%s4344_s7 + $0x74] ss:$8 sps:$4 sm:$0xff]  }
 0x1e5   : > { %v942_v27 = vmax.f32 %v924_v20, 0.0  ;;  %1821 = vmatprep.subr.bf16.mxu0 %v3377_v16 }
 0x1e6   : > { %v940_v29 = vmax.f32 %v916_v24, 0.0 }
 0x1e7   : > { %v950_v30 = vpack.c.bf16 %v942_v27, %v941_v19 }
 0x1e8   : > { %v949_v31 = vpack.c.bf16 %v940_v29, %v939_v22  ;;  %1822 = vmatpush1.bf16.msra.mxu0 %v3375_v26  ;;  %v3459_v26 = vld [vmem:[%s4346_s9 + $0x8] sm:$0xff]   ;;  %v3460_v29 = vld [vmem:[%s4346_s9 + $0x50] sm:$0xff]  }
 0x1e9   : > { %1823 = vmatprep.subr.bf16.mxu0 %v3380_v28 }
 0x1ea   : > { %2881 = vmatmul.mubr.msk.bf16.gmra.mrb[28].mxu0 %vm805_vm2, %v946_v56  ;;  %2889 = vmatmul.mubr.msk.bf16.gmra.mrb[28].mxu1 %vm805_vm2, %v946_v56  ;;  %v983_v56 = vsub.s32 3, %v3901_v51 }
 0x1eb   : > { %1165 = vmatprep.mubr.bf16.mxu0 %v3528_v23  ;;  %1278 = vmatprep.mubr.bf16.mxu1 %v3528_v23 }
 0x1ec   : > { %1824 = vmatpush1.bf16.msra.mxu0 %v3378_v32  ;;  %v3920_v60 = vrot.slane %v967_v54, %v983_v56 }
 0x1ed   : > { %1825 = vmatprep.subr.bf16.mxu0 %v3383_v25 }
 0x1f0   : > { %1826 = vmatpush1.bf16.msra.mxu0 %v3381_v33  ;;  %v3408_v33 = vld [vmem:[%s4344_s7 + $0x100] ss:$8 sps:$4 sm:$0xff]  }
 0x1f1   : > { %1827 = vmatprep.subr.bf16.mxu0 %v3386_v34 }
 0x1f2   : > { %2882 = vmatmul.mubr.msk.bf16.gmra.mrb[32].mxu0 %vm805_vm2, %v947_v11  ;;  %2890 = vmatmul.mubr.msk.bf16.gmra.mrb[32].mxu1 %vm805_vm2, %v947_v11  ;;  %v3456_v11 = vld [vmem:[%s4346_s9 + $0x40] sm:$0xff]  }
 0x1f3   : > { %1175 = vmatprep.mubr.bf16.mxu0 %v3528_v23  ;;  %1288 = vmatprep.mubr.bf16.mxu1 %v3528_v23 }
 0x1f4   : > { %1828 = vmatpush1.bf16.msra.mxu0 %v3384_v35  ;;  %3016 = vmatprep.subr.bf16.mxu1 %v3456_v11  ;;  %v3414_v11 = vld [vmem:[%s4344_s7 + $0x120] ss:$8 sps:$4 sm:$0xff]  }
 0x1f5   : > { %1829 = vmatprep.subr.bf16.mxu0 %v3389_v36  ;;  %3017 = vmatpush3.bf16.msra.mxu1 %v3457_v12 }
 0x1f6   : > { %3018 = vmatprep.subr.bf16.mxu1 %v3458_v15 }
 0x1f8   : > { %1830 = vmatpush1.bf16.msra.mxu0 %v3387_v37 }
 0x1f9   : > { %1831 = vmatprep.subr.bf16.mxu0 %v3392_v38  ;;  %v3413_v38 = vld [vmem:[%s4344_s7 + $0x114] ss:$8 sps:$4 sm:$0xff]   ;;  %3019 = vmatpush3.bf16.msra.mxu1 %v3459_v26 }
 0x1fa   : > { %2883 = vmatmul.mubr.msk.bf16.gmra.mrb[36].mxu0 %vm805_vm2, %v948_v10  ;;  %2891 = vmatmul.mubr.msk.bf16.gmra.mrb[36].mxu1 %vm805_vm2, %v948_v10 }
 0x1fb   : > { %1185 = vmatprep.mubr.bf16.mxu0 %v3528_v23  ;;  %1298 = vmatprep.mubr.bf16.mxu1 %v3528_v23 }
 0x1fc   : > { %1832 = vmatpush1.bf16.msra.mxu0 %v3390_v39  ;;  %3020 = vmatprep.subr.bf16.mxu1 %v3460_v29  ;;  %v3466_v29 = vld [vmem:[%s4346_s9 + $0x68] sm:$0xff]  }
 0x1fd   : > { %1833 = vmatprep.subr.bf16.mxu0 %v3395_v40 }
 0x200   : > { %1834 = vmatpush1.bf16.msra.mxu0 %v3393_v41 }
 0x201   : > { %1835 = vmatprep.subr.bf16.mxu0 %v3398_v42 }
 0x202   : > { %2884 = vmatmul.mubr.msk.bf16.gmra.mrb[40].mxu0 %vm805_vm2, %v949_v31  ;;  %2892 = vmatmul.mubr.msk.bf16.gmra.mrb[40].mxu1 %vm805_vm2, %v949_v31 }
 0x203   : > { %1195 = vmatprep.mubr.bf16.mxu0 %v3528_v23  ;;  %1308 = vmatprep.mubr.bf16.mxu1 %v3528_v23  ;;  %v3402_v23 = vld [vmem:[%s4344_s7 + $0xe0] ss:$8 sps:$4 sm:$0xff]  }
 0x204   : > { %1836 = vmatpush1.bf16.msra.mxu0 %v3396_v43  ;;  %v3461_v43 = vld [vmem:[%s4346_s9 + $0x10] sm:$0xff]  }
 0x205   : > { %1837 = vmatprep.subr.bf16.mxu0 %v3401_v44  ;;  %3021 = vmatpush3.bf16.msra.mxu1 %v3461_v43 }
 0x208   : > { %1838 = vmatpush1.bf16.msra.mxu0 %v3399_v45 }
 0x209   : > { %1839 = vmatprep.subr.bf16.mxu0 %v3404_v46 }
 0x20a   : > { %2885 = vmatmul.mubr.msk.bf16.gmra.mrb[44].mxu0 %vm805_vm2, %v950_v30  ;;  %2893 = vmatmul.mubr.msk.bf16.gmra.mrb[44].mxu1 %vm805_vm2, %v950_v30 }
 0x20c   : > { %1840 = vmatpush1.bf16.msra.mxu0 %v3402_v23 }
 0x20d   : > { %1841 = vmatprep.subr.bf16.mxu0 %v3407_v47  ;;  %v3462_v47 = vld [vmem:[%s4346_s9 + $0x58] sm:$0xff]  }
 0x20e   : > { %3022 = vmatprep.subr.bf16.mxu1 %v3462_v47 }
 0x210   : > { %1842 = vmatpush1.bf16.msra.mxu0 %v3405_v48 }
 0x211   : > { %1924 = vmatprep.subr.bf16.mxu0 %v3410_v49 }
 0x2a5   : > { %v1127_v61 = vpop.f32.mrb[16].mxu0  ;;  %v1240_v62 = vpop.f32.mrb[16].mxu1 }
 0x2a6   : > { %v1128_v63 = vadd.f32 %v1127_v61, %v3912_v57  ;;  %v1241_v0 = vadd.f32 %v1240_v62, %v3914_v58  ;;  %v1129_v1 = vpop.f32.mrb[17].mxu0  ;;  %v1242_v2 = vpop.f32.mrb[17].mxu1  ;;  %v3416_v62 = vld [vmem:[%s4344_s7 + $0x124] ss:$8 sps:$4 sm:$0xff]  }
 0x2a7   : > { %v1130_v3 = vadd.f32 %v1129_v1, %v3918_v59  ;;  %v1243_v4 = vadd.f32 %v1242_v2, %v3920_v60  ;;  %v1131_v5 = vpop.f32.mrb[18].mxu0  ;;  %v1244_v6 = vpop.f32.mrb[18].mxu1 }
 0x2a8   : > { %v1132_v7 = vadd.f32 %v1131_v5, %v3912_v57  ;;  %v1245_v8 = vadd.f32 %v1244_v6, %v3914_v58  ;;  %v1133_v9 = vpop.f32.mrb[19].mxu0  ;;  %v1246_v10 = vpop.f32.mrb[19].mxu1  ;;  %v1319_v16 = vmax.f32 %v1128_v63, 0.0  ;;  %v1321_v17 = vmax.f32 %v1241_v0, 0.0  ;;  %v3464_v6 = vld [vmem:[%s4346_s9 + $0x60] sm:$0xff]  }
 0x2a9   : > { %v1134_v13 = vadd.f32 %v1133_v9, %v3918_v59  ;;  %v1247_v14 = vadd.f32 %v1246_v10, %v3920_v60  ;;  %v1320_v20 = vmax.f32 %v1130_v3, 0.0  ;;  %v1322_v21 = vmax.f32 %v1243_v4, 0.0  ;;  %v3463_v3 = vld [vmem:[%s4346_s9 + $0x18] sm:$0xff]  }
 0x2aa   : > { %v1323_v18 = vmax.f32 %v1132_v7, 0.0  ;;  %v1325_v19 = vmax.f32 %v1245_v8, 0.0  ;;  %3023 = vmatpush3.bf16.msra.mxu1 %v3463_v3 }
 0x2ab   : > { %v1324_v22 = vmax.f32 %v1134_v13, 0.0  ;;  %v1326_v24 = vmax.f32 %v1247_v14, 0.0  ;;  %3024 = vmatprep.subr.bf16.mxu1 %v3464_v6 }
 0x2ac   : > { %v1383_v27 = vpack.c.bf16 %v1323_v18, %v1319_v16  ;;  %v3942_v28 = vpack.c.bf16 %v1325_v19, %v1321_v17  ;;  %v3419_v16 = vld [vmem:[%s4344_s7 + $0x134] ss:$8 sps:$4 sm:$0xff]  }
 0x2ad   : > { %v1384_v30 = vpack.c.bf16 %v1324_v22, %v1320_v20  ;;  %v3947_v31 = vpack.c.bf16 %v1326_v24, %v1322_v21  ;;  %v1137_v32 = vpop.f32.mrb[20].mxu0  ;;  %v1250_v25 = vpop.f32.mrb[20].mxu1  ;;  %v3465_v21 = vld [vmem:[%s4346_s9 + $0x20] sm:$0xff]  }
 0x2ae   : > { %v1138_v34 = vadd.f32 %v1137_v32, %v3912_v57  ;;  %v1251_v35 = vadd.f32 %v1250_v25, %v3914_v58  ;;  %v1139_v36 = vpop.f32.mrb[21].mxu0  ;;  %v1252_v37 = vpop.f32.mrb[21].mxu1  ;;  %v3417_v25 = vld [vmem:[%s4344_s7 + $0x130] ss:$8 sps:$4 sm:$0xff]   ;;  %3025 = vmatpush3.bf16.msra.mxu1 %v3465_v21 }
 0x2af   : > { %v1140_v39 = vadd.f32 %v1139_v36, %v3918_v59  ;;  %v1253_v40 = vadd.f32 %v1252_v37, %v3920_v60  ;;  %v1141_v41 = vpop.f32.mrb[22].mxu0  ;;  %v1254_v42 = vpop.f32.mrb[22].mxu1  ;;  %1843 = vmatprep.mubr.bf16.mxu0 %v1384_v30  ;;  %v3422_v37 = vld [vmem:[%s4344_s7 + $0x144] ss:$8 sps:$4 sm:$0xff]   ;;  %3026 = vmatprep.subr.bf16.mxu1 %v3466_v29 }
 0x2b0   : > { %v1142_v44 = vadd.f32 %v1141_v41, %v3912_v57  ;;  %v1255_v45 = vadd.f32 %v1254_v42, %v3914_v58  ;;  %v1143_v46 = vpop.f32.mrb[23].mxu0  ;;  %v1256_v23 = vpop.f32.mrb[23].mxu1  ;;  %1844 = vmatmul.mubr.bf16.vlgmr.msra.gmra.mrb[48].mxu0 %v1383_v27  ;;  %v1327_v53 = vmax.f32 %v1138_v34, 0.0  ;;  %v1329_v54 = vmax.f32 %v1251_v35, 0.0  ;;  %v3467_v42 = vld [vmem:[%s4346_s9 + $0x28] sm:$0xff]  }
 0x2b1   : > { %v1144_v48 = vadd.f32 %v1143_v46, %v3918_v59  ;;  %v1257_v49 = vadd.f32 %v1256_v23, %v3920_v60  ;;  %1925 = vmatpush1.bf16.msra.mxu0 %v3408_v33  ;;  %v1328_v63 = vmax.f32 %v1140_v39, 0.0  ;;  %v1330_v0 = vmax.f32 %v1253_v40, 0.0 }
 0x2b2   : > { %v1331_v56 = vmax.f32 %v1142_v44, 0.0  ;;  %v1333_v61 = vmax.f32 %v1255_v45, 0.0  ;;  %1926 = vmatprep.subr.bf16.mxu0 %v3413_v38  ;;  %v3468_v45 = vld [vmem:[%s4346_s9 + $0x70] sm:$0xff]   ;;  %3027 = vmatpush3.bf16.msra.mxu1 %v3467_v42 }
 0x2b3   : > { %v1332_v1 = vmax.f32 %v1144_v48, 0.0  ;;  %v1334_v2 = vmax.f32 %v1257_v49, 0.0  ;;  %v3420_v49 = vld [vmem:[%s4344_s7 + $0x140] ss:$8 sps:$4 sm:$0xff]   ;;  %3028 = vmatprep.subr.bf16.mxu1 %v3468_v45 }
 0x2b4   : > { %v1387_v4 = vpack.c.bf16 %v1331_v56, %v1327_v53  ;;  %v3978_v5 = vpack.c.bf16 %v1333_v61, %v1329_v54  ;;  %v3425_v61 = vld [vmem:[%s4344_s7 + $0x154] ss:$8 sps:$4 sm:$0xff]  }
 0x2b5   : > { %v1388_v7 = vpack.c.bf16 %v1332_v1, %v1328_v63  ;;  %v3983_v8 = vpack.c.bf16 %v1334_v2, %v1330_v0  ;;  %1927 = vmatpush1.bf16.msra.mxu0 %v3411_v50  ;;  %v1147_v9 = vpop.f32.mrb[24].mxu0  ;;  %v1260_v10 = vpop.f32.mrb[24].mxu1  ;;  %v3469_v2 = vld [vmem:[%s4346_s9 + $0x30] sm:$0xff]  }
 0x2b6   : > { %v1148_v12 = vadd.f32 %v1147_v9, %v3912_v57  ;;  %v1261_v13 = vadd.f32 %v1260_v10, %v3914_v58  ;;  %v1149_v14 = vpop.f32.mrb[25].mxu0  ;;  %v1262_v15 = vpop.f32.mrb[25].mxu1  ;;  %1928 = vmatprep.subr.bf16.mxu0 %v3416_v62  ;;  %3029 = vmatpush3.bf16.msra.mxu1 %v3469_v2 }
 0x2b7   : > { %v1150_v17 = vadd.f32 %v1149_v14, %v3918_v59  ;;  %v1263_v18 = vadd.f32 %v1262_v15, %v3920_v60  ;;  %v1151_v19 = vpop.f32.mrb[26].mxu0  ;;  %v1264_v20 = vpop.f32.mrb[26].mxu1  ;;  %1853 = vmatprep.mubr.bf16.mxu0 %v1388_v7 }
 0x2b8   : > { %v1152_v22 = vadd.f32 %v1151_v19, %v3912_v57  ;;  %v1265_v24 = vadd.f32 %v1264_v20, %v3914_v58  ;;  %v1153_v26 = vpop.f32.mrb[27].mxu0  ;;  %v1266_v27 = vpop.f32.mrb[27].mxu1  ;;  %1854 = vmatmul.mubr.bf16.gmra.mrb[52].mxu0 %v1387_v4  ;;  %v1335_v33 = vmax.f32 %v1148_v12, 0.0  ;;  %v1337_v34 = vmax.f32 %v1261_v13, 0.0 }
 0x2b9   : > { %v1154_v30 = vadd.f32 %v1153_v26, %v3918_v59  ;;  %v1267_v32 = vadd.f32 %v1266_v27, %v3920_v60  ;;  %1929 = vmatpush1.bf16.msra.mxu0 %v3414_v11  ;;  %v1336_v38 = vmax.f32 %v1150_v17, 0.0  ;;  %v1338_v39 = vmax.f32 %v1263_v18, 0.0  ;;  %v3423_v11 = vld [vmem:[%s4344_s7 + $0x150] ss:$8 sps:$4 sm:$0xff]  }
 0x2ba   : > { %v1339_v35 = vmax.f32 %v1152_v22, 0.0  ;;  %v1341_v36 = vmax.f32 %v1265_v24, 0.0  ;;  %1930 = vmatprep.subr.bf16.mxu0 %v3419_v16  ;;  %v3428_v16 = vld [vmem:[%s4344_s7 + $0x164] ss:$8 sps:$4 sm:$0xff]  }
 0x2bb   : > { %v1340_v40 = vmax.f32 %v1154_v30, 0.0  ;;  %v1342_v41 = vmax.f32 %v1267_v32, 0.0  ;;  %v3426_v30 = vld [vmem:[%s4344_s7 + $0x160] ss:$8 sps:$4 sm:$0xff]  }
 0x2bc   : > { %v1391_v43 = vpack.c.bf16 %v1339_v35, %v1335_v33  ;;  %v4014_v44 = vpack.c.bf16 %v1341_v36, %v1337_v34  ;;  %v3431_v35 = vld [vmem:[%s4344_s7 + $0x174] ss:$8 sps:$4 sm:$0xff]  }
 0x2bd   : > { %v1392_v46 = vpack.c.bf16 %v1340_v40, %v1336_v38  ;;  %v4019_v23 = vpack.c.bf16 %v1342_v41, %v1338_v39  ;;  %1931 = vmatpush1.bf16.msra.mxu0 %v3417_v25  ;;  %v1157_v47 = vpop.f32.mrb[28].mxu0  ;;  %v1270_v48 = vpop.f32.mrb[28].mxu1 }
 0x2be   : > { %v1158_v50 = vadd.f32 %v1157_v47, %v3912_v57  ;;  %v1271_v53 = vadd.f32 %v1270_v48, %v3914_v58  ;;  %v1159_v54 = vpop.f32.mrb[29].mxu0  ;;  %v1272_v56 = vpop.f32.mrb[29].mxu1  ;;  %1932 = vmatprep.subr.bf16.mxu0 %v3422_v37  ;;  %v3429_v47 = vld [vmem:[%s4344_s7 + $0x170] ss:$8 sps:$4 sm:$0xff]  }
 0x2bf   : > { %v1160_v62 = vadd.f32 %v1159_v54, %v3918_v59  ;;  %v1273_v63 = vadd.f32 %v1272_v56, %v3920_v60  ;;  %v1161_v0 = vpop.f32.mrb[30].mxu0  ;;  %v1274_v1 = vpop.f32.mrb[30].mxu1  ;;  %1863 = vmatprep.mubr.bf16.mxu0 %v1392_v46  ;;  %v3434_v54 = vld [vmem:[%s4344_s7 + $0x184] ss:$8 sps:$4 sm:$0xff]  }
 0x2c0   : > { %v1162_v3 = vadd.f32 %v1161_v0, %v3912_v57  ;;  %v1275_v4 = vadd.f32 %v1274_v1, %v3914_v58  ;;  %v1163_v6 = vpop.f32.mrb[31].mxu0  ;;  %v1276_v7 = vpop.f32.mrb[31].mxu1  ;;  %1864 = vmatmul.mubr.bf16.gmra.mrb[56].mxu0 %v1391_v43  ;;  %v1343_v12 = vmax.f32 %v1158_v50, 0.0  ;;  %v1345_v13 = vmax.f32 %v1271_v53, 0.0 }
 0x2c1   : > { %v1164_v9 = vadd.f32 %v1163_v6, %v3918_v59  ;;  %v1277_v10 = vadd.f32 %v1276_v7, %v3920_v60  ;;  %1933 = vmatpush1.bf16.msra.mxu0 %v3420_v49  ;;  %v1344_v17 = vmax.f32 %v1160_v62, 0.0  ;;  %v1346_v18 = vmax.f32 %v1273_v63, 0.0  ;;  %v3432_v7 = vld [vmem:[%s4344_s7 + $0x180] ss:$8 sps:$4 sm:$0xff]  }
 0x2c2   : > { %v1347_v14 = vmax.f32 %v1162_v3, 0.0  ;;  %v1349_v15 = vmax.f32 %v1275_v4, 0.0  ;;  %1934 = vmatprep.subr.bf16.mxu0 %v3425_v61 }
 0x2c3   : > { %v1348_v19 = vmax.f32 %v1164_v9, 0.0  ;;  %v1350_v20 = vmax.f32 %v1277_v10, 0.0 }
 0x2c4   : > { %v1395_v21 = vpack.c.bf16 %v1347_v14, %v1343_v12  ;;  %v4044_v22 = vpack.c.bf16 %v1349_v15, %v1345_v13  ;;  %v3437_v13 = vld [vmem:[%s4344_s7 + $0x194] ss:$8 sps:$4 sm:$0xff]  }
 0x2c5   : > { %v1396_v24 = vpack.c.bf16 %v1348_v19, %v1344_v17  ;;  %v4046_v26 = vpack.c.bf16 %v1350_v20, %v1346_v18  ;;  %1935 = vmatpush1.bf16.msra.mxu0 %v3423_v11  ;;  %v1167_v27 = vpop.f32.mrb[32].mxu0  ;;  %v1280_v29 = vpop.f32.mrb[32].mxu1 }
 0x2c6   : > { %v1168_v32 = vadd.f32 %v1167_v27, %v3912_v57  ;;  %v1281_v25 = vadd.f32 %v1280_v29, %v3914_v58  ;;  %v1169_v33 = vpop.f32.mrb[33].mxu0  ;;  %v1282_v34 = vpop.f32.mrb[33].mxu1  ;;  %1936 = vmatprep.subr.bf16.mxu0 %v3428_v16  ;;  %v3435_v29 = vld [vmem:[%s4344_s7 + $0x190] ss:$8 sps:$4 sm:$0xff]  }
 0x2c7   : > { %v1170_v36 = vadd.f32 %v1169_v33, %v3918_v59  ;;  %v1283_v37 = vadd.f32 %v1282_v34, %v3920_v60  ;;  %v1171_v38 = vpop.f32.mrb[34].mxu0  ;;  %v1284_v39 = vpop.f32.mrb[34].mxu1  ;;  %1873 = vmatprep.mubr.bf16.mxu0 %v1396_v24  ;;  %v3440_v34 = vld [vmem:[%s4344_s7 + $0x1a4] ss:$8 sps:$4 sm:$0xff]  }
 0x2c8   : > { %v1172_v40 = vadd.f32 %v1171_v38, %v3912_v57  ;;  %v1285_v41 = vadd.f32 %v1284_v39, %v3914_v58  ;;  %v1173_v42 = vpop.f32.mrb[35].mxu0  ;;  %v1286_v43 = vpop.f32.mrb[35].mxu1  ;;  %1874 = vmatmul.mubr.bf16.gmra.mrb[60].mxu0 %v1395_v21  ;;  %v1351_v48 = vmax.f32 %v1168_v32, 0.0  ;;  %v1353_v49 = vmax.f32 %v1281_v25, 0.0 }
 0x2c9   : > { %v1174_v45 = vadd.f32 %v1173_v42, %v3918_v59  ;;  %v1287_v46 = vadd.f32 %v1286_v43, %v3920_v60  ;;  %1937 = vmatpush1.bf16.msra.mxu0 %v3426_v30  ;;  %v1352_v56 = vmax.f32 %v1170_v36, 0.0  ;;  %v1354_v61 = vmax.f32 %v1283_v37, 0.0 }
 0x2ca   : > { %v1355_v50 = vmax.f32 %v1172_v40, 0.0  ;;  %v1357_v53 = vmax.f32 %v1285_v41, 0.0  ;;  %1938 = vmatprep.subr.bf16.mxu0 %v3431_v35 }
 0x2cb   : > { %v1356_v62 = vmax.f32 %v1174_v45, 0.0  ;;  %v1358_v63 = vmax.f32 %v1287_v46, 0.0  ;;  %v3438_v46 = vld [vmem:[%s4344_s7 + $0x1a0] ss:$8 sps:$4 sm:$0xff]  }
 0x2cc   : > { %v1399_v0 = vpack.c.bf16 %v1355_v50, %v1351_v48  ;;  %v4068_v1 = vpack.c.bf16 %v1357_v53, %v1353_v49  ;;  %v3443_v53 = vld [vmem:[%s4344_s7 + $0x1b4] ss:$8 sps:$4 sm:$0xff]  }
 0x2cd   : > { %v1400_v2 = vpack.c.bf16 %v1356_v62, %v1352_v56  ;;  %v4070_v3 = vpack.c.bf16 %v1358_v63, %v1354_v61  ;;  %1939 = vmatpush1.bf16.msra.mxu0 %v3429_v47  ;;  %v1177_v4 = vpop.f32.mrb[36].mxu0  ;;  %v1290_v6 = vpop.f32.mrb[36].mxu1 }
 0x2ce   : > { %v1178_v9 = vadd.f32 %v1177_v4, %v3912_v57  ;;  %v1291_v10 = vadd.f32 %v1290_v6, %v3914_v58  ;;  %v1179_v11 = vpop.f32.mrb[37].mxu0  ;;  %v1292_v12 = vpop.f32.mrb[37].mxu1  ;;  %1940 = vmatprep.subr.bf16.mxu0 %v3434_v54 }
 0x2cf   : > { %v1180_v14 = vadd.f32 %v1179_v11, %v3918_v59  ;;  %v1293_v15 = vadd.f32 %v1292_v12, %v3920_v60  ;;  %v1181_v16 = vpop.f32.mrb[38].mxu0  ;;  %v1294_v17 = vpop.f32.mrb[38].mxu1  ;;  %1883 = vmatprep.mubr.bf16.mxu0 %v1400_v2 }
 0x2d0   : > { %v1182_v18 = vadd.f32 %v1181_v16, %v3912_v57  ;;  %v1295_v19 = vadd.f32 %v1294_v17, %v3914_v58  ;;  %v1183_v20 = vpop.f32.mrb[39].mxu0  ;;  %v1296_v21 = vpop.f32.mrb[39].mxu1  ;;  %1884 = vmatmul.mubr.bf16.gmra.mrb[64].mxu0 %v1399_v0  ;;  %v1359_v30 = vmax.f32 %v1178_v9, 0.0  ;;  %v1361_v32 = vmax.f32 %v1291_v10, 0.0  ;;  %v3441_v9 = vld [vmem:[%s4344_s7 + $0x1b0] ss:$8 sps:$4 sm:$0xff]  }
 0x2d1   : > { %v1184_v24 = vadd.f32 %v1183_v20, %v3918_v59  ;;  %v1297_v27 = vadd.f32 %v1296_v21, %v3920_v60  ;;  %1941 = vmatpush1.bf16.msra.mxu0 %v3432_v7  ;;  %v1360_v35 = vmax.f32 %v1180_v14, 0.0  ;;  %v1362_v36 = vmax.f32 %v1293_v15, 0.0  ;;  %v3446_v14 = vld [vmem:[%s4344_s7 + $0x1c4] ss:$8 sps:$4 sm:$0xff]  }
 0x2d2   : > { %v1363_v25 = vmax.f32 %v1182_v18, 0.0  ;;  %v1365_v33 = vmax.f32 %v1295_v19, 0.0  ;;  %1942 = vmatprep.subr.bf16.mxu0 %v3437_v13 }
 0x2d3   : > { %v1364_v37 = vmax.f32 %v1184_v24, 0.0  ;;  %v1366_v38 = vmax.f32 %v1297_v27, 0.0 }
 0x2d4   : > { %v1403_v39 = vpack.c.bf16 %v1363_v25, %v1359_v30  ;;  %v4092_v40 = vpack.c.bf16 %v1365_v33, %v1361_v32  ;;  %v3444_v30 = vld [vmem:[%s4344_s7 + $0x1c0] ss:$8 sps:$4 sm:$0xff]  }
 0x2d5   : > { %v1404_v41 = vpack.c.bf16 %v1364_v37, %v1360_v35  ;;  %v4094_v42 = vpack.c.bf16 %v1366_v38, %v1362_v36  ;;  %1943 = vmatpush1.bf16.msra.mxu0 %v3435_v29  ;;  %v1187_v43 = vpop.f32.mrb[40].mxu0  ;;  %v1300_v45 = vpop.f32.mrb[40].mxu1  ;;  %v3449_v35 = vld [vmem:[%s4344_s7 + $0x1d4] ss:$8 sps:$4 sm:$0xff]  }
 0x2d6   : > { %v1188_v47 = vadd.f32 %v1187_v43, %v3912_v57  ;;  %v1301_v48 = vadd.f32 %v1300_v45, %v3914_v58  ;;  %v1189_v49 = vpop.f32.mrb[41].mxu0  ;;  %v1302_v50 = vpop.f32.mrb[41].mxu1  ;;  %1944 = vmatprep.subr.bf16.mxu0 %v3440_v34 }
 0x2d7   : > { %v1190_v54 = vadd.f32 %v1189_v49, %v3918_v59  ;;  %v1303_v56 = vadd.f32 %v1302_v50, %v3920_v60  ;;  %v1191_v61 = vpop.f32.mrb[42].mxu0  ;;  %v1304_v62 = vpop.f32.mrb[42].mxu1  ;;  %1893 = vmatprep.mubr.bf16.mxu0 %v1404_v41  ;;  %v3447_v49 = vld [vmem:[%s4344_s7 + $0x1d0] ss:$8 sps:$4 sm:$0xff]  }
 0x2d8   : > { %v1192_v63 = vadd.f32 %v1191_v61, %v3912_v57  ;;  %v1305_v0 = vadd.f32 %v1304_v62, %v3914_v58  ;;  %v1193_v2 = vpop.f32.mrb[43].mxu0  ;;  %v1306_v4 = vpop.f32.mrb[43].mxu1  ;;  %1894 = vmatmul.mubr.bf16.gmra.mrb[68].mxu0 %v1403_v39  ;;  %v1367_v10 = vmax.f32 %v1188_v47, 0.0  ;;  %v1369_v11 = vmax.f32 %v1301_v48, 0.0 }
 0x2d9   : > { %v1194_v6 = vadd.f32 %v1193_v2, %v3918_v59  ;;  %v1307_v7 = vadd.f32 %v1306_v4, %v3920_v60  ;;  %1945 = vmatpush1.bf16.msra.mxu0 %v3438_v46  ;;  %v1368_v15 = vmax.f32 %v1190_v54, 0.0  ;;  %v1370_v16 = vmax.f32 %v1303_v56, 0.0  ;;  %v3450_v4 = vld [vmem:[%s4344_s7 + $0x1e0] ss:$8 sps:$4 sm:$0xff]  }
 0x2da   : > { %v1371_v12 = vmax.f32 %v1192_v63, 0.0  ;;  %v1373_v13 = vmax.f32 %v1305_v0, 0.0  ;;  %1946 = vmatprep.subr.bf16.mxu0 %v3443_v53 }
 0x2db   : > { %v1372_v17 = vmax.f32 %v1194_v6, 0.0  ;;  %v1374_v18 = vmax.f32 %v1307_v7, 0.0  ;;  %v3455_v6 = vld [vmem:[%s4344_s7 + $0x1f4] ss:$8 sps:$4 sm:$0xff]   ;;  %v3453_v7 = vld [vmem:[%s4344_s7 + $0x1f0] ss:$8 sps:$4 sm:$0xff]  }
 0x2dc   : > { %v1407_v19 = vpack.c.bf16 %v1371_v12, %v1367_v10  ;;  %v4116_v20 = vpack.c.bf16 %v1373_v13, %v1369_v11 }
 0x2dd   : > { %v1408_v21 = vpack.c.bf16 %v1372_v17, %v1368_v15  ;;  %v1410_v24 = vpack.c.bf16 %v1374_v18, %v1370_v16  ;;  %1947 = vmatpush1.bf16.msra.mxu0 %v3441_v9  ;;  %v1197_v27 = vpop.f32.mrb[44].mxu0  ;;  %v1310_v29 = vpop.f32.mrb[44].mxu1  ;;  %v3473_v17 = vld [vmem:[%s4348_s11 + $0x8] sm:$0xff]  }
 0x2de   : > { %v1198_v32 = vadd.f32 %v1197_v27, %v3912_v57  ;;  %v1311_v25 = vadd.f32 %v1310_v29, %v3914_v58  ;;  %v1199_v33 = vpop.f32.mrb[45].mxu0  ;;  %v1312_v34 = vpop.f32.mrb[45].mxu1  ;;  %1948 = vmatprep.subr.bf16.mxu0 %v3446_v14 }
 0x2df   : > { %v1200_v36 = vadd.f32 %v1199_v33, %v3918_v59  ;;  %v1313_v37 = vadd.f32 %v1312_v34, %v3920_v60  ;;  %v1201_v38 = vpop.f32.mrb[46].mxu0  ;;  %v1314_v39 = vpop.f32.mrb[46].mxu1  ;;  %1903 = vmatprep.mubr.bf16.mxu0 %v1408_v21 }
 0x2e0   : > { %v1202_v41 = vadd.f32 %v1201_v38, %v3912_v57  ;;  %v1315_v43 = vadd.f32 %v1314_v39, %v3914_v58  ;;  %v1203_v45 = vpop.f32.mrb[47].mxu0  ;;  %v1316_v46 = vpop.f32.mrb[47].mxu1  ;;  %1904 = vmatmul.mubr.bf16.gmra.mrb[72].mxu0 %v1407_v19  ;;  %v1375_v50 = vmax.f32 %v1198_v32, 0.0  ;;  %v1377_v53 = vmax.f32 %v1311_v25, 0.0  ;;  %v3452_v57 = vld [vmem:[%s4344_s7 + $0x1e4] ss:$8 sps:$4 sm:$0xff]  }
 0x2e1   : > { %v1204_v47 = vadd.f32 %v1203_v45, %v3918_v59  ;;  %v1317_v48 = vadd.f32 %v1316_v46, %v3920_v60  ;;  %1949 = vmatpush1.bf16.msra.mxu0 %v3444_v30  ;;  %v1376_v58 = vmax.f32 %v1200_v36, 0.0  ;;  %v1378_v61 = vmax.f32 %v1313_v37, 0.0  ;;  %v3474_v30 = vld [vmem:[%s4348_s11 + $0x10] sm:$0xff]  }
 0x2e2   : > { %v1379_v54 = vmax.f32 %v1202_v41, 0.0  ;;  %v1381_v56 = vmax.f32 %v1315_v43, 0.0  ;;  %1950 = vmatprep.subr.bf16.mxu0 %v3449_v35 }
 0x2e3   : > { %v1380_v62 = vmax.f32 %v1204_v47, 0.0  ;;  %v1382_v59 = vmax.f32 %v1317_v48, 0.0 }
 0x2e4   : > { %v1411_v63 = vpack.c.bf16 %v1379_v54, %v1375_v50  ;;  %v1413_v60 = vpack.c.bf16 %v1381_v56, %v1377_v53 }
 0x2e5   : > { %v1412_v0 = vpack.c.bf16 %v1380_v62, %v1376_v58  ;;  %v1414_v2 = vpack.c.bf16 %v1382_v59, %v1378_v61  ;;  %1951 = vmatpush1.bf16.msra.mxu0 %v3447_v49 }
 0x2e6   : > { %1952 = vmatprep.subr.bf16.mxu0 %v3452_v57 }
 0x2e7   : > { %1913 = vmatprep.mubr.bf16.mxu0 %v1412_v0 }
 0x2e8   : > { %1914 = vmatmul.mubr.bf16.gmra.mrb[76].mxu0 %v1411_v63 }
 0x2e9   : > { %1953 = vmatpush1.bf16.msra.mxu0 %v3450_v4  ;;  %1956 = vmatprep.mubr.bf16.mxu0 %v3947_v31  ;;  %v3471_v31 = vld [vmem:[%s4346_s9 + $0x38] sm:$0xff]  }
 0x2ea   : > { %1954 = vmatprep.subr.bf16.mxu0 %v3455_v6 }
 0x2ed   : > { %1955 = vmatpush1.bf16.msra.mxu0 %v3453_v7 }
 0x2f0   : > { %1957 = vmatmul.mubr.bf16.vlgmr.msra.gmra.mrb[48].mxu0 %v3942_v28  ;;  %v3470_v28 = vld [vmem:[%s4346_s9 + $0x78] sm:$0xff]  }
 0x2f1   : > { %1966 = vmatprep.mubr.bf16.mxu0 %v3983_v8  ;;  %3030 = vmatprep.subr.bf16.mxu1 %v3470_v28  ;;  %v1479_v8 = vld [vmem:[%s4345_s8] sm:$0x3] }
 0x2f2   : > { %3031 = vmatpush3.bf16.msra.mxu1 %v3471_v31 }
 0x2f8   : > { %1967 = vmatmul.mubr.bf16.gmra.mrb[52].mxu0 %v3978_v5  ;;  %v3472_v5 = vld [vmem:[%s4348_s11] sm:$0xff]  }
 0x2f9   : > { %1976 = vmatprep.mubr.bf16.mxu0 %v4019_v23  ;;  %3154 = vmatprep.subr.bf16.mxu1 %v3472_v5  ;;  %v4178_v23 = vrot.slane %v1479_v8, %v975_v55 }
 0x300   : > { %1977 = vmatmul.mubr.bf16.gmra.mrb[56].mxu0 %v4014_v44  ;;  %v4174_v44 = vrot.slane %v1479_v8, %v971_v52 }
 0x301   : > { %1986 = vmatprep.mubr.bf16.mxu0 %v4046_v26 }
 0x308   : > { %1987 = vmatmul.mubr.bf16.gmra.mrb[60].mxu0 %v4044_v22 }
 0x309   : > { %1996 = vmatprep.mubr.bf16.mxu0 %v4070_v3 }
 0x310   : > { %1997 = vmatmul.mubr.bf16.gmra.mrb[64].mxu0 %v4068_v1 }
 0x311   : > { %2006 = vmatprep.mubr.bf16.mxu0 %v4094_v42 }
 0x318   : > { %2007 = vmatmul.mubr.bf16.gmra.mrb[68].mxu0 %v4092_v40 }
 0x319   : > { %2016 = vmatprep.mubr.bf16.mxu0 %v1410_v24 }
 0x320   : > { %2017 = vmatmul.mubr.bf16.gmra.mrb[72].mxu0 %v4116_v20 }
 0x321   : > { %2026 = vmatprep.mubr.bf16.mxu0 %v1414_v2 }
 0x328   : > { %2027 = vmatmul.mubr.bf16.gmra.mrb[76].mxu0 %v1413_v60 }
 0x3c3   : > { %v1958_v22 = vpop.f32.mrb[48].mxu0 }
 0x3c4   : > { %v3218_v26 = vadd.f32 %v1958_v22, %v4174_v44  ;;  %v1960_v1 = vpop.f32.mrb[49].mxu0 }
 0x3c5   : > { %v3219_v3 = vadd.f32 %v1960_v1, %v4178_v23  ;;  %v1962_v40 = vpop.f32.mrb[50].mxu0 }
 0x3c6   : > { %v3220_v42 = vadd.f32 %v1962_v40, %v4174_v44  ;;  %v1964_v9 = vpop.f32.mrb[51].mxu0  ;;  %v2037_v11 = vmax.f32 %v3218_v26, 0.0 }
 0x3c7   : > { %v3221_v10 = vadd.f32 %v1964_v9, %v4178_v23  ;;  %v2038_v52 = vmax.f32 %v3219_v3, 0.0 }
 0x3c8   : > { %v2039_v12 = vmax.f32 %v3220_v42, 0.0 }
 0x3c9   : > { %v2040_v13 = vmax.f32 %v3221_v10, 0.0 }
 0x3ca   : > { %v2069_v14 = vpack.c.bf16 %v2039_v12, %v2037_v11 }
 0x3cb   : > { %v2070_v51 = vpack.c.bf16 %v2040_v13, %v2038_v52  ;;  %v1968_v55 = vpop.f32.mrb[52].mxu0 }
 0x3cc   : > { %v3222_v15 = vadd.f32 %v1968_v55, %v4174_v44  ;;  %v1970_v16 = vpop.f32.mrb[53].mxu0 }
 0x3cd   : > { %v3223_v18 = vadd.f32 %v1970_v16, %v4178_v23  ;;  %v1972_v19 = vpop.f32.mrb[54].mxu0  ;;  %2252 = vmatprep.mubr.bf16.mxu1 %v2070_v51 }
 0x3ce   : > { %v3224_v20 = vadd.f32 %v1972_v19, %v4174_v44  ;;  %v1974_v21 = vpop.f32.mrb[55].mxu0  ;;  %2253 = vmatmul.mubr.bf16.vlgmr.msra.gmra.mrb[48].mxu1 %v2069_v14  ;;  %v2041_v27 = vmax.f32 %v3222_v15, 0.0 }
 0x3cf   : > { %v3225_v24 = vadd.f32 %v1974_v21, %v4178_v23  ;;  %3155 = vmatpush3.bf16.msra.mxu1 %v3472_v5  ;;  %v2042_v32 = vmax.f32 %v3223_v18, 0.0 }
 0x3d0   : > { %v2043_v29 = vmax.f32 %v3224_v20, 0.0  ;;  %3156 = vmatprep.subr.bf16.mxu1 %v3473_v17 }
 0x3d1   : > { %v2044_v25 = vmax.f32 %v3225_v24, 0.0 }
 0x3d2   : > { %v2071_v33 = vpack.c.bf16 %v2043_v29, %v2041_v27 }
 0x3d3   : > { %v2072_v34 = vpack.c.bf16 %v2044_v25, %v2042_v32  ;;  %v1978_v35 = vpop.f32.mrb[56].mxu0  ;;  %3157 = vmatpush3.bf16.msra.mxu1 %v3473_v17 }
 0x3d4   : > { %v3226_v36 = vadd.f32 %v1978_v35, %v4174_v44  ;;  %v1980_v37 = vpop.f32.mrb[57].mxu0  ;;  %3158 = vmatprep.subr.bf16.mxu1 %v3474_v30 }
 0x3d5   : > { %v3227_v38 = vadd.f32 %v1980_v37, %v4178_v23  ;;  %v1982_v39 = vpop.f32.mrb[58].mxu0  ;;  %2260 = vmatprep.mubr.bf16.mxu1 %v2072_v34 }
 0x3d6   : > { %v3228_v41 = vadd.f32 %v1982_v39, %v4174_v44  ;;  %v1984_v43 = vpop.f32.mrb[59].mxu0  ;;  %2261 = vmatmul.mubr.bf16.gmra.mrb[52].mxu1 %v2071_v33  ;;  %v2045_v46 = vmax.f32 %v3226_v36, 0.0 }
 0x3d7   : > { %v3229_v45 = vadd.f32 %v1984_v43, %v4178_v23  ;;  %3159 = vmatpush3.bf16.msra.mxu1 %v3474_v30  ;;  %v2046_v48 = vmax.f32 %v3227_v38, 0.0 }
 0x3d8   : > { %v2047_v47 = vmax.f32 %v3228_v41, 0.0 }
 0x3d9   : > { %v2048_v49 = vmax.f32 %v3229_v45, 0.0 }
 0x3da   : > { %v2073_v50 = vpack.c.bf16 %v2047_v47, %v2045_v46 }
 0x3db   : > { %v2074_v53 = vpack.c.bf16 %v2048_v49, %v2046_v48  ;;  %v1988_v54 = vpop.f32.mrb[60].mxu0 }
 0x3dc   : > { %v3230_v56 = vadd.f32 %v1988_v54, %v4174_v44  ;;  %v1990_v57 = vpop.f32.mrb[61].mxu0 }
 0x3dd   : > { %v3231_v58 = vadd.f32 %v1990_v57, %v4178_v23  ;;  %v1992_v61 = vpop.f32.mrb[62].mxu0  ;;  %2268 = vmatprep.mubr.bf16.mxu1 %v2074_v53 }
 0x3de   : > { %v3232_v62 = vadd.f32 %v1992_v61, %v4174_v44  ;;  %v1994_v59 = vpop.f32.mrb[63].mxu0  ;;  %2269 = vmatmul.mubr.bf16.gmra.mrb[56].mxu1 %v2073_v50  ;;  %v2049_v60 = vmax.f32 %v3230_v56, 0.0 }
 0x3df   : > { %v3233_v63 = vadd.f32 %v1994_v59, %v4178_v23  ;;  %v2050_v2 = vmax.f32 %v3231_v58, 0.0 }
 0x3e0   : > { %v2051_v0 = vmax.f32 %v3232_v62, 0.0 }
 0x3e1   : > { %v2052_v4 = vmax.f32 %v3233_v63, 0.0 }
 0x3e2   : > { %v2075_v6 = vpack.c.bf16 %v2051_v0, %v2049_v60  ;;  %v3475_v60 = vld [vmem:[%s4348_s11 + $0x18] sm:$0xff]   ;;  %v3478_v0 = vld [vmem:[%s4348_s11 + $0x30] sm:$0xff]  }
 0x3e3   : > { %v2076_v7 = vpack.c.bf16 %v2052_v4, %v2050_v2  ;;  %v1998_v28 = vpop.f32.mrb[64].mxu0  ;;  %3160 = vmatprep.subr.bf16.mxu1 %v3475_v60  ;;  %v3479_v2 = vld [vmem:[%s4348_s11 + $0x38] sm:$0xff]   ;;  %v3480_v4 = vld [vmem:[%s4350_s13] sm:$0xff]  }
 0x3e4   : > { %v3234_v31 = vadd.f32 %v1998_v28, %v4174_v44  ;;  %v2000_v5 = vpop.f32.mrb[65].mxu0  ;;  %3161 = vmatpush3.bf16.msra.mxu1 %v3475_v60 }
 0x3e5   : > { %v3235_v8 = vadd.f32 %v2000_v5, %v4178_v23  ;;  %v2002_v22 = vpop.f32.mrb[66].mxu0  ;;  %2276 = vmatprep.mubr.bf16.mxu1 %v2076_v7  ;;  %v4239_v7 = vld [vmem:[%s4347_s10] ss:$0 sm:$0xff] }
 0x3e6   : > { %v3236_v26 = vadd.f32 %v2002_v22, %v4174_v44  ;;  %v2004_v1 = vpop.f32.mrb[67].mxu0  ;;  %2277 = vmatmul.mubr.bf16.gmra.mrb[60].mxu1 %v2075_v6  ;;  %v2053_v40 = vmax.f32 %v3234_v31, 0.0 }
 0x3e7   : > { %v3237_v3 = vadd.f32 %v2004_v1, %v4178_v23  ;;  %v2054_v9 = vmax.f32 %v3235_v8, 0.0 }
 0x3e8   : > { %v2055_v42 = vmax.f32 %v3236_v26, 0.0 }
 0x3e9   : > { %v2056_v10 = vmax.f32 %v3237_v3, 0.0 }
 0x3ea   : > { %v2077_v11 = vpack.c.bf16 %v2055_v42, %v2053_v40 }
 0x3eb   : > { %v2078_v12 = vpack.c.bf16 %v2056_v10, %v2054_v9  ;;  %v2008_v52 = vpop.f32.mrb[68].mxu0 }
 0x3ec   : > { %v3238_v13 = vadd.f32 %v2008_v52, %v4174_v44  ;;  %v2010_v14 = vpop.f32.mrb[69].mxu0 }
 0x3ed   : > { %v3239_v51 = vadd.f32 %v2010_v14, %v4178_v23  ;;  %v2012_v55 = vpop.f32.mrb[70].mxu0  ;;  %2284 = vmatprep.mubr.bf16.mxu1 %v2078_v12 }
 0x3ee   : > { %v3240_v15 = vadd.f32 %v2012_v55, %v4174_v44  ;;  %v2014_v16 = vpop.f32.mrb[71].mxu0  ;;  %2285 = vmatmul.mubr.bf16.gmra.mrb[64].mxu1 %v2077_v11  ;;  %v2057_v18 = vmax.f32 %v3238_v13, 0.0 }
 0x3ef   : > { %v3241_v17 = vadd.f32 %v2014_v16, %v4178_v23  ;;  %v2058_v20 = vmax.f32 %v3239_v51, 0.0 }
 0x3f0   : > { %v2059_v19 = vmax.f32 %v3240_v15, 0.0 }
 0x3f1   : > { %v2060_v21 = vmax.f32 %v3241_v17, 0.0 }
 0x3f2   : > { %v2079_v24 = vpack.c.bf16 %v2059_v19, %v2057_v18 }
 0x3f3   : > { %v2080_v27 = vpack.c.bf16 %v2060_v21, %v2058_v20  ;;  %v2018_v29 = vpop.f32.mrb[72].mxu0  ;;  %v3481_v21 = vld [vmem:[%s4350_s13 + $0x8] sm:$0xff]  }
 0x3f4   : > { %v3242_v30 = vadd.f32 %v2018_v29, %v4174_v44  ;;  %v2020_v32 = vpop.f32.mrb[73].mxu0 }
 0x3f5   : > { %v3243_v25 = vadd.f32 %v2020_v32, %v4178_v23  ;;  %v2022_v33 = vpop.f32.mrb[74].mxu0  ;;  %2292 = vmatprep.mubr.bf16.mxu1 %v2080_v27  ;;  %v3482_v32 = vld [vmem:[%s4350_s13 + $0x10] sm:$0xff]  }
 0x3f6   : > { %v3244_v34 = vadd.f32 %v2022_v33, %v4174_v44  ;;  %v2024_v35 = vpop.f32.mrb[75].mxu0  ;;  %2293 = vmatmul.mubr.bf16.gmra.mrb[68].mxu1 %v2079_v24  ;;  %v2061_v37 = vmax.f32 %v3242_v30, 0.0 }
 0x3f7   : > { %v3245_v36 = vadd.f32 %v2024_v35, %v4178_v23  ;;  %v2062_v39 = vmax.f32 %v3243_v25, 0.0 }
 0x3f8   : > { %v2063_v38 = vmax.f32 %v3244_v34, 0.0 }
 0x3f9   : > { %v2064_v41 = vmax.f32 %v3245_v36, 0.0 }
 0x3fa   : > { %v2081_v43 = vpack.c.bf16 %v2063_v38, %v2061_v37 }
 0x3fb   : > { %v2082_v45 = vpack.c.bf16 %v2064_v41, %v2062_v39  ;;  %v2028_v46 = vpop.f32.mrb[76].mxu0  ;;  %v3483_v39 = vld [vmem:[%s4350_s13 + $0x18] sm:$0xff]  }
 0x3fc   : > { %v3246_v47 = vadd.f32 %v2028_v46, %v4174_v44  ;;  %v2030_v48 = vpop.f32.mrb[77].mxu0 }
 0x3fd   : > { %v3247_v49 = vadd.f32 %v2030_v48, %v4178_v23  ;;  %v2032_v50 = vpop.f32.mrb[78].mxu0  ;;  %2300 = vmatprep.mubr.bf16.mxu1 %v2082_v45 }
 0x3fe   : > { %v3248_v53 = vadd.f32 %v2032_v50, %v4174_v44  ;;  %v2034_v54 = vpop.f32.mrb[79].mxu0  ;;  %2301 = vmatmul.mubr.bf16.gmra.mrb[72].mxu1 %v2081_v43  ;;  %v2065_v57 = vmax.f32 %v3246_v47, 0.0  ;;  %v3476_v44 = vld [vmem:[%s4348_s11 + $0x20] sm:$0xff]  }
 0x3ff   : > { %v3249_v56 = vadd.f32 %v2034_v54, %v4178_v23  ;;  %v2066_v61 = vmax.f32 %v3247_v49, 0.0  ;;  %3162 = vmatprep.subr.bf16.mxu1 %v3476_v44  ;;  %v3477_v23 = vld [vmem:[%s4348_s11 + $0x28] sm:$0xff]   ;;  %v3484_v47 = vld [vmem:[%s4350_s13 + $0x20] sm:$0xff]  }
 0x400   : > { %v2067_v58 = vmax.f32 %v3248_v53, 0.0  ;;  %3163 = vmatpush3.bf16.msra.mxu1 %v3476_v44 }
 0x401   : > { %v2068_v62 = vmax.f32 %v3249_v56, 0.0  ;;  %3164 = vmatprep.subr.bf16.mxu1 %v3477_v23 }
 0x402   : > { %v2083_v59 = vpack.c.bf16 %v2067_v58, %v2065_v57  ;;  %v3485_v58 = vld [vmem:[%s4350_s13 + $0x28] sm:$0xff]  }
 0x403   : > { %v2084_v63 = vpack.c.bf16 %v2068_v62, %v2066_v61 }
 0x404   : > { %3165 = vmatpush3.bf16.msra.mxu1 %v3477_v23 }
 0x405   : > { %2308 = vmatprep.mubr.bf16.mxu1 %v2084_v63  ;;  %3166 = vmatprep.subr.bf16.mxu1 %v3478_v0 }
 0x406   : > { %2309 = vmatmul.mubr.bf16.gmra.mrb[76].mxu1 %v2083_v59 }
 0x408   : > { %3167 = vmatpush3.bf16.msra.mxu1 %v3478_v0 }
 0x409   : > { %3168 = vmatprep.subr.bf16.mxu1 %v3479_v2 }
 0x40c   : > { %3169 = vmatpush3.bf16.msra.mxu1 %v3479_v2 }
 0x40d   : > { %3186 = vmatprep.subr.bf16.mxu1 %v3480_v4 }
 0x4a1   : > { %v3032_v6 = vpop.f32.mrb[48].mxu1 }
 0x4a2   : > { %v3033_v28 = vpop.f32.mrb[49].mxu1 }
 0x4a3   : > { %v3034_v31 = vadd.f32 %v3033_v28, %v3032_v6  ;;  %v3035_v5 = vpop.f32.mrb[50].mxu1 }
 0x4a4   : > { %v3036_v8 = vpop.f32.mrb[51].mxu1 }
 0x4a5   : > { %v2255_v22 = vadd.f32 %v3034_v31, %v4239_v7  ;;  %v3037_v26 = vadd.f32 %v3036_v8, %v3035_v5 }
 0x4a7   : > { %v2258_v1 = vadd.f32 %v3037_v26, %v4239_v7  ;;  %v2317_v3 = vmax.f32 %v2255_v22, 0.0 }
 0x4a9   : > { %v2318_v40 = vmax.f32 %v2258_v1, 0.0  ;;  %v3038_v42 = vpop.f32.mrb[52].mxu1 }
 0x4aa   : > { %v3039_v9 = vpop.f32.mrb[53].mxu1 }
 0x4ab   : > { %v3040_v10 = vadd.f32 %v3039_v9, %v3038_v42  ;;  %v3041_v11 = vpop.f32.mrb[54].mxu1  ;;  %v2333_v12 = vpack.c.bf16 %v2318_v40, %v2317_v3 }
 0x4ac   : > { %v3042_v52 = vpop.f32.mrb[55].mxu1 }
 0x4ad   : > { %v2263_v13 = vadd.f32 %v3040_v10, %v4239_v7  ;;  %v3043_v14 = vadd.f32 %v3042_v52, %v3041_v11  ;;  %3170 = vmatprep.mubr.bf16.mxu1 %v2333_v12 }
 0x4af   : > { %v2266_v51 = vadd.f32 %v3043_v14, %v4239_v7  ;;  %v2319_v55 = vmax.f32 %v2263_v13, 0.0 }
 0x4b1   : > { %v2320_v15 = vmax.f32 %v2266_v51, 0.0  ;;  %v3044_v16 = vpop.f32.mrb[56].mxu1 }
 0x4b2   : > { %v3045_v17 = vpop.f32.mrb[57].mxu1 }
 0x4b3   : > { %v2334_v18 = vpack.c.bf16 %v2320_v15, %v2319_v55  ;;  %v3046_v19 = vadd.f32 %v3045_v17, %v3044_v16  ;;  %v3047_v20 = vpop.f32.mrb[58].mxu1 }
 0x4b4   : > { %v3048_v24 = vpop.f32.mrb[59].mxu1 }
 0x4b5   : > { %v2271_v27 = vadd.f32 %v3046_v19, %v4239_v7  ;;  %v3049_v29 = vadd.f32 %v3048_v24, %v3047_v20  ;;  %3171 = vmatmul.mubr.bf16.vlgmr.msra.gmra.mrb[80].mxu1 %v2334_v18 }
 0x4b6   : > { %3187 = vmatpush3.bf16.msra.mxu1 %v3480_v4 }
 0x4b7   : > { %v2274_v30 = vadd.f32 %v3049_v29, %v4239_v7  ;;  %3188 = vmatprep.subr.bf16.mxu1 %v3481_v21  ;;  %v2321_v25 = vmax.f32 %v2271_v27, 0.0 }
 0x4b9   : > { %v2322_v33 = vmax.f32 %v2274_v30, 0.0  ;;  %v3050_v34 = vpop.f32.mrb[60].mxu1  ;;  %v3486_v30 = vld [vmem:[%s4350_s13 + $0x30] sm:$0xff]  }
 0x4ba   : > { %v3051_v35 = vpop.f32.mrb[61].mxu1  ;;  %3189 = vmatpush3.bf16.msra.mxu1 %v3481_v21 }
 0x4bb   : > { %v3052_v36 = vadd.f32 %v3051_v35, %v3050_v34  ;;  %v3053_v37 = vpop.f32.mrb[62].mxu1  ;;  %v2335_v38 = vpack.c.bf16 %v2322_v33, %v2321_v25  ;;  %3190 = vmatprep.subr.bf16.mxu1 %v3482_v32 }
 0x4bc   : > { %v3054_v41 = vpop.f32.mrb[63].mxu1 }
 0x4bd   : > { %v2279_v43 = vadd.f32 %v3052_v36, %v4239_v7  ;;  %v3055_v45 = vadd.f32 %v3054_v41, %v3053_v37  ;;  %3174 = vmatprep.mubr.bf16.mxu1 %v2335_v38 }
 0x4be   : > { %3191 = vmatpush3.bf16.msra.mxu1 %v3482_v32  ;;  %v3487_v32 = vld [vmem:[%s4350_s13 + $0x38] sm:$0xff]  }
 0x4bf   : > { %v2282_v46 = vadd.f32 %v3055_v45, %v4239_v7  ;;  %3192 = vmatprep.subr.bf16.mxu1 %v3483_v39  ;;  %v2323_v48 = vmax.f32 %v2279_v43, 0.0 }
 0x4c1   : > { %v2324_v49 = vmax.f32 %v2282_v46, 0.0  ;;  %v3056_v50 = vpop.f32.mrb[64].mxu1 }
 0x4c2   : > { %v3057_v53 = vpop.f32.mrb[65].mxu1  ;;  %3193 = vmatpush3.bf16.msra.mxu1 %v3483_v39 }
 0x4c3   : > { %v3058_v54 = vadd.f32 %v3057_v53, %v3056_v50  ;;  %v3059_v56 = vpop.f32.mrb[66].mxu1  ;;  %v2336_v57 = vpack.c.bf16 %v2324_v49, %v2323_v48  ;;  %3194 = vmatprep.subr.bf16.mxu1 %v3484_v47 }
 0x4c4   : > { %v3060_v61 = vpop.f32.mrb[67].mxu1 }
 0x4c5   : > { %v2287_v62 = vadd.f32 %v3058_v54, %v4239_v7  ;;  %v3061_v59 = vadd.f32 %v3060_v61, %v3059_v56  ;;  %3175 = vmatmul.mubr.bf16.gmra.mrb[84].mxu1 %v2336_v57 }
 0x4c6   : > { %3195 = vmatpush3.bf16.msra.mxu1 %v3484_v47 }
 0x4c7   : > { %v2290_v63 = vadd.f32 %v3061_v59, %v4239_v7  ;;  %3196 = vmatprep.subr.bf16.mxu1 %v3485_v58  ;;  %v2325_v60 = vmax.f32 %v2287_v62, 0.0 }
 0x4c9   : > { %v2326_v44 = vmax.f32 %v2290_v63, 0.0  ;;  %v3062_v23 = vpop.f32.mrb[68].mxu1 }
 0x4ca   : > { %v3063_v0 = vpop.f32.mrb[69].mxu1  ;;  %3197 = vmatpush3.bf16.msra.mxu1 %v3485_v58 }
 0x4cb   : > { %v3064_v2 = vadd.f32 %v3063_v0, %v3062_v23  ;;  %v3065_v4 = vpop.f32.mrb[70].mxu1  ;;  %v2337_v6 = vpack.c.bf16 %v2326_v44, %v2325_v60  ;;  %3198 = vmatprep.subr.bf16.mxu1 %v3486_v30 }
 0x4cc   : > { %v3066_v28 = vpop.f32.mrb[71].mxu1 }
 0x4cd   : > { %v2295_v31 = vadd.f32 %v3064_v2, %v4239_v7  ;;  %v3067_v5 = vadd.f32 %v3066_v28, %v3065_v4  ;;  %3178 = vmatprep.mubr.bf16.mxu1 %v2337_v6 }
 0x4ce   : > { %3199 = vmatpush3.bf16.msra.mxu1 %v3486_v30 }
 0x4cf   : > { %v2298_v8 = vadd.f32 %v3067_v5, %v4239_v7  ;;  %v2327_v22 = vmax.f32 %v2295_v31, 0.0  ;;  %3200 = vmatprep.subr.bf16.mxu1 %v3487_v32 }
 0x4d1   : > { %v2328_v26 = vmax.f32 %v2298_v8, 0.0  ;;  %v3068_v1 = vpop.f32.mrb[72].mxu1 }
 0x4d2   : > { %v3069_v3 = vpop.f32.mrb[73].mxu1  ;;  %3201 = vmatpush3.bf16.msra.mxu1 %v3487_v32 }
 0x4d3   : > { %v3070_v40 = vadd.f32 %v3069_v3, %v3068_v1  ;;  %v3071_v42 = vpop.f32.mrb[74].mxu1  ;;  %v2338_v9 = vpack.c.bf16 %v2328_v26, %v2327_v22 }
 0x4d4   : > { %v3072_v10 = vpop.f32.mrb[75].mxu1 }
 0x4d5   : > { %v2303_v11 = vadd.f32 %v3070_v40, %v4239_v7  ;;  %v3073_v12 = vadd.f32 %v3072_v10, %v3071_v42  ;;  %3179 = vmatmul.mubr.bf16.gmra.mrb[88].mxu1 %v2338_v9 }
 0x4d7   : > { %v2306_v52 = vadd.f32 %v3073_v12, %v4239_v7  ;;  %v2329_v13 = vmax.f32 %v2303_v11, 0.0 }
 0x4d9   : > { %v2330_v14 = vmax.f32 %v2306_v52, 0.0  ;;  %v3074_v51 = vpop.f32.mrb[76].mxu1 }
 0x4da   : > { %v3075_v55 = vpop.f32.mrb[77].mxu1 }
 0x4db   : > { %v3076_v15 = vadd.f32 %v3075_v55, %v3074_v51  ;;  %v3077_v16 = vpop.f32.mrb[78].mxu1  ;;  %v2339_v17 = vpack.c.bf16 %v2330_v14, %v2329_v13 }
 0x4dc   : > { %v3078_v18 = vpop.f32.mrb[79].mxu1 }
 0x4dd   : > { %v2311_v19 = vadd.f32 %v3076_v15, %v4239_v7  ;;  %v3079_v20 = vadd.f32 %v3078_v18, %v3077_v16  ;;  %3182 = vmatprep.mubr.bf16.mxu1 %v2339_v17 }
 0x4df   : > { %v2314_v21 = vadd.f32 %v3079_v20, %v4239_v7  ;;  %v2331_v24 = vmax.f32 %v2311_v19, 0.0  ;;  %v2975_v7 = vld [vmem:[%s4349_s12] ss:$0 sm:$0xff] }
 0x4e0   : > { %v2984_v20 = vld [vmem:[%s4351_s14] ss:$0 sm:$0xff] }
 0x4e1   : > { %v2332_v27 = vmax.f32 %v2314_v21, 0.0 }
 0x4e3   : > { %v2340_v29 = vpack.c.bf16 %v2332_v27, %v2331_v24 }
 0x4e5   : > { %3183 = vmatmul.mubr.bf16.gmra.mrb[92].mxu1 %v2340_v29 }
 0x588   : > { %v3172_v25 = vpop.f32.mrb[80].mxu1 }
 0x589   : > { %v2455_v33 = vadd.f32 %v3172_v25, %v2975_v7  ;;  %v2446_v34 = vpop.f32.mrb[81].mxu1 }
 0x58a   : > { %v2447_v35 = vadd.f32 %v2975_v7, %v2446_v34  ;;  %v3173_v36 = vpop.f32.mrb[82].mxu1 }
 0x58b   : > { %v2458_v37 = vadd.f32 %v3173_v36, %v2975_v7  ;;  %v2449_v38 = vpop.f32.mrb[83].mxu1  ;;  %v2511_v41 = vmax.f32 %v2455_v33, 0.0 }
 0x58c   : > { %v2450_v39 = vadd.f32 %v2975_v7, %v2449_v38  ;;  %v2509_v45 = vmax.f32 %v2447_v35, 0.0 }
 0x58d   : > { %v2512_v43 = vmax.f32 %v2458_v37, 0.0 }
 0x58e   : > { %v2510_v46 = vmax.f32 %v2450_v39, 0.0 }
 0x58f   : > { %v2526_v47 = vpack.c.bf16 %v2512_v43, %v2511_v41 }
 0x590   : > { %v2525_v48 = vpack.c.bf16 %v2510_v46, %v2509_v45 }
 0x592   : > { %3202 = vmatprep.mubr.bf16.mxu1 %v2525_v48 }
 0x593   : > { %3203 = vmatmul.mubr.bf16.vlgmr.msra.gmra.mrb[96].mxu1 %v2526_v47 }
 0x598   : > { %v3176_v49 = vpop.f32.mrb[84].mxu1 }
 0x599   : > { %v2471_v50 = vadd.f32 %v3176_v49, %v2975_v7  ;;  %v2462_v53 = vpop.f32.mrb[85].mxu1 }
 0x59a   : > { %v2463_v54 = vadd.f32 %v2975_v7, %v2462_v53  ;;  %v3177_v56 = vpop.f32.mrb[86].mxu1 }
 0x59b   : > { %v2474_v57 = vadd.f32 %v3177_v56, %v2975_v7  ;;  %v2465_v58 = vpop.f32.mrb[87].mxu1  ;;  %v2515_v62 = vmax.f32 %v2471_v50, 0.0 }
 0x59c   : > { %v2466_v61 = vadd.f32 %v2975_v7, %v2465_v58  ;;  %v2513_v63 = vmax.f32 %v2463_v54, 0.0 }
 0x59d   : > { %v2516_v59 = vmax.f32 %v2474_v57, 0.0 }
 0x59e   : > { %v2514_v60 = vmax.f32 %v2466_v61, 0.0 }
 0x59f   : > { %v2528_v44 = vpack.c.bf16 %v2516_v59, %v2515_v62 }
 0x5a0   : > { %v2527_v23 = vpack.c.bf16 %v2514_v60, %v2513_v63 }
 0x5a2   : > { %3206 = vmatprep.mubr.bf16.mxu1 %v2527_v23 }
 0x5a3   : > { %3207 = vmatmul.mubr.bf16.gmra.mrb[100].mxu1 %v2528_v44 }
 0x5a8   : > { %v3180_v0 = vpop.f32.mrb[88].mxu1 }
 0x5a9   : > { %v2487_v2 = vadd.f32 %v3180_v0, %v2975_v7  ;;  %v2478_v4 = vpop.f32.mrb[89].mxu1 }
 0x5aa   : > { %v2479_v6 = vadd.f32 %v2975_v7, %v2478_v4  ;;  %v3181_v28 = vpop.f32.mrb[90].mxu1 }
 0x5ab   : > { %v2490_v31 = vadd.f32 %v3181_v28, %v2975_v7  ;;  %v2481_v5 = vpop.f32.mrb[91].mxu1  ;;  %v2519_v22 = vmax.f32 %v2487_v2, 0.0 }
 0x5ac   : > { %v2482_v8 = vadd.f32 %v2975_v7, %v2481_v5  ;;  %v2517_v1 = vmax.f32 %v2479_v6, 0.0 }
 0x5ad   : > { %v2520_v26 = vmax.f32 %v2490_v31, 0.0 }
 0x5ae   : > { %v2518_v3 = vmax.f32 %v2482_v8, 0.0 }
 0x5af   : > { %v2530_v40 = vpack.c.bf16 %v2520_v26, %v2519_v22 }
 0x5b0   : > { %v2529_v42 = vpack.c.bf16 %v2518_v3, %v2517_v1 }
 0x5b2   : > { %3210 = vmatprep.mubr.bf16.mxu1 %v2529_v42 }
 0x5b3   : > { %3211 = vmatmul.mubr.bf16.gmra.mrb[104].mxu1 %v2530_v40 }
 0x5b8   : > { %v3184_v9 = vpop.f32.mrb[92].mxu1 }
 0x5b9   : > { %v2503_v10 = vadd.f32 %v3184_v9, %v2975_v7  ;;  %v2494_v11 = vpop.f32.mrb[93].mxu1 }
 0x5ba   : > { %v2495_v12 = vadd.f32 %v2975_v7, %v2494_v11  ;;  %v3185_v52 = vpop.f32.mrb[94].mxu1 }
 0x5bb   : > { %v2506_v13 = vadd.f32 %v3185_v52, %v2975_v7  ;;  %v2497_v14 = vpop.f32.mrb[95].mxu1  ;;  %v2523_v55 = vmax.f32 %v2503_v10, 0.0 }
 0x5bc   : > { %v2498_v51 = vadd.f32 %v2975_v7, %v2497_v14  ;;  %v2521_v16 = vmax.f32 %v2495_v12, 0.0 }
 0x5bd   : > { %v2524_v15 = vmax.f32 %v2506_v13, 0.0 }
 0x5be   : > { %v2522_v17 = vmax.f32 %v2498_v51, 0.0 }
 0x5bf   : > { %v2532_v18 = vpack.c.bf16 %v2524_v15, %v2523_v55 }
 0x5c0   : > { %v2531_v19 = vpack.c.bf16 %v2522_v17, %v2521_v16 }
 0x5c2   : > { %3214 = vmatprep.mubr.bf16.mxu1 %v2531_v19 }
 0x5c3   : > { %3215 = vmatmul.mubr.bf16.gmra.mrb[108].mxu1 %v2532_v18 }
 0x666   : > { %v3204_v21 = vpop.f32.mrb[96].mxu1 }
 0x667   : > { %v2647_v24 = vadd.f32 %v3204_v21, %v2984_v20  ;;  %v2638_v27 = vpop.f32.mrb[97].mxu1 }
 0x668   : > { %v2639_v29 = vadd.f32 %v2984_v20, %v2638_v27  ;;  %v3205_v30 = vpop.f32.mrb[98].mxu1 }
 0x669   : > { %2704 = vst.msk [vmem:[%s4288_s30 + $0x10] sm:$0xff] %vm2701_vm3, %v2647_v24  ;;  %v2650_v32 = vadd.f32 %v3205_v30, %v2984_v20  ;;  %v2641_v7 = vpop.f32.mrb[99].mxu1 }
 0x66a   : > { %2702 = vst.msk [vmem:[%s4288_s30] sm:$0xff] %vm2701_vm3, %v2639_v29  ;;  %v2642_v25 = vadd.f32 %v2984_v20, %v2641_v7 }
 0x66b   : > { %2705 = vst.msk [vmem:[%s4288_s30 + $0x18] sm:$0xff] %vm2701_vm3, %v2650_v32 }
 0x66c   : > { %2703 = vst.msk [vmem:[%s4288_s30 + $0x8] sm:$0xff] %vm2701_vm3, %v2642_v25 }
 0x676   : > { %v3208_v33 = vpop.f32.mrb[100].mxu1 }
 0x677   : > { %v2663_v34 = vadd.f32 %v3208_v33, %v2984_v20  ;;  %v2654_v35 = vpop.f32.mrb[101].mxu1 }
 0x678   : > { %v2655_v36 = vadd.f32 %v2984_v20, %v2654_v35  ;;  %v3209_v37 = vpop.f32.mrb[102].mxu1 }
 0x679   : > { %2708 = vst.msk [vmem:[%s4288_s30 + $0x30] sm:$0xff] %vm2701_vm3, %v2663_v34  ;;  %v2666_v38 = vadd.f32 %v3209_v37, %v2984_v20  ;;  %v2657_v39 = vpop.f32.mrb[103].mxu1 }
 0x67a   : > { %2706 = vst.msk [vmem:[%s4288_s30 + $0x20] sm:$0xff] %vm2701_vm3, %v2655_v36  ;;  %v2658_v41 = vadd.f32 %v2984_v20, %v2657_v39 }
 0x67b   : > { %2709 = vst.msk [vmem:[%s4288_s30 + $0x38] sm:$0xff] %vm2701_vm3, %v2666_v38 }
 0x67c   : > { %2707 = vst.msk [vmem:[%s4288_s30 + $0x28] sm:$0xff] %vm2701_vm3, %v2658_v41 }
 0x686   : > { %v3212_v43 = vpop.f32.mrb[104].mxu1 }
 0x687   : > { %v2679_v45 = vadd.f32 %v3212_v43, %v2984_v20  ;;  %v2670_v46 = vpop.f32.mrb[105].mxu1 }
 0x688   : > { %v2671_v47 = vadd.f32 %v2984_v20, %v2670_v46  ;;  %v3213_v48 = vpop.f32.mrb[106].mxu1 }
 0x689   : > { %2712 = vst.msk [vmem:[%s4288_s30 + $0x50] sm:$0xff] %vm2701_vm3, %v2679_v45  ;;  %v2682_v49 = vadd.f32 %v3213_v48, %v2984_v20  ;;  %v2673_v50 = vpop.f32.mrb[107].mxu1 }
 0x68a   : > { %2710 = vst.msk [vmem:[%s4288_s30 + $0x40] sm:$0xff] %vm2701_vm3, %v2671_v47  ;;  %v2674_v53 = vadd.f32 %v2984_v20, %v2673_v50 }
 0x68b   : > { %2713 = vst.msk [vmem:[%s4288_s30 + $0x58] sm:$0xff] %vm2701_vm3, %v2682_v49 }
 0x68c   : > { %2711 = vst.msk [vmem:[%s4288_s30 + $0x48] sm:$0xff] %vm2701_vm3, %v2674_v53 }
 0x696   : > { %v3216_v54 = vpop.f32.mrb[108].mxu1 }
 0x697   : > { %v2695_v56 = vadd.f32 %v3216_v54, %v2984_v20  ;;  %v2686_v57 = vpop.f32.mrb[109].mxu1 }
 0x698   : > { %v2687_v58 = vadd.f32 %v2984_v20, %v2686_v57  ;;  %v3217_v61 = vpop.f32.mrb[110].mxu1 }
 0x699   : > { %2716 = vst.msk [vmem:[%s4288_s30 + $0x70] sm:$0xff] %vm2701_vm3, %v2695_v56  ;;  %v2698_v62 = vadd.f32 %v3217_v61, %v2984_v20  ;;  %v2689_v59 = vpop.f32.mrb[111].mxu1 }
 0x69a   : > { %2714 = vst.msk [vmem:[%s4288_s30 + $0x60] sm:$0xff] %vm2701_vm3, %v2687_v58  ;;  %v2690_v63 = vadd.f32 %v2984_v20, %v2689_v59 }
 0x69b   : > { %2717 = vst.msk [vmem:[%s4288_s30 + $0x78] sm:$0xff] %vm2701_vm3, %v2698_v62 }
 0x69c   : > { %2715 = vst.msk [vmem:[%s4288_s30 + $0x68] sm:$0xff] %vm2701_vm3, %v2690_v63 }
 0x69d PF: > { %s25_s22 = sadd.s32 1, %s3526_s22   ;;  %s4356_s16 = sld [smem:[#allocation2_spill]] }
 0x69e   : > { %p22_p7 = scmp.ge.s32.totalorder %s25_s22, 6   ;;  %s4357_s18 = smov %s3518_s20 }
 0x69f   : > { %s4358_s19 = smov %s3522_s21  ;;  %s4359_s20 = smov %s4362_s23 }
 0x6a0   :  { %24 = sbr.rel (!%p22_p7) target bundleno = 3 (0x3), region = 113 }
 0x6a3   : > { %s4360_s21 = smov %s4356_s16 }

// kernel: _forward.2
= control target key start
LH: loop header
LB: loop body
LE: loop exit
PB: predicated region body
PF: predicated region fallthrough
CT: control target
= control target key end

     0   :  { %s3423_s17 = smov 0   ;;  %s3425_s18 = smov 0   ;;  %s5318_s0 = inlined_call_operand.vmem [shape: bf16[2,256,4], index: 0, kind: input, shape index: {}]   ;;  %s5319_s1 = inlined_call_operand.vmem [shape: bf16[4,64], index: 1, kind: input, shape index: {}]   ;;  %s5320_s2 = inlined_call_operand.vmem [shape: f32[1,64], index: 2, kind: input, shape index: {}]   ;;  %s5321_s3 = inlined_call_operand.vmem [shape: bf16[64,64], index: 3, kind: input, shape index: {}]   ;;  %s5322_s4 = inlined_call_operand.vmem [shape: f32[1,64], index: 4, kind: input, shape index: {}]   ;;  %s5323_s5 = inlined_call_operand.vmem [shape: bf16[64,64], index: 5, kind: input, shape index: {}]   ;;  %s5324_s6 = inlined_call_operand.vmem [shape: f32[1,64], index: 6, kind: input, shape index: {}]   ;;  %s5325_s7 = inlined_call_operand.vmem [shape: bf16[64,128], index: 7, kind: input, shape index: {}]   ;;  %s5326_s8 = inlined_call_operand.vmem [shape: f32[1,128], index: 8, kind: input, shape index: {}]   ;;  %s5327_s9 = inlined_call_operand.vmem [shape: bf16[128,1024], index: 9, kind: input, shape index: {}]   ;;  %s5328_s10 = inlined_call_operand.vmem [shape: f32[1,1024], index: 10, kind: input, shape index: {}]   ;;  %s5329_s11 = inlined_call_operand.vmem [shape: f32[2,2,1,1024], index: 11, kind: output, shape index: {}]  }
   0x1   :  { %5432 = sst [smem:[#allocation103_spill]] %s5319_s1  ;;  %s3427_s19 = smov 0  }
   0x2   :  { %s3429_s20 = smov 0   ;;  %s3431_s21 = smov 0  }
   0x3 LB: > { %s36_s22 = sadd.s32 1, %s3349_s19  ;;  %s40_s23 = sadd.s32 1, %s3353_s20  ;;  %s3357_s21 = sphi %s3431_s21, %s21_s21   ;;  %s3353_s20 = sphi %s3429_s20, %s5972_s20   ;;  %s3349_s19 = sphi %s3427_s19, %s5971_s19   ;;  %s3345_s18 = sphi %s3425_s18, %s5970_s18   ;;  %s3341_s17 = sphi %s3423_s17, %s5969_s17  }
   0x4   : > { %p38_p0 = scmp.ge.s32.totalorder %s36_s22, 2  ;;  %p2988_p1 = scmp.ge.s32.totalorder %s3357_s21, 1 }
   0x5   : > { %p369_p2 = scmp.lt.s32.totalorder %s3357_s21, 5 }
   0x6   : > { %s5974_s22 = smov (%p38_p0, %s36_s22), 0  ;;  %s5976_s23 = smov (!%p38_p0, %s40_s23), %s3353_s20 }
   0x7   : > { %p370_p3 = pnand %p2988_p1, %p369_p2  ;;  %p42_p4 = scmp.ge.s32.totalorder %s5976_s23, 2 }
   0x9   : > { %s5978_s23 = smov (%p42_p4, %s5976_s23), 0  ;;  %373 = sbr.rel (%p370_p3) target bundleno = 1485 (0x5cd), region = 64 }
  0x10   : > { %s5433_s1 = sld [smem:[#allocation103_spill]]  ;;  %vm527_vm0 = vcmask 1041408   ;;  %s2989_s26 = sshll.u32 %s3341_s17, 4  ;;  %vm502_vm1 = vcmask 31744   ;;  %v3307_v2 = vld [vmem:[%s5321_s3] sm:$0xff]   ;;  %v3308_v3 = vld [vmem:[%s5321_s3 + $0x8] sm:$0xff]  }
  0x11   : > { %p419_p5 = scmp.lt.s32.totalorder %s3345_s18, 1  ;;  %p421_p6 = scmp.lt.s32.totalorder %s2989_s26, 31  ;;  %3182 = vmatprep.subr.bf16.mxu1 %v3307_v2  ;;  %v3359_v7 = vmov 0.0   ;;  %v3309_v13 = vld [vmem:[%s5321_s3 + $0x10] sm:$0xff]   ;;  %v3310_v14 = vld [vmem:[%s5321_s3 + $0x18] sm:$0xff]   ;;  %v3311_v15 = vld [vmem:[%s5323_s5] sm:$0xff]  }
  0x12   : > { %p431_p7 = scmp.lt.s32.totalorder %s3341_s17, 1  ;;  %3183 = vmatpush3.bf16.msra.mxu1 %v3307_v2  ;;  %v3312_v16 = vld [vmem:[%s5323_s5 + $0x8] sm:$0xff]   ;;  %v3313_v17 = vld [vmem:[%s5323_s5 + $0x10] sm:$0xff]   ;;  %v2994_v18 = vld [vmem:[%s5320_s2] ss:$0 sm:$0xff]  ;;  %vm691_vm2 = vcmask 523264  }
  0x13   : > { %s5980_s18 = smov (!%p419_p5, %s3345_s18), 1  ;;  %s5982_s26 = smov (!%p421_p6, %s2989_s26), 31  ;;  %3184 = vmatprep.subr.bf16.mxu1 %v3308_v3 }
  0x14   : > { %s2990_s12 = sshll.u32 %s5980_s18, 5  ;;  %s2993_s15 = sshll.u32 %s5980_s18, 4 }
  0x15   : > { %s424_s13 = sadd.s32 %s2990_s12, %s5982_s26  ;;  %s3114_s12 = sshll.u32 %s3341_s17, 7 }
  0x16   : > { %v454_v0 = vld [vmem:[%s5433_s1] sm:$0x3]  ;;  %s2991_s14 = sshll.u32 %s424_s13, 2  ;;  %3185 = vmatpush3.bf16.msra.mxu1 %v3308_v3  ;;  %s3889_s13 = sadd.s32 128, %s3114_s12 }
  0x17   : > { %3254 = vmatprep.subr.msk.bf16.mxu0 %vm527_vm0, %v454_v0  ;;  %v529_v1 = vsel %vm527_vm0, %v454_v0, 0  ;;  %s426_s25 = scalar_lea.vmem %s5318_s0, %s2991_s14  ;;  %3186 = vmatprep.subr.bf16.mxu1 %v3309_v13  ;;  %p3115_p8 = scmp.gt.s32.totalorder %s3889_s13, 200 }
  0x18   : > { %3165 = vmatpush3.bf16.msra.mxu0 %v529_v1  ;;  %s432_s1 = scalar_select %p431_p7, %s3341_s17, 1  ;;  %v3299_v4 = vld [vmem:[%s426_s25] sm:$0xff]   ;;  %v3300_v5 = vld [vmem:[%s426_s25 + $0x8] sm:$0xff]   ;;  %v3301_v6 = vld [vmem:[%s426_s25 + $0x10] sm:$0xff]  }
  0x19   : > { %3166 = vmatprep.mubr.msk.bf16.mxu0 %vm502_vm1, %v3299_v4  ;;  %v3302_v8 = vld [vmem:[%s426_s25 + $0x18] sm:$0xff]   ;;  %v3303_v9 = vld [vmem:[%s426_s25 + $0x20] sm:$0xff]   ;;  %v3304_v10 = vld [vmem:[%s426_s25 + $0x28] sm:$0xff]   ;;  %3206 = vmatprep.subr.bf16.mxu0 %v3311_v15 }
  0x1a   : > { %s2992_s27 = sshll.u32 %s432_s1, 3  ;;  %v3305_v11 = vld [vmem:[%s426_s25 + $0x30] sm:$0xff]   ;;  %v3306_v12 = vld [vmem:[%s426_s25 + $0x38] sm:$0xff]   ;;  %3187 = vmatpush3.bf16.msra.mxu1 %v3309_v13  ;;  %v3316_v13 = vld [vmem:[%s5325_s7 + $0x8] sm:$0xff]  }
  0x1b   : > { %s435_s28 = sadd.s32 %s2993_s15, %s2992_s27  ;;  %3167 = vmatmul.mubr.msk.bf16.vlgmr.msra.gmra.mrb[0].mxu0 %vm502_vm1, %v3300_v5  ;;  %3188 = vmatprep.subr.bf16.mxu1 %v3310_v14 }
  0x1c   : > { %s3475_s18 = scalar_lea.vmem %s5329_s11, %s435_s28  ;;  %3170 = vmatprep.mubr.msk.bf16.mxu0 %vm502_vm1, %v3301_v6  ;;  %3207 = vmatpush3.bf16.msra.mxu0 %v3311_v15  ;;  %v3011_v15 = vld [vmem:[%s5322_s4] ss:$0 sm:$0xff] }
  0x1d   : > { %2215 = vst [vmem:[%s3475_s18] sm:$0xff] %v3359_v7  ;;  %3208 = vmatprep.subr.bf16.mxu0 %v3312_v16 }
  0x1e   : > { %3189 = vmatpush3.bf16.msra.mxu1 %v3310_v14  ;;  %v3317_v14 = vld [vmem:[%s5325_s7 + $0x10] sm:$0xff]  }
  0x20   : > { %3209 = vmatpush3.bf16.msra.mxu0 %v3312_v16 }
  0x21   : > { %3210 = vmatprep.subr.bf16.mxu0 %v3313_v17 }
  0x23   : > { %3171 = vmatmul.mubr.msk.bf16.gmra.mrb[4].mxu0 %vm502_vm1, %v3302_v8 }
  0x24   : > { %3174 = vmatprep.mubr.msk.bf16.mxu0 %vm502_vm1, %v3303_v9  ;;  %3211 = vmatpush3.bf16.msra.mxu0 %v3313_v17 }
  0x2b   : > { %3175 = vmatmul.mubr.msk.bf16.gmra.mrb[8].mxu0 %vm502_vm1, %v3304_v10 }
  0x2c   : > { %3178 = vmatprep.mubr.msk.bf16.mxu0 %vm502_vm1, %v3305_v11  ;;  %v3314_v11 = vld [vmem:[%s5323_s5 + $0x18] sm:$0xff]  }
  0x2d   : > { %3212 = vmatprep.subr.bf16.mxu0 %v3314_v11 }
  0x2e   : > { %3213 = vmatpush3.bf16.msra.mxu0 %v3314_v11  ;;  %v3545_v11 = vld [vmem:[%s5327_s9 + $0x8] sm:$0xff] }
  0x33   : > { %3179 = vmatmul.mubr.msk.bf16.gmra.mrb[12].mxu0 %vm502_vm1, %v3306_v12  ;;  %v3315_v12 = vld [vmem:[%s5325_s7] sm:$0xff]  }
  0x34   : > { %3230 = vmatprep.subr.bf16.mxu1 %v3315_v12 }
  0xee   : > { %v3168_v19 = vpop.f32.mrb[0].mxu0 }
  0xef   : > { %v574_v20 = vadd.f32 %v3168_v19, %v2994_v18  ;;  %v565_v21 = vpop.f32.mrb[1].mxu0 }
  0xf0   : > { %v566_v22 = vadd.f32 %v2994_v18, %v565_v21  ;;  %v3169_v23 = vpop.f32.mrb[2].mxu0 }
  0xf1   : > { %v577_v24 = vadd.f32 %v3169_v23, %v2994_v18  ;;  %v568_v25 = vpop.f32.mrb[3].mxu0  ;;  %v630_v27 = vmax.f32 %v574_v20, 0.0 }
  0xf2   : > { %v569_v26 = vadd.f32 %v2994_v18, %v568_v25  ;;  %v628_v29 = vmax.f32 %v566_v22, 0.0 }
  0xf3   : > { %v631_v28 = vmax.f32 %v577_v24, 0.0 }
  0xf4   : > { %v629_v30 = vmax.f32 %v569_v26, 0.0 }
  0xf5   : > { %v645_v31 = vpack.c.bf16 %v631_v28, %v630_v27 }
  0xf6   : > { %v3172_v32 = vpop.f32.mrb[4].mxu0  ;;  %v644_v33 = vpack.c.bf16 %v629_v30, %v628_v29 }
  0xf7   : > { %v590_v34 = vadd.f32 %v3172_v32, %v2994_v18  ;;  %v581_v35 = vpop.f32.mrb[5].mxu0 }
  0xf8   : > { %v582_v36 = vadd.f32 %v2994_v18, %v581_v35  ;;  %v3173_v37 = vpop.f32.mrb[6].mxu0  ;;  %3190 = vmatprep.mubr.msk.bf16.mxu1 %vm691_vm2, %v644_v33 }
  0xf9   : > { %v634_v38 = vmax.f32 %v590_v34, 0.0  ;;  %v593_v39 = vadd.f32 %v3173_v37, %v2994_v18  ;;  %v584_v40 = vpop.f32.mrb[7].mxu0  ;;  %3191 = vmatmul.mubr.msk.bf16.vlgmr.msra.gmra.mrb[0].mxu1 %vm691_vm2, %v645_v31 }
  0xfa   : > { %v632_v41 = vmax.f32 %v582_v36, 0.0  ;;  %v585_v42 = vadd.f32 %v2994_v18, %v584_v40  ;;  %3231 = vmatpush3.bf16.msra.mxu1 %v3315_v12 }
  0xfb   : > { %v635_v43 = vmax.f32 %v593_v39, 0.0  ;;  %3232 = vmatprep.subr.bf16.mxu1 %v3316_v13 }
  0xfc   : > { %v633_v44 = vmax.f32 %v585_v42, 0.0 }
  0xfd   : > { %v647_v45 = vpack.c.bf16 %v635_v43, %v634_v38 }
  0xfe   : > { %v646_v46 = vpack.c.bf16 %v633_v44, %v632_v41  ;;  %v3176_v47 = vpop.f32.mrb[8].mxu0  ;;  %3233 = vmatpush3.bf16.msra.mxu1 %v3316_v13 }
  0xff   : > { %v606_v48 = vadd.f32 %v3176_v47, %v2994_v18  ;;  %v597_v49 = vpop.f32.mrb[9].mxu0  ;;  %3234 = vmatprep.subr.bf16.mxu1 %v3317_v14 }
 0x100   : > { %v598_v50 = vadd.f32 %v2994_v18, %v597_v49  ;;  %3194 = vmatprep.mubr.msk.bf16.mxu1 %vm691_vm2, %v646_v46  ;;  %v3177_v51 = vpop.f32.mrb[10].mxu0 }
 0x101   : > { %v638_v52 = vmax.f32 %v606_v48, 0.0  ;;  %v609_v53 = vadd.f32 %v3177_v51, %v2994_v18  ;;  %3195 = vmatmul.mubr.msk.bf16.gmra.mrb[4].mxu1 %vm691_vm2, %v647_v45  ;;  %v600_v54 = vpop.f32.mrb[11].mxu0 }
 0x102   : > { %v636_v55 = vmax.f32 %v598_v50, 0.0  ;;  %v601_v56 = vadd.f32 %v2994_v18, %v600_v54  ;;  %3235 = vmatpush3.bf16.msra.mxu1 %v3317_v14  ;;  %v3550_v14 = vld [vmem:[%s5327_s9 + $0x28] sm:$0xff] }
 0x103   : > { %v639_v57 = vmax.f32 %v609_v53, 0.0 }
 0x104   : > { %v637_v58 = vmax.f32 %v601_v56, 0.0 }
 0x105   : > { %v649_v59 = vpack.c.bf16 %v639_v57, %v638_v52 }
 0x106   : > { %v648_v60 = vpack.c.bf16 %v637_v58, %v636_v55  ;;  %v3180_v61 = vpop.f32.mrb[12].mxu0 }
 0x107   : > { %v622_v62 = vadd.f32 %v3180_v61, %v2994_v18  ;;  %v613_v63 = vpop.f32.mrb[13].mxu0 }
 0x108   : > { %3198 = vmatprep.mubr.msk.bf16.mxu1 %vm691_vm2, %v648_v60  ;;  %v614_v0 = vadd.f32 %v2994_v18, %v613_v63  ;;  %v3181_v1 = vpop.f32.mrb[14].mxu0 }
 0x109   : > { %3199 = vmatmul.mubr.msk.bf16.gmra.mrb[8].mxu1 %vm691_vm2, %v649_v59  ;;  %v642_v2 = vmax.f32 %v622_v62, 0.0  ;;  %v625_v3 = vadd.f32 %v3181_v1, %v2994_v18  ;;  %v616_v4 = vpop.f32.mrb[15].mxu0 }
 0x10a   : > { %v640_v5 = vmax.f32 %v614_v0, 0.0  ;;  %v617_v6 = vadd.f32 %v2994_v18, %v616_v4 }
 0x10b   : > { %v643_v7 = vmax.f32 %v625_v3, 0.0 }
 0x10c   : > { %v641_v8 = vmax.f32 %v617_v6, 0.0 }
 0x10d   : > { %v651_v9 = vpack.c.bf16 %v643_v7, %v642_v2 }
 0x10e   : > { %v650_v10 = vpack.c.bf16 %v641_v8, %v640_v5  ;;  %v3318_v8 = vld [vmem:[%s5325_s7 + $0x18] sm:$0xff]  }
 0x10f   : > { %3236 = vmatprep.subr.bf16.mxu1 %v3318_v8 }
 0x110   : > { %3202 = vmatprep.mubr.msk.bf16.mxu1 %vm691_vm2, %v650_v10  ;;  %3237 = vmatpush3.bf16.msra.mxu1 %v3318_v8  ;;  %v1209_v10 = vld [vmem:[%s5327_s9 + $0x20] sm:$0xff]  ;;  %v1234_v8 = vld [vmem:[%s5327_s9 + $0xe8] sm:$0xff] }
 0x111   : > { %3203 = vmatmul.mubr.msk.bf16.gmra.mrb[12].mxu1 %vm691_vm2, %v651_v9  ;;  %v1205_v9 = vld [vmem:[%s5327_s9] sm:$0xff] }
 0x112   : > { %v3050_v12 = vcombine.low %v1205_v9, %v1209_v10  ;;  %v3051_v13 = vcombine.high %v1205_v9, %v1209_v10 }
 0x114   : > { %1631 = vmatprep.subr.bf16.mxu0 %v3051_v13 }
 0x1cc   : > { %v3192_v16 = vpop.f32.mrb[0].mxu1 }
 0x1cd   : > { %v759_v17 = vadd.f32 %v3192_v16, %v3011_v15  ;;  %v750_v18 = vpop.f32.mrb[1].mxu1  ;;  %v1217_v16 = vld [vmem:[%s5327_s9 + $0x60] sm:$0xff] }
 0x1ce   : > { %v751_v19 = vadd.f32 %v3011_v15, %v750_v18  ;;  %v3193_v20 = vpop.f32.mrb[2].mxu1  ;;  %v3053_v18 = vcombine.high %v3545_v11, %v3550_v14 }
 0x1cf   : > { %v762_v21 = vadd.f32 %v3193_v20, %v3011_v15  ;;  %v753_v22 = vpop.f32.mrb[3].mxu1  ;;  %v815_v24 = vmax.f32 %v759_v17, 0.0  ;;  %v3052_v17 = vcombine.low %v3545_v11, %v3550_v14  ;;  %v1221_v20 = vld [vmem:[%s5327_s9 + $0x80] sm:$0xff] }
 0x1d0   : > { %v754_v23 = vadd.f32 %v3011_v15, %v753_v22  ;;  %v813_v26 = vmax.f32 %v751_v19, 0.0  ;;  %1744 = vmatprep.subr.bf16.mxu1 %v3053_v18  ;;  %v1238_v18 = vld [vmem:[%s5327_s9 + $0x108] sm:$0xff] }
 0x1d1   : > { %v816_v25 = vmax.f32 %v762_v21, 0.0  ;;  %v1225_v21 = vld [vmem:[%s5327_s9 + $0xa0] sm:$0xff] }
 0x1d2   : > { %v814_v27 = vmax.f32 %v754_v23, 0.0  ;;  %v3067_v23 = vcombine.high %v1221_v20, %v1225_v21 }
 0x1d3   : > { %v830_v28 = vpack.c.bf16 %v816_v25, %v815_v24  ;;  %v1229_v24 = vld [vmem:[%s5327_s9 + $0xc0] sm:$0xff] }
 0x1d4   : > { %v829_v29 = vpack.c.bf16 %v814_v27, %v813_v26  ;;  %v3196_v30 = vpop.f32.mrb[4].mxu1  ;;  %v1233_v25 = vld [vmem:[%s5327_s9 + $0xe0] sm:$0xff]  ;;  %v3066_v26 = vcombine.low %v1221_v20, %v1225_v21 }
 0x1d5   : > { %v775_v31 = vadd.f32 %v3196_v30, %v3011_v15  ;;  %v766_v32 = vpop.f32.mrb[5].mxu1  ;;  %v3075_v27 = vcombine.high %v1229_v24, %v1233_v25  ;;  %v3074_v30 = vcombine.low %v1229_v24, %v1233_v25 }
 0x1d6   : > { %v767_v33 = vadd.f32 %v3011_v15, %v766_v32  ;;  %v3197_v34 = vpop.f32.mrb[6].mxu1  ;;  %3214 = vmatprep.mubr.msk.bf16.mxu0 %vm691_vm2, %v829_v29  ;;  %v1241_v29 = vld [vmem:[%s5327_s9 + $0x120] sm:$0xff] }
 0x1d7   : > { %v819_v35 = vmax.f32 %v775_v31, 0.0  ;;  %v778_v36 = vadd.f32 %v3197_v34, %v3011_v15  ;;  %v769_v37 = vpop.f32.mrb[7].mxu1  ;;  %3215 = vmatmul.mubr.msk.bf16.vlgmr.msra.gmra.mrb[16].mxu0 %vm691_vm2, %v830_v28  ;;  %v1237_v28 = vld [vmem:[%s5327_s9 + $0x100] sm:$0xff] }
 0x1d8   : > { %v817_v38 = vmax.f32 %v767_v33, 0.0  ;;  %v770_v39 = vadd.f32 %v3011_v15, %v769_v37  ;;  %1632 = vmatpush1.bf16.msra.mxu0 %v3050_v12  ;;  %v3083_v31 = vcombine.high %v1237_v28, %v1241_v29  ;;  %v1245_v32 = vld [vmem:[%s5327_s9 + $0x140] sm:$0xff]  ;;  %v3082_v34 = vcombine.low %v1237_v28, %v1241_v29  ;;  %v1246_v29 = vld [vmem:[%s5327_s9 + $0x148] sm:$0xff] }
 0x1d9   : > { %v820_v40 = vmax.f32 %v778_v36, 0.0  ;;  %v1249_v33 = vld [vmem:[%s5327_s9 + $0x160] sm:$0xff] }
 0x1da   : > { %v818_v41 = vmax.f32 %v770_v39, 0.0  ;;  %v3090_v36 = vcombine.low %v1245_v32, %v1249_v33  ;;  %v3589_v37 = vld [vmem:[%s5324_s6] ss:$0 sm:$0xff] }
 0x1db   : > { %v832_v42 = vpack.c.bf16 %v820_v40, %v819_v35  ;;  %v3091_v35 = vcombine.high %v1245_v32, %v1249_v33 }
 0x1dc   : > { %v831_v43 = vpack.c.bf16 %v818_v41, %v817_v38  ;;  %v3200_v44 = vpop.f32.mrb[8].mxu1 }
 0x1dd   : > { %v791_v45 = vadd.f32 %v3200_v44, %v3011_v15  ;;  %v782_v46 = vpop.f32.mrb[9].mxu1 }
 0x1de   : > { %v783_v47 = vadd.f32 %v3011_v15, %v782_v46  ;;  %3218 = vmatprep.mubr.msk.bf16.mxu0 %vm691_vm2, %v831_v43  ;;  %v3201_v48 = vpop.f32.mrb[10].mxu1 }
 0x1df   : > { %v823_v49 = vmax.f32 %v791_v45, 0.0  ;;  %v794_v50 = vadd.f32 %v3201_v48, %v3011_v15  ;;  %3219 = vmatmul.mubr.msk.bf16.gmra.mrb[20].mxu0 %vm691_vm2, %v832_v42  ;;  %v785_v51 = vpop.f32.mrb[11].mxu1 }
 0x1e0   : > { %v821_v52 = vmax.f32 %v783_v47, 0.0  ;;  %v786_v53 = vadd.f32 %v3011_v15, %v785_v51  ;;  %v1218_v51 = vld [vmem:[%s5327_s9 + $0x68] sm:$0xff] }
 0x1e1   : > { %v824_v54 = vmax.f32 %v794_v50, 0.0  ;;  %v1214_v50 = vld [vmem:[%s5327_s9 + $0x48] sm:$0xff] }
 0x1e2   : > { %v822_v55 = vmax.f32 %v786_v53, 0.0 }
 0x1e3   : > { %v834_v56 = vpack.c.bf16 %v824_v54, %v823_v49 }
 0x1e4   : > { %v833_v57 = vpack.c.bf16 %v822_v55, %v821_v52  ;;  %v3204_v58 = vpop.f32.mrb[12].mxu1 }
 0x1e5   : > { %v807_v59 = vadd.f32 %v3204_v58, %v3011_v15  ;;  %v798_v60 = vpop.f32.mrb[13].mxu1 }
 0x1e6   : > { %3222 = vmatprep.mubr.msk.bf16.mxu0 %vm691_vm2, %v833_v57  ;;  %v799_v61 = vadd.f32 %v3011_v15, %v798_v60  ;;  %v3205_v62 = vpop.f32.mrb[14].mxu1  ;;  %v3061_v57 = vcombine.high %v1214_v50, %v1218_v51  ;;  %v1222_v60 = vld [vmem:[%s5327_s9 + $0x88] sm:$0xff] }
 0x1e7   : > { %3223 = vmatmul.mubr.msk.bf16.gmra.mrb[24].mxu0 %vm691_vm2, %v834_v56  ;;  %v827_v63 = vmax.f32 %v807_v59, 0.0  ;;  %v810_v0 = vadd.f32 %v3205_v62, %v3011_v15  ;;  %v801_v1 = vpop.f32.mrb[15].mxu1 }
 0x1e8   : > { %v825_v2 = vmax.f32 %v799_v61, 0.0  ;;  %v802_v3 = vadd.f32 %v3011_v15, %v801_v1  ;;  %v1213_v15 = vld [vmem:[%s5327_s9 + $0x40] sm:$0xff]  ;;  %v1226_v61 = vld [vmem:[%s5327_s9 + $0xa8] sm:$0xff]  ;;  %v3060_v1 = vcombine.low %v1214_v50, %v1218_v51 }
 0x1e9   : > { %v828_v4 = vmax.f32 %v810_v0, 0.0  ;;  %v3059_v19 = vcombine.high %v1213_v15, %v1217_v16  ;;  %v3058_v22 = vcombine.low %v1213_v15, %v1217_v16  ;;  %v3068_v11 = vcombine.low %v1222_v60, %v1226_v61  ;;  %v1253_v51 = vld [vmem:[%s5327_s9 + $0x180] sm:$0xff] }
 0x1ea   : > { %v826_v5 = vmax.f32 %v802_v3, 0.0 }
 0x1eb   : > { %v836_v6 = vpack.c.bf16 %v828_v4, %v827_v63  ;;  %1633 = vmatprep.subr.bf16.mxu0 %v3059_v19  ;;  %v3069_v4 = vcombine.high %v1222_v60, %v1226_v61  ;;  %v1242_v19 = vld [vmem:[%s5327_s9 + $0x128] sm:$0xff] }
 0x1ec   : > { %v835_v7 = vpack.c.bf16 %v826_v5, %v825_v2  ;;  %1634 = vmatpush1.bf16.msra.mxu0 %v3058_v22  ;;  %v1262_v60 = vld [vmem:[%s5327_s9 + $0x1c8] sm:$0xff] }
 0x1ed   : > { %1635 = vmatprep.subr.bf16.mxu0 %v3067_v23 }
 0x1ee   : > { %3226 = vmatprep.mubr.msk.bf16.mxu0 %vm691_vm2, %v835_v7  ;;  %v1230_v7 = vld [vmem:[%s5327_s9 + $0xc8] sm:$0xff] }
 0x1ef   : > { %3227 = vmatmul.mubr.msk.bf16.gmra.mrb[28].mxu0 %vm691_vm2, %v836_v6  ;;  %v3077_v15 = vcombine.high %v1230_v7, %v1234_v8  ;;  %v3076_v25 = vcombine.low %v1230_v7, %v1234_v8  ;;  %v1212_v8 = vld [vmem:[%s5327_s9 + $0x38] sm:$0xff] }
 0x1f0   : > { %1636 = vmatpush1.bf16.msra.mxu0 %v3066_v26 }
 0x1f1   : > { %1637 = vmatprep.subr.bf16.mxu0 %v3075_v27  ;;  %v3085_v27 = vcombine.high %v1238_v18, %v1242_v19 }
 0x1f4   : > { %1638 = vmatpush1.bf16.msra.mxu0 %v3074_v30  ;;  %v1250_v30 = vld [vmem:[%s5327_s9 + $0x168] sm:$0xff] }
 0x1f5   : > { %1639 = vmatprep.subr.bf16.mxu0 %v3083_v31 }
 0x1f8   : > { %1640 = vmatpush1.bf16.msra.mxu0 %v3082_v34  ;;  %v3084_v34 = vcombine.low %v1238_v18, %v1242_v19 }
 0x1f9   : > { %1641 = vmatprep.subr.bf16.mxu0 %v3091_v35 }
 0x1fc   : > { %1642 = vmatpush1.bf16.msra.mxu0 %v3090_v36 }
 0x2aa   : > { %v3216_v38 = vpop.f32.mrb[16].mxu0 }
 0x2ab   : > { %v943_v39 = vadd.f32 %v3216_v38, %v3589_v37  ;;  %v934_v40 = vpop.f32.mrb[17].mxu0  ;;  %v3093_v38 = vcombine.high %v1246_v29, %v1250_v30 }
 0x2ac   : > { %v935_v41 = vadd.f32 %v3589_v37, %v934_v40  ;;  %v3217_v42 = vpop.f32.mrb[18].mxu0 }
 0x2ad   : > { %v946_v43 = vadd.f32 %v3217_v42, %v3589_v37  ;;  %v937_v44 = vpop.f32.mrb[19].mxu0  ;;  %v999_v46 = vmax.f32 %v943_v39, 0.0 }
 0x2ae   : > { %v938_v45 = vadd.f32 %v3589_v37, %v937_v44  ;;  %v997_v48 = vmax.f32 %v935_v41, 0.0 }
 0x2af   : > { %v1000_v47 = vmax.f32 %v946_v43, 0.0 }
 0x2b0   : > { %v998_v49 = vmax.f32 %v938_v45, 0.0 }
 0x2b1   : > { %v1014_v52 = vpack.c.bf16 %v1000_v47, %v999_v46  ;;  %v3092_v46 = vcombine.low %v1246_v29, %v1250_v30 }
 0x2b2   : > { %v1013_v53 = vpack.c.bf16 %v998_v49, %v997_v48  ;;  %v3220_v54 = vpop.f32.mrb[20].mxu0 }
 0x2b3   : > { %v959_v55 = vadd.f32 %v3220_v54, %v3589_v37  ;;  %v950_v56 = vpop.f32.mrb[21].mxu0  ;;  %v1258_v54 = vld [vmem:[%s5327_s9 + $0x1a8] sm:$0xff] }
 0x2b4   : > { %v951_v58 = vadd.f32 %v3589_v37, %v950_v56  ;;  %v3221_v59 = vpop.f32.mrb[22].mxu0  ;;  %3238 = vmatprep.mubr.msk.bf16.mxu1 %vm691_vm2, %v1013_v53 }
 0x2b5   : > { %v962_v62 = vadd.f32 %v3221_v59, %v3589_v37  ;;  %v953_v63 = vpop.f32.mrb[23].mxu0  ;;  %3239 = vmatmul.mubr.msk.bf16.vlgmr.msra.gmra.mrb[16].mxu1 %vm691_vm2, %v1014_v52  ;;  %v1003_v2 = vmax.f32 %v959_v55, 0.0  ;;  %v1254_v52 = vld [vmem:[%s5327_s9 + $0x188] sm:$0xff]  ;;  %v1265_v59 = vld [vmem:[%s5327_s9 + $0x1e0] sm:$0xff] }
 0x2b6   : > { %v954_v0 = vadd.f32 %v3589_v37, %v953_v63  ;;  %1745 = vmatpush1.bf16.msra.mxu1 %v3052_v17  ;;  %v1001_v5 = vmax.f32 %v951_v58, 0.0  ;;  %v3100_v56 = vcombine.low %v1254_v52, %v1258_v54  ;;  %v1261_v58 = vld [vmem:[%s5327_s9 + $0x1c0] sm:$0xff] }
 0x2b7   : > { %v1004_v3 = vmax.f32 %v962_v62, 0.0  ;;  %1746 = vmatprep.subr.bf16.mxu1 %v3061_v57  ;;  %v3101_v57 = vcombine.high %v1254_v52, %v1258_v54  ;;  %v3107_v61 = vcombine.high %v1261_v58, %v1265_v59  ;;  %v1266_v62 = vld [vmem:[%s5327_s9 + $0x1e8] sm:$0xff]  ;;  %v3106_v63 = vcombine.low %v1261_v58, %v1265_v59  ;;  %v1232_v54 = vld [vmem:[%s5327_s9 + $0xd8] sm:$0xff] }
 0x2b8   : > { %v1002_v6 = vmax.f32 %v954_v0, 0.0  ;;  %v3108_v0 = vcombine.low %v1262_v60, %v1266_v62 }
 0x2b9   : > { %v1016_v9 = vpack.c.bf16 %v1004_v3, %v1003_v2  ;;  %v3360_v2 = vmov 0   ;;  %v1207_v3 = vld [vmem:[%s5327_s9 + $0x10] sm:$0xff] }
 0x2ba   : > { %v1015_v10 = vpack.c.bf16 %v1002_v6, %v1001_v5  ;;  %v3224_v12 = vpop.f32.mrb[24].mxu0  ;;  %1747 = vmatpush1.bf16.msra.mxu1 %v3060_v1  ;;  %v3109_v1 = vcombine.high %v1262_v60, %v1266_v62  ;;  %1663 = vmatprep.mubr.bf16.mxu0 %v3360_v2  ;;  %v1208_v5 = vld [vmem:[%s5327_s9 + $0x18] sm:$0xff] }
 0x2bb   : > { %v975_v13 = vadd.f32 %v3224_v12, %v3589_v37  ;;  %v966_v14 = vpop.f32.mrb[25].mxu0  ;;  %1748 = vmatprep.subr.bf16.mxu1 %v3069_v4  ;;  %v1211_v4 = vld [vmem:[%s5327_s9 + $0x30] sm:$0xff]  ;;  %v3689_v12 = vld [vmem:[%s5326_s8] ss:$0 sm:$0xff] }
 0x2bc   : > { %v967_v16 = vadd.f32 %v3589_v37, %v966_v14  ;;  %3242 = vmatprep.mubr.msk.bf16.mxu1 %vm691_vm2, %v1015_v10  ;;  %v3225_v17 = vpop.f32.mrb[26].mxu0  ;;  %v3054_v6 = vcombine.low %v1207_v3, %v1211_v4  ;;  %v3055_v7 = vcombine.high %v1207_v3, %v1211_v4  ;;  %v3057_v10 = vcombine.high %v1208_v5, %v1212_v8 }
 0x2bd   : > { %v1007_v20 = vmax.f32 %v975_v13, 0.0  ;;  %v978_v21 = vadd.f32 %v3225_v17, %v3589_v37  ;;  %3243 = vmatmul.mubr.msk.bf16.gmra.mrb[20].mxu1 %vm691_vm2, %v1016_v9  ;;  %v969_v22 = vpop.f32.mrb[27].mxu0  ;;  %v3056_v9 = vcombine.low %v1208_v5, %v1212_v8  ;;  %v1243_v5 = vld [vmem:[%s5327_s9 + $0x130] sm:$0xff] }
 0x2be   : > { %v1005_v23 = vmax.f32 %v967_v16, 0.0  ;;  %v970_v24 = vadd.f32 %v3589_v37, %v969_v22  ;;  %1749 = vmatpush1.bf16.msra.mxu1 %v3068_v11  ;;  %v1215_v22 = vld [vmem:[%s5327_s9 + $0x50] sm:$0xff] }
 0x2bf   : > { %v1008_v26 = vmax.f32 %v978_v21, 0.0  ;;  %1750 = vmatprep.subr.bf16.mxu1 %v3077_v15 }
 0x2c0   : > { %v1006_v28 = vmax.f32 %v970_v24, 0.0 }
 0x2c1   : > { %v1018_v31 = vpack.c.bf16 %v1008_v26, %v1007_v20  ;;  %v1216_v26 = vld [vmem:[%s5327_s9 + $0x58] sm:$0xff] }
 0x2c2   : > { %v1017_v32 = vpack.c.bf16 %v1006_v28, %v1005_v23  ;;  %v3228_v33 = vpop.f32.mrb[28].mxu0  ;;  %1751 = vmatpush1.bf16.msra.mxu1 %v3076_v25  ;;  %v1219_v25 = vld [vmem:[%s5327_s9 + $0x70] sm:$0xff] }
 0x2c3   : > { %v991_v35 = vadd.f32 %v3228_v33, %v3589_v37  ;;  %v982_v36 = vpop.f32.mrb[29].mxu0  ;;  %1752 = vmatprep.subr.bf16.mxu1 %v3085_v27  ;;  %v1220_v27 = vld [vmem:[%s5327_s9 + $0x78] sm:$0xff] }
 0x2c4   : > { %3246 = vmatprep.mubr.msk.bf16.mxu1 %vm691_vm2, %v1017_v32  ;;  %v983_v39 = vadd.f32 %v3589_v37, %v982_v36  ;;  %v3229_v40 = vpop.f32.mrb[30].mxu0  ;;  %v1227_v36 = vld [vmem:[%s5327_s9 + $0xb0] sm:$0xff] }
 0x2c5   : > { %3247 = vmatmul.mubr.msk.bf16.gmra.mrb[24].mxu1 %vm691_vm2, %v1018_v31  ;;  %v1011_v41 = vmax.f32 %v991_v35, 0.0  ;;  %v994_v42 = vadd.f32 %v3229_v40, %v3589_v37  ;;  %v985_v43 = vpop.f32.mrb[31].mxu0  ;;  %v1223_v31 = vld [vmem:[%s5327_s9 + $0x90] sm:$0xff]  ;;  %v3065_v35 = vcombine.high %v1216_v26, %v1220_v27 }
 0x2c6   : > { %v1009_v44 = vmax.f32 %v983_v39, 0.0  ;;  %v986_v45 = vadd.f32 %v3589_v37, %v985_v43  ;;  %1753 = vmatpush1.bf16.msra.mxu1 %v3084_v34  ;;  %v1257_v37 = vld [vmem:[%s5327_s9 + $0x1a0] sm:$0xff]  ;;  %v3063_v34 = vcombine.high %v1215_v22, %v1219_v25  ;;  %v1228_v39 = vld [vmem:[%s5327_s9 + $0xb8] sm:$0xff]  ;;  %v3070_v59 = vcombine.low %v1223_v31, %v1227_v36 }
 0x2c7   : > { %v1012_v47 = vmax.f32 %v994_v42, 0.0  ;;  %1754 = vmatprep.subr.bf16.mxu1 %v3093_v38  ;;  %v3099_v53 = vcombine.high %v1253_v51, %v1257_v37  ;;  %v3098_v55 = vcombine.low %v1253_v51, %v1257_v37  ;;  %v1224_v38 = vld [vmem:[%s5327_s9 + $0x98] sm:$0xff]  ;;  %v1231_v51 = vld [vmem:[%s5327_s9 + $0xd0] sm:$0xff] }
 0x2c8   : > { %v1010_v48 = vmax.f32 %v986_v45, 0.0  ;;  %v3064_v45 = vcombine.low %v1216_v26, %v1220_v27  ;;  %v3072_v60 = vcombine.low %v1224_v38, %v1228_v39 }
 0x2c9   : > { %v1020_v49 = vpack.c.bf16 %v1012_v47, %v1011_v41  ;;  %1643 = vmatprep.subr.bf16.mxu0 %v3099_v53  ;;  %v3071_v47 = vcombine.high %v1223_v31, %v1227_v36  ;;  %v1235_v53 = vld [vmem:[%s5327_s9 + $0xf0] sm:$0xff] }
 0x2ca   : > { %v1019_v50 = vpack.c.bf16 %v1010_v48, %v1009_v44  ;;  %1755 = vmatpush1.bf16.msra.mxu1 %v3092_v46  ;;  %1644 = vmatpush1.bf16.msra.mxu0 %v3098_v55  ;;  %v3062_v44 = vcombine.low %v1215_v22, %v1219_v25  ;;  %v3073_v48 = vcombine.high %v1224_v38, %v1228_v39  ;;  %v1236_v55 = vld [vmem:[%s5327_s9 + $0xf8] sm:$0xff]  ;;  %v1259_v39 = vld [vmem:[%s5327_s9 + $0x1b0] sm:$0xff] }
 0x2cb   : > { %1756 = vmatprep.subr.bf16.mxu1 %v3101_v57  ;;  %1645 = vmatprep.subr.bf16.mxu0 %v3107_v61  ;;  %v1248_v22 = vld [vmem:[%s5327_s9 + $0x158] sm:$0xff] }
 0x2cc   : > { %3250 = vmatprep.mubr.msk.bf16.mxu1 %vm691_vm2, %v1019_v50 }
 0x2cd   : > { %3251 = vmatmul.mubr.msk.bf16.gmra.mrb[28].mxu1 %vm691_vm2, %v1020_v49 }
 0x2ce   : > { %1757 = vmatpush1.bf16.msra.mxu1 %v3100_v56  ;;  %1646 = vmatpush1.bf16.msra.mxu0 %v3106_v63  ;;  %v3079_v63 = vcombine.high %v1231_v51, %v1235_v53 }
 0x2cf   : > { %1758 = vmatprep.subr.bf16.mxu1 %v3109_v1  ;;  %1776 = vmatprep.mubr.bf16.mxu1 %v3360_v2  ;;  %v1239_v1 = vld [vmem:[%s5327_s9 + $0x110] sm:$0xff] }
 0x2d0   : > { %1857 = vmatprep.subr.bf16.mxu0 %v3055_v7  ;;  %v1244_v7 = vld [vmem:[%s5327_s9 + $0x138] sm:$0xff]  ;;  %v3086_v27 = vcombine.low %v1239_v1, %v1243_v5 }
 0x2d2   : > { %1759 = vmatpush1.bf16.msra.mxu1 %v3108_v0  ;;  %v3081_v0 = vcombine.high %v1232_v54, %v1236_v55 }
 0x2d3   : > { %1970 = vmatprep.subr.bf16.mxu1 %v3057_v10 }
 0x388   : > { %v3240_v11 = vpop.f32.mrb[16].mxu1 }
 0x389   : > { %v1127_v13 = vadd.f32 %v3240_v11, %v3689_v12  ;;  %v1118_v14 = vpop.f32.mrb[17].mxu1 }
 0x38a   : > { %v1119_v15 = vadd.f32 %v3689_v12, %v1118_v14  ;;  %v3241_v16 = vpop.f32.mrb[18].mxu1  ;;  %v3078_v14 = vcombine.low %v1231_v51, %v1235_v53  ;;  %v1267_v53 = vld [vmem:[%s5327_s9 + $0x1f0] sm:$0xff] }
 0x38b   : > { %v1130_v17 = vadd.f32 %v3241_v16, %v3689_v12  ;;  %v1121_v18 = vpop.f32.mrb[19].mxu1  ;;  %v1183_v20 = vmax.f32 %v1127_v13, 0.0 }
 0x38c   : > { %v1122_v19 = vadd.f32 %v3689_v12, %v1121_v18  ;;  %v1181_v23 = vmax.f32 %v1119_v15, 0.0  ;;  %v3080_v15 = vcombine.low %v1232_v54, %v1236_v55  ;;  %v1268_v54 = vld [vmem:[%s5327_s9 + $0x1f8] sm:$0xff] }
 0x38d   : > { %v1184_v21 = vmax.f32 %v1130_v17, 0.0  ;;  %v3087_v17 = vcombine.high %v1239_v1, %v1243_v5  ;;  %v3870_v1 = vld [vmem:[%s5328_s10] sm:$0xff] }
 0x38e   : > { %v1182_v24 = vmax.f32 %v1122_v19, 0.0  ;;  %v1247_v19 = vld [vmem:[%s5327_s9 + $0x150] sm:$0xff] }
 0x38f   : > { %v3707_v28 = vpack.c.bf16 %v1184_v21, %v1183_v20  ;;  %v1251_v21 = vld [vmem:[%s5327_s9 + $0x170] sm:$0xff] }
 0x390   : > { %v3709_v29 = vpack.c.bf16 %v1182_v24, %v1181_v23  ;;  %v3244_v30 = vpop.f32.mrb[20].mxu1  ;;  %v1252_v23 = vld [vmem:[%s5327_s9 + $0x178] sm:$0xff] }
 0x391   : > { %v1143_v32 = vadd.f32 %v3244_v30, %v3689_v12  ;;  %v1134_v33 = vpop.f32.mrb[21].mxu1 }
 0x392   : > { %v1135_v40 = vadd.f32 %v3689_v12, %v1134_v33  ;;  %v3245_v41 = vpop.f32.mrb[22].mxu1  ;;  %1664 = vmatmul.mubr.bf16.vlgmr.msra.gmra.mrb[32].mxu0 %v3709_v29  ;;  %1777 = vmatmul.mubr.bf16.vlgmr.msra.gmra.mrb[32].mxu1 %v3709_v29  ;;  %v3095_v33 = vcombine.high %v1247_v19, %v1251_v21 }
 0x393   : > { %v1146_v42 = vadd.f32 %v3245_v41, %v3689_v12  ;;  %1858 = vmatpush1.bf16.msra.mxu0 %v3054_v6  ;;  %1971 = vmatpush1.bf16.msra.mxu1 %v3056_v9  ;;  %v1137_v43 = vpop.f32.mrb[23].mxu1  ;;  %v1187_v49 = vmax.f32 %v1143_v32, 0.0  ;;  %v1240_v6 = vld [vmem:[%s5327_s9 + $0x118] sm:$0xff] }
 0x394   : > { %v1138_v46 = vadd.f32 %v3689_v12, %v1137_v43  ;;  %1673 = vmatprep.mubr.bf16.mxu0 %v3360_v2  ;;  %1786 = vmatprep.mubr.bf16.mxu1 %v3360_v2  ;;  %v1185_v37 = vmax.f32 %v1135_v40, 0.0  ;;  %v3089_v18 = vcombine.high %v1240_v6, %v1244_v7  ;;  %v3088_v30 = vcombine.low %v1240_v6, %v1244_v7  ;;  %v1256_v40 = vld [vmem:[%s5327_s9 + $0x198] sm:$0xff] }
 0x395   : > { %v1188_v50 = vmax.f32 %v1146_v42, 0.0  ;;  %1859 = vmatprep.subr.bf16.mxu0 %v3063_v34  ;;  %1972 = vmatprep.subr.bf16.mxu1 %v3065_v35  ;;  %v3097_v34 = vcombine.high %v1248_v22, %v1252_v23  ;;  %v1255_v35 = vld [vmem:[%s5327_s9 + $0x190] sm:$0xff]  ;;  %v1260_v41 = vld [vmem:[%s5327_s9 + $0x1b8] sm:$0xff] }
 0x396   : > { %v1186_v52 = vmax.f32 %v1138_v46, 0.0  ;;  %v3105_v51 = vcombine.high %v1256_v40, %v1260_v41 }
 0x397   : > { %v3743_v56 = vpack.c.bf16 %v1188_v50, %v1187_v49  ;;  %1860 = vmatpush1.bf16.msra.mxu0 %v3062_v44  ;;  %1973 = vmatpush1.bf16.msra.mxu1 %v3064_v45  ;;  %v3103_v50 = vcombine.high %v1255_v35, %v1259_v39 }
 0x398   : > { %v3745_v57 = vpack.c.bf16 %v1186_v52, %v1185_v37  ;;  %v3248_v58 = vpop.f32.mrb[24].mxu1  ;;  %1861 = vmatprep.subr.bf16.mxu0 %v3071_v47  ;;  %1974 = vmatprep.subr.bf16.mxu1 %v3073_v48  ;;  %v3094_v47 = vcombine.low %v1247_v19, %v1251_v21  ;;  %v3096_v48 = vcombine.low %v1248_v22, %v1252_v23  ;;  %v1263_v37 = vld [vmem:[%s5327_s9 + $0x1d0] sm:$0xff] }
 0x399   : > { %v1159_v61 = vadd.f32 %v3248_v58, %v3689_v12  ;;  %v1150_v62 = vpop.f32.mrb[25].mxu1 }
 0x39a   : > { %v1151_v3 = vadd.f32 %v3689_v12, %v1150_v62  ;;  %1674 = vmatmul.mubr.bf16.gmra.mrb[36].mxu0 %v3707_v28  ;;  %1787 = vmatmul.mubr.bf16.gmra.mrb[36].mxu1 %v3707_v28  ;;  %v3249_v4 = vpop.f32.mrb[26].mxu1 }
 0x39b   : > { %v1191_v8 = vmax.f32 %v1159_v61, 0.0  ;;  %v1162_v9 = vadd.f32 %v3249_v4, %v3689_v12  ;;  %v1153_v10 = vpop.f32.mrb[27].mxu1  ;;  %1683 = vmatprep.mubr.bf16.mxu0 %v3360_v2  ;;  %1796 = vmatprep.mubr.bf16.mxu1 %v3360_v2  ;;  %v3111_v61 = vcombine.high %v1263_v37, %v1267_v53 }
 0x39c   : > { %v1189_v11 = vmax.f32 %v1151_v3, 0.0  ;;  %v1154_v13 = vadd.f32 %v3689_v12, %v1153_v10  ;;  %1862 = vmatpush1.bf16.msra.mxu0 %v3070_v59  ;;  %1975 = vmatpush1.bf16.msra.mxu1 %v3072_v60  ;;  %v3102_v59 = vcombine.low %v1255_v35, %v1259_v39  ;;  %v3104_v60 = vcombine.low %v1256_v40, %v1260_v41 }
 0x39d   : > { %v1192_v16 = vmax.f32 %v1162_v9, 0.0  ;;  %1863 = vmatprep.subr.bf16.mxu0 %v3079_v63  ;;  %1976 = vmatprep.subr.bf16.mxu1 %v3081_v0  ;;  %v3110_v63 = vcombine.low %v1263_v37, %v1267_v53 }
 0x39e   : > { %v1190_v20 = vmax.f32 %v1154_v13, 0.0 }
 0x39f   : > { %v3779_v24 = vpack.c.bf16 %v1192_v16, %v1191_v8 }
 0x3a0   : > { %v3781_v25 = vpack.c.bf16 %v1190_v20, %v1189_v11  ;;  %v3252_v26 = vpop.f32.mrb[28].mxu1  ;;  %1864 = vmatpush1.bf16.msra.mxu0 %v3078_v14  ;;  %1977 = vmatpush1.bf16.msra.mxu1 %v3080_v15 }
 0x3a1   : > { %v1175_v31 = vadd.f32 %v3252_v26, %v3689_v12  ;;  %v1166_v32 = vpop.f32.mrb[29].mxu1  ;;  %1865 = vmatprep.subr.bf16.mxu0 %v3087_v17  ;;  %1978 = vmatprep.subr.bf16.mxu1 %v3089_v18 }
 0x3a2   : > { %1684 = vmatmul.mubr.bf16.gmra.mrb[40].mxu0 %v3745_v57  ;;  %1797 = vmatmul.mubr.bf16.gmra.mrb[40].mxu1 %v3745_v57  ;;  %v1167_v36 = vadd.f32 %v3689_v12, %v1166_v32  ;;  %v3253_v38 = vpop.f32.mrb[30].mxu1 }
 0x3a3   : > { %v1195_v42 = vmax.f32 %v1175_v31, 0.0  ;;  %1693 = vmatprep.mubr.bf16.mxu0 %v3360_v2  ;;  %1806 = vmatprep.mubr.bf16.mxu1 %v3360_v2  ;;  %v1178_v43 = vadd.f32 %v3253_v38, %v3689_v12  ;;  %v1169_v44 = vpop.f32.mrb[31].mxu1 }
 0x3a4   : > { %v1193_v45 = vmax.f32 %v1167_v36, 0.0  ;;  %v1170_v46 = vadd.f32 %v3689_v12, %v1169_v44  ;;  %1866 = vmatpush1.bf16.msra.mxu0 %v3086_v27  ;;  %1979 = vmatpush1.bf16.msra.mxu1 %v3088_v30  ;;  %v1264_v12 = vld [vmem:[%s5327_s9 + $0x1d8] sm:$0xff] }
 0x3a5   : > { %v1196_v49 = vmax.f32 %v1178_v43, 0.0  ;;  %1867 = vmatprep.subr.bf16.mxu0 %v3095_v33  ;;  %1980 = vmatprep.subr.bf16.mxu1 %v3097_v34  ;;  %v3113_v62 = vcombine.high %v1264_v12, %v1268_v54  ;;  %v3112_v0 = vcombine.low %v1264_v12, %v1268_v54 }
 0x3a6   : > { %v1194_v52 = vmax.f32 %v1170_v46, 0.0 }
 0x3a7   : > { %v3815_v55 = vpack.c.bf16 %v1196_v49, %v1195_v42 }
 0x3a8   : > { %v1203_v58 = vpack.c.bf16 %v1194_v52, %v1193_v45  ;;  %1868 = vmatpush1.bf16.msra.mxu0 %v3094_v47  ;;  %1981 = vmatpush1.bf16.msra.mxu1 %v3096_v48 }
 0x3a9   : > { %1869 = vmatprep.subr.bf16.mxu0 %v3103_v50  ;;  %1982 = vmatprep.subr.bf16.mxu1 %v3105_v51 }
 0x3aa   : > { %1694 = vmatmul.mubr.bf16.gmra.mrb[44].mxu0 %v3743_v56  ;;  %1807 = vmatmul.mubr.bf16.gmra.mrb[44].mxu1 %v3743_v56 }
 0x3ab   : > { %1703 = vmatprep.mubr.bf16.mxu0 %v3360_v2  ;;  %1816 = vmatprep.mubr.bf16.mxu1 %v3360_v2 }
 0x3ac   : > { %1870 = vmatpush1.bf16.msra.mxu0 %v3102_v59  ;;  %1983 = vmatpush1.bf16.msra.mxu1 %v3104_v60 }
 0x3ad   : > { %1871 = vmatprep.subr.bf16.mxu0 %v3111_v61  ;;  %1984 = vmatprep.subr.bf16.mxu1 %v3113_v62 }
 0x3b0   : > { %1872 = vmatpush1.bf16.msra.mxu0 %v3110_v63  ;;  %1985 = vmatpush1.bf16.msra.mxu1 %v3112_v0 }
 0x3b2   : > { %1704 = vmatmul.mubr.bf16.gmra.mrb[48].mxu0 %v3781_v25  ;;  %1817 = vmatmul.mubr.bf16.gmra.mrb[48].mxu1 %v3781_v25 }
 0x3b3   : > { %1713 = vmatprep.mubr.bf16.mxu0 %v3360_v2  ;;  %1826 = vmatprep.mubr.bf16.mxu1 %v3360_v2 }
 0x3ba   : > { %1714 = vmatmul.mubr.bf16.gmra.mrb[52].mxu0 %v3779_v24  ;;  %1827 = vmatmul.mubr.bf16.gmra.mrb[52].mxu1 %v3779_v24 }
 0x3bb   : > { %1723 = vmatprep.mubr.bf16.mxu0 %v3360_v2  ;;  %1836 = vmatprep.mubr.bf16.mxu1 %v3360_v2 }
 0x3c2   : > { %1724 = vmatmul.mubr.bf16.gmra.mrb[56].mxu0 %v1203_v58  ;;  %1837 = vmatmul.mubr.bf16.gmra.mrb[56].mxu1 %v1203_v58 }
 0x3c3   : > { %1733 = vmatprep.mubr.bf16.mxu0 %v3360_v2  ;;  %1846 = vmatprep.mubr.bf16.mxu1 %v3360_v2 }
 0x3ca   : > { %1734 = vmatmul.mubr.bf16.gmra.mrb[60].mxu0 %v3815_v55  ;;  %1847 = vmatmul.mubr.bf16.gmra.mrb[60].mxu1 %v3815_v55 }
 0x3cb   : > { %1889 = vmatprep.mubr.bf16.mxu0 %v3360_v2  ;;  %2002 = vmatprep.mubr.bf16.mxu1 %v3360_v2 }
 0x3d2   : > { %1890 = vmatmul.mubr.bf16.vlgmr.msra.gmra.mrb[64].mxu0 %v3709_v29  ;;  %2003 = vmatmul.mubr.bf16.vlgmr.msra.gmra.mrb[64].mxu1 %v3709_v29 }
 0x3d3   : > { %1899 = vmatprep.mubr.bf16.mxu0 %v3360_v2  ;;  %2012 = vmatprep.mubr.bf16.mxu1 %v3360_v2 }
 0x3da   : > { %1900 = vmatmul.mubr.bf16.gmra.mrb[68].mxu0 %v3707_v28  ;;  %2013 = vmatmul.mubr.bf16.gmra.mrb[68].mxu1 %v3707_v28  ;;  %v1271_v28 = vlaneseq }
 0x3db   : > { %1909 = vmatprep.mubr.bf16.mxu0 %v3360_v2  ;;  %2022 = vmatprep.mubr.bf16.mxu1 %v3360_v2 }
 0x3dc   : > { %v3863_v29 = vshrl.u32 %v1271_v28, 7 }
 0x3de   : > { %5434 = vst [vmem:[#allocation2_spill] sm:$0xff] %v3863_v29  ;;  %v1277_v3 = vsub.s32 1, %v3863_v29 }
 0x3e0   : > { %v3882_v6 = vrot.slane %v3870_v1, %v1277_v3 }
 0x3e2   : > { %1910 = vmatmul.mubr.bf16.gmra.mrb[72].mxu0 %v3745_v57  ;;  %2023 = vmatmul.mubr.bf16.gmra.mrb[72].mxu1 %v3745_v57  ;;  %v1281_v57 = vsub.s32 2, %v3863_v29 }
 0x3e3   : > { %1919 = vmatprep.mubr.bf16.mxu0 %v3360_v2  ;;  %2032 = vmatprep.mubr.bf16.mxu1 %v3360_v2 }
 0x3e4   : > { %v3878_v5 = vrot.slane %v3870_v1, %v1281_v57 }
 0x3ea   : > { %1920 = vmatmul.mubr.bf16.gmra.mrb[76].mxu0 %v3743_v56  ;;  %2033 = vmatmul.mubr.bf16.gmra.mrb[76].mxu1 %v3743_v56  ;;  %v1273_v56 = vsub.s32 0, %v3863_v29 }
 0x3eb   : > { %1929 = vmatprep.mubr.bf16.mxu0 %v3360_v2  ;;  %2042 = vmatprep.mubr.bf16.mxu1 %v3360_v2 }
 0x3ec   : > { %v3875_v4 = vrot.slane %v3870_v1, %v1273_v56 }
 0x3f2   : > { %1930 = vmatmul.mubr.bf16.gmra.mrb[80].mxu0 %v3781_v25  ;;  %2043 = vmatmul.mubr.bf16.gmra.mrb[80].mxu1 %v3781_v25 }
 0x3f3   : > { %1939 = vmatprep.mubr.bf16.mxu0 %v3360_v2  ;;  %2052 = vmatprep.mubr.bf16.mxu1 %v3360_v2 }
 0x3fa   : > { %1940 = vmatmul.mubr.bf16.gmra.mrb[84].mxu0 %v3779_v24  ;;  %2053 = vmatmul.mubr.bf16.gmra.mrb[84].mxu1 %v3779_v24 }
 0x3fb   : > { %1949 = vmatprep.mubr.bf16.mxu0 %v3360_v2  ;;  %2062 = vmatprep.mubr.bf16.mxu1 %v3360_v2 }
 0x402   : > { %1950 = vmatmul.mubr.bf16.gmra.mrb[88].mxu0 %v1203_v58  ;;  %2063 = vmatmul.mubr.bf16.gmra.mrb[88].mxu1 %v1203_v58 }
 0x403   : > { %1959 = vmatprep.mubr.bf16.mxu0 %v3360_v2  ;;  %2072 = vmatprep.mubr.bf16.mxu1 %v3360_v2  ;;  %v1285_v2 = vsub.s32 3, %v3863_v29 }
 0x405   : > { %v3885_v7 = vrot.slane %v3870_v1, %v1285_v2 }
 0x40a   : > { %1960 = vmatmul.mubr.bf16.gmra.mrb[92].mxu0 %v3815_v55  ;;  %2073 = vmatmul.mubr.bf16.gmra.mrb[92].mxu1 %v3815_v55 }
 0x465   : > { %v1665_v8 = vpop.f32.mrb[32].mxu0  ;;  %v1778_v9 = vpop.f32.mrb[32].mxu1 }
 0x466   : > { %v3892_v10 = vadd.f32 %v1665_v8, %v3875_v4  ;;  %v3895_v11 = vadd.f32 %v1778_v9, %v3878_v5  ;;  %v1667_v13 = vpop.f32.mrb[33].mxu0  ;;  %v1780_v14 = vpop.f32.mrb[33].mxu1 }
 0x467   : > { %v3898_v15 = vadd.f32 %v1667_v13, %v3882_v6  ;;  %v3901_v16 = vadd.f32 %v1780_v14, %v3885_v7  ;;  %v1669_v17 = vpop.f32.mrb[34].mxu0  ;;  %v1782_v18 = vpop.f32.mrb[34].mxu1 }
 0x468   : > { %5435 = vst [vmem:[#allocation3_spill] sm:$0xff] %v3892_v10  ;;  %v3906_v21 = vadd.f32 %v1669_v17, %v3875_v4  ;;  %v3909_v22 = vadd.f32 %v1782_v18, %v3878_v5  ;;  %v1671_v23 = vpop.f32.mrb[35].mxu0  ;;  %v1784_v24 = vpop.f32.mrb[35].mxu1 }
 0x469   : > { %v3914_v27 = vadd.f32 %v1671_v23, %v3882_v6  ;;  %v3917_v30 = vadd.f32 %v1784_v24, %v3885_v7 }
 0x46a   : > { %5436 = vst [vmem:[#allocation4_spill] sm:$0xff] %v3906_v21  ;;  %5437 = vst [vmem:[#allocation5_spill] sm:$0xff] %v3909_v22 }
 0x46b   : > { %5438 = vst [vmem:[#allocation6_spill] sm:$0xff] %v3914_v27  ;;  %5439 = vst [vmem:[#allocation7_spill] sm:$0xff] %v3917_v30 }
 0x46d   : > { %v1675_v35 = vpop.f32.mrb[36].mxu0  ;;  %v1788_v36 = vpop.f32.mrb[36].mxu1 }
 0x46e   : > { %v3924_v38 = vadd.f32 %v1675_v35, %v3875_v4  ;;  %v3927_v39 = vadd.f32 %v1788_v36, %v3878_v5  ;;  %v1677_v40 = vpop.f32.mrb[37].mxu0  ;;  %v1790_v41 = vpop.f32.mrb[37].mxu1 }
 0x46f   : > { %v3930_v42 = vadd.f32 %v1677_v40, %v3882_v6  ;;  %v3933_v43 = vadd.f32 %v1790_v41, %v3885_v7  ;;  %v1679_v44 = vpop.f32.mrb[38].mxu0  ;;  %v1792_v45 = vpop.f32.mrb[38].mxu1 }
 0x470   : > { %5440 = vst [vmem:[#allocation8_spill] sm:$0xff] %v3924_v38  ;;  %v3938_v48 = vadd.f32 %v1679_v44, %v3875_v4  ;;  %v3941_v49 = vadd.f32 %v1792_v45, %v3878_v5  ;;  %v1681_v50 = vpop.f32.mrb[39].mxu0  ;;  %v1794_v51 = vpop.f32.mrb[39].mxu1 }
 0x471   : > { %v3946_v53 = vadd.f32 %v1681_v50, %v3882_v6  ;;  %v3949_v12 = vadd.f32 %v1794_v51, %v3885_v7 }
 0x472   : > { %5441 = vst [vmem:[#allocation9_spill] sm:$0xff] %v3938_v48 }
 0x475   : > { %v1685_v60 = vpop.f32.mrb[40].mxu0  ;;  %v1798_v61 = vpop.f32.mrb[40].mxu1 }
 0x476   : > { %v3956_v62 = vadd.f32 %v1685_v60, %v3875_v4  ;;  %v3959_v63 = vadd.f32 %v1798_v61, %v3878_v5  ;;  %v1687_v0 = vpop.f32.mrb[41].mxu0  ;;  %v1800_v28 = vpop.f32.mrb[41].mxu1 }
 0x477   : > { %v3962_v56 = vadd.f32 %v1687_v0, %v3882_v6  ;;  %v3965_v57 = vadd.f32 %v1800_v28, %v3885_v7  ;;  %v1689_v3 = vpop.f32.mrb[42].mxu0  ;;  %v1802_v2 = vpop.f32.mrb[42].mxu1 }
 0x478   : > { %5442 = vst [vmem:[#allocation10_spill] sm:$0xff] %v3956_v62  ;;  %v3970_v13 = vadd.f32 %v1689_v3, %v3875_v4  ;;  %v3973_v14 = vadd.f32 %v1802_v2, %v3878_v5  ;;  %v1691_v17 = vpop.f32.mrb[43].mxu0  ;;  %v1804_v18 = vpop.f32.mrb[43].mxu1 }
 0x479   : > { %v3978_v35 = vadd.f32 %v1691_v17, %v3882_v6  ;;  %v3981_v36 = vadd.f32 %v1804_v18, %v3885_v7 }
 0x47a   : > { %5443 = vst [vmem:[#allocation11_spill] sm:$0xff] %v3970_v13 }
 0x47d   : > { %v1695_v50 = vpop.f32.mrb[44].mxu0  ;;  %v1808_v51 = vpop.f32.mrb[44].mxu1 }
 0x47e   : > { %v3988_v60 = vadd.f32 %v1695_v50, %v3875_v4  ;;  %v3991_v61 = vadd.f32 %v1808_v51, %v3878_v5  ;;  %v1697_v0 = vpop.f32.mrb[45].mxu0  ;;  %v1810_v28 = vpop.f32.mrb[45].mxu1 }
 0x47f   : > { %v3994_v3 = vadd.f32 %v1697_v0, %v3882_v6  ;;  %v3997_v2 = vadd.f32 %v1810_v28, %v3885_v7  ;;  %v1699_v17 = vpop.f32.mrb[46].mxu0  ;;  %v1812_v18 = vpop.f32.mrb[46].mxu1 }
 0x480   : > { %5444 = vst [vmem:[#allocation12_spill] sm:$0xff] %v3988_v60  ;;  %5445 = vst [vmem:[#allocation13_spill] sm:$0xff] %v3991_v61  ;;  %v4002_v50 = vadd.f32 %v1699_v17, %v3875_v4  ;;  %v4005_v51 = vadd.f32 %v1812_v18, %v3878_v5  ;;  %v1701_v44 = vpop.f32.mrb[47].mxu0  ;;  %v1814_v40 = vpop.f32.mrb[47].mxu1 }
 0x481   : > { %5446 = vst [vmem:[#allocation14_spill] sm:$0xff] %v3994_v3  ;;  %5447 = vst [vmem:[#allocation15_spill] sm:$0xff] %v3997_v2  ;;  %v4010_v28 = vadd.f32 %v1701_v44, %v3882_v6  ;;  %v4013_v9 = vadd.f32 %v1814_v40, %v3885_v7 }
 0x482   : > { %5448 = vst [vmem:[#allocation16_spill] sm:$0xff] %v4002_v50  ;;  %5449 = vst [vmem:[#allocation17_spill] sm:$0xff] %v4005_v51 }
 0x483   : > { %5450 = vst [vmem:[#allocation18_spill] sm:$0xff] %v4010_v28  ;;  %5451 = vst [vmem:[#allocation19_spill] sm:$0xff] %v4013_v9 }
 0x485   : > { %v1705_v23 = vpop.f32.mrb[48].mxu0  ;;  %v1818_v8 = vpop.f32.mrb[48].mxu1 }
 0x486   : > { %v4020_v0 = vadd.f32 %v1705_v23, %v3875_v4  ;;  %v4023_v24 = vadd.f32 %v1818_v8, %v3878_v5  ;;  %v1707_v44 = vpop.f32.mrb[49].mxu0  ;;  %v1820_v59 = vpop.f32.mrb[49].mxu1 }
 0x487   : > { %v4026_v40 = vadd.f32 %v1707_v44, %v3882_v6  ;;  %v4029_v41 = vadd.f32 %v1820_v59, %v3885_v7  ;;  %v1709_v17 = vpop.f32.mrb[50].mxu0  ;;  %v1822_v45 = vpop.f32.mrb[50].mxu1 }
 0x488   : > { %5452 = vst [vmem:[#allocation20_spill] sm:$0xff] %v4020_v0  ;;  %5453 = vst [vmem:[#allocation21_spill] sm:$0xff] %v4023_v24  ;;  %v4034_v23 = vadd.f32 %v1709_v17, %v3875_v4  ;;  %v4037_v8 = vadd.f32 %v1822_v45, %v3878_v5  ;;  %v1711_v58 = vpop.f32.mrb[51].mxu0  ;;  %v1824_v54 = vpop.f32.mrb[51].mxu1 }
 0x489   : > { %5454 = vst [vmem:[#allocation22_spill] sm:$0xff] %v4026_v40  ;;  %5455 = vst [vmem:[#allocation23_spill] sm:$0xff] %v4029_v41  ;;  %v4042_v59 = vadd.f32 %v1711_v58, %v3882_v6  ;;  %v4045_v47 = vadd.f32 %v1824_v54, %v3885_v7 }
 0x48a   : > { %5456 = vst [vmem:[#allocation24_spill] sm:$0xff] %v4034_v23  ;;  %5457 = vst [vmem:[#allocation25_spill] sm:$0xff] %v4037_v8 }
 0x48b   : > { %5458 = vst [vmem:[#allocation26_spill] sm:$0xff] %v4042_v59  ;;  %5459 = vst [vmem:[#allocation27_spill] sm:$0xff] %v4045_v47 }
 0x48d   : > { %v1715_v37 = vpop.f32.mrb[52].mxu0  ;;  %v1828_v46 = vpop.f32.mrb[52].mxu1 }
 0x48e   : > { %v4052_v44 = vadd.f32 %v1715_v37, %v3875_v4  ;;  %v4055_v52 = vadd.f32 %v1828_v46, %v3878_v5  ;;  %v1717_v58 = vpop.f32.mrb[53].mxu0  ;;  %v1830_v26 = vpop.f32.mrb[53].mxu1 }
 0x48f   : > { %v4058_v54 = vadd.f32 %v1717_v58, %v3882_v6  ;;  %v4061_v55 = vadd.f32 %v1830_v26, %v3885_v7  ;;  %v1719_v17 = vpop.f32.mrb[54].mxu0  ;;  %v1832_v18 = vpop.f32.mrb[54].mxu1 }
 0x490   : > { %5460 = vst [vmem:[#allocation28_spill] sm:$0xff] %v4052_v44  ;;  %5461 = vst [vmem:[#allocation29_spill] sm:$0xff] %v4055_v52  ;;  %v4066_v37 = vadd.f32 %v1719_v17, %v3875_v4  ;;  %v4069_v46 = vadd.f32 %v1832_v18, %v3878_v5  ;;  %v1721_v20 = vpop.f32.mrb[55].mxu0  ;;  %v1834_v32 = vpop.f32.mrb[55].mxu1 }
 0x491   : > { %5462 = vst [vmem:[#allocation30_spill] sm:$0xff] %v4058_v54  ;;  %5463 = vst [vmem:[#allocation31_spill] sm:$0xff] %v4061_v55  ;;  %v4074_v26 = vadd.f32 %v1721_v20, %v3882_v6  ;;  %v4077_v33 = vadd.f32 %v1834_v32, %v3885_v7 }
 0x492   : > { %5464 = vst [vmem:[#allocation32_spill] sm:$0xff] %v4066_v37  ;;  %5465 = vst [vmem:[#allocation33_spill] sm:$0xff] %v4069_v46 }
 0x493   : > { %5466 = vst [vmem:[#allocation34_spill] sm:$0xff] %v4074_v26  ;;  %5467 = vst [vmem:[#allocation35_spill] sm:$0xff] %v4077_v33  ;;  %v1297_v33 = vsub.s32 6, %v3863_v29 }
 0x495   : > { %v1725_v19 = vpop.f32.mrb[56].mxu0  ;;  %v1838_v31 = vpop.f32.mrb[56].mxu1 }
 0x496   : > { %v4084_v58 = vadd.f32 %v1725_v19, %v3875_v4  ;;  %v4087_v25 = vadd.f32 %v1838_v31, %v3878_v5  ;;  %v1727_v20 = vpop.f32.mrb[57].mxu0  ;;  %v1840_v55 = vpop.f32.mrb[57].mxu1 }
 0x497   : > { %v4090_v32 = vadd.f32 %v1727_v20, %v3882_v6  ;;  %v4093_v34 = vadd.f32 %v1840_v55, %v3885_v7  ;;  %v1729_v17 = vpop.f32.mrb[58].mxu0  ;;  %v1842_v45 = vpop.f32.mrb[58].mxu1 }
 0x498   : > { %5468 = vst [vmem:[#allocation36_spill] sm:$0xff] %v4084_v58  ;;  %5469 = vst [vmem:[#allocation37_spill] sm:$0xff] %v4087_v25  ;;  %v4098_v19 = vadd.f32 %v1729_v17, %v3875_v4  ;;  %v4101_v31 = vadd.f32 %v1842_v45, %v3878_v5  ;;  %v1731_v46 = vpop.f32.mrb[59].mxu0  ;;  %v1844_v26 = vpop.f32.mrb[59].mxu1 }
 0x499   : > { %5470 = vst [vmem:[#allocation38_spill] sm:$0xff] %v4090_v32  ;;  %5471 = vst [vmem:[#allocation39_spill] sm:$0xff] %v4093_v34  ;;  %v4106_v55 = vadd.f32 %v1731_v46, %v3882_v6  ;;  %v4109_v52 = vadd.f32 %v1844_v26, %v3885_v7  ;;  %v1289_v26 = vsub.s32 4, %v3863_v29 }
 0x49a   : > { %5472 = vst [vmem:[#allocation40_spill] sm:$0xff] %v4098_v19  ;;  %5473 = vst [vmem:[#allocation41_spill] sm:$0xff] %v4101_v31  ;;  %v1301_v31 = vsub.s32 7, %v3863_v29 }
 0x49b   : > { %5474 = vst [vmem:[#allocation42_spill] sm:$0xff] %v4106_v55  ;;  %5475 = vst [vmem:[#allocation43_spill] sm:$0xff] %v4109_v52 }
 0x49d   : > { %v1735_v25 = vpop.f32.mrb[60].mxu0  ;;  %v1848_v58 = vpop.f32.mrb[60].mxu1 }
 0x49e   : > { %v4116_v20 = vadd.f32 %v1735_v25, %v3875_v4  ;;  %v4119_v37 = vadd.f32 %v1848_v58, %v3878_v5  ;;  %v1737_v46 = vpop.f32.mrb[61].mxu0  ;;  %v1850_v34 = vpop.f32.mrb[61].mxu1  ;;  %v1293_v25 = vsub.s32 5, %v3863_v29 }
 0x49f   : > { %v4124_v17 = vadd.f32 %v1737_v46, %v3882_v6  ;;  %v4127_v18 = vadd.f32 %v1850_v34, %v3885_v7  ;;  %v1739_v45 = vpop.f32.mrb[62].mxu0  ;;  %v1852_v52 = vpop.f32.mrb[62].mxu1 }
 0x4a0   : > { %5476 = vst [vmem:[#allocation44_spill] sm:$0xff] %v4116_v20  ;;  %5477 = vst [vmem:[#allocation45_spill] sm:$0xff] %v4119_v37  ;;  %v4134_v19 = vadd.f32 %v1739_v45, %v3875_v4  ;;  %v4137_v32 = vadd.f32 %v1852_v52, %v3878_v5  ;;  %v1741_v46 = vpop.f32.mrb[63].mxu0  ;;  %v1854_v54 = vpop.f32.mrb[63].mxu1  ;;  %v4150_v45 = vrot.slane %v3870_v1, %v1289_v26 }
 0x4a1   : > { %5478 = vst [vmem:[#allocation46_spill] sm:$0xff] %v4124_v17  ;;  %5479 = vst [vmem:[#allocation47_spill] sm:$0xff] %v4127_v18  ;;  %v4142_v47 = vadd.f32 %v1741_v46, %v3882_v6  ;;  %v4145_v29 = vadd.f32 %v1854_v54, %v3885_v7  ;;  %v4153_v5 = vrot.slane %v3870_v1, %v1297_v33 }
 0x4a2   : > { %5480 = vst [vmem:[#allocation48_spill] sm:$0xff] %v4134_v19  ;;  %5481 = vst [vmem:[#allocation49_spill] sm:$0xff] %v4137_v32  ;;  %v4158_v6 = vrot.slane %v3870_v1, %v1293_v25  ;;  %v4161_v7 = vrot.slane %v3870_v1, %v1301_v31 }
 0x4a3   : > { %5482 = vst [vmem:[#allocation50_spill] sm:$0xff] %v4142_v47  ;;  %5483 = vst [vmem:[#allocation51_spill] sm:$0xff] %v4145_v29 }
 0x4a5   : > { %v1891_v54 = vpop.f32.mrb[64].mxu0  ;;  %v2004_v46 = vpop.f32.mrb[64].mxu1 }
 0x4a6   : > { %v4164_v4 = vadd.f32 %v1891_v54, %v4150_v45  ;;  %v4167_v26 = vadd.f32 %v2004_v46, %v4153_v5  ;;  %v1893_v33 = vpop.f32.mrb[65].mxu0  ;;  %v2006_v55 = vpop.f32.mrb[65].mxu1 }
 0x4a7   : > { %v4170_v52 = vadd.f32 %v1893_v33, %v4158_v6  ;;  %v4173_v44 = vadd.f32 %v2006_v55, %v4161_v7  ;;  %v1895_v25 = vpop.f32.mrb[66].mxu0  ;;  %v2008_v34 = vpop.f32.mrb[66].mxu1 }
 0x4a8   : > { %5484 = vst [vmem:[#allocation52_spill] sm:$0xff] %v4164_v4  ;;  %5485 = vst [vmem:[#allocation53_spill] sm:$0xff] %v4167_v26  ;;  %v4178_v54 = vadd.f32 %v1895_v25, %v4150_v45  ;;  %v4181_v46 = vadd.f32 %v2008_v34, %v4153_v5  ;;  %v1897_v58 = vpop.f32.mrb[67].mxu0  ;;  %v2010_v29 = vpop.f32.mrb[67].mxu1 }
 0x4a9   : > { %5486 = vst [vmem:[#allocation54_spill] sm:$0xff] %v4170_v52  ;;  %5487 = vst [vmem:[#allocation55_spill] sm:$0xff] %v4173_v44  ;;  %v4186_v55 = vadd.f32 %v1897_v58, %v4158_v6  ;;  %v4189_v47 = vadd.f32 %v2010_v29, %v4161_v7 }
 0x4aa   : > { %5488 = vst [vmem:[#allocation56_spill] sm:$0xff] %v4178_v54  ;;  %5489 = vst [vmem:[#allocation57_spill] sm:$0xff] %v4181_v46 }
 0x4ab   : > { %5490 = vst [vmem:[#allocation58_spill] sm:$0xff] %v4186_v55  ;;  %5491 = vst [vmem:[#allocation59_spill] sm:$0xff] %v4189_v47 }
 0x4ad   : > { %v1901_v19 = vpop.f32.mrb[68].mxu0  ;;  %v2014_v18 = vpop.f32.mrb[68].mxu1 }
 0x4ae   : > { %v4196_v33 = vadd.f32 %v1901_v19, %v4150_v45  ;;  %v4199_v32 = vadd.f32 %v2014_v18, %v4153_v5  ;;  %v1903_v58 = vpop.f32.mrb[69].mxu0  ;;  %v2016_v37 = vpop.f32.mrb[69].mxu1 }
 0x4af   : > { %v4202_v29 = vadd.f32 %v1903_v58, %v4158_v6  ;;  %v4205_v31 = vadd.f32 %v2016_v37, %v4161_v7  ;;  %v1905_v25 = vpop.f32.mrb[70].mxu0  ;;  %v2018_v1 = vpop.f32.mrb[70].mxu1 }
 0x4b0   : > { %v4210_v19 = vadd.f32 %v1905_v25, %v4150_v45  ;;  %v4213_v18 = vadd.f32 %v2018_v1, %v4153_v5  ;;  %v1907_v20 = vpop.f32.mrb[71].mxu0  ;;  %v2020_v8 = vpop.f32.mrb[71].mxu1 }
 0x4b1   : > { %v4218_v37 = vadd.f32 %v1907_v20, %v4158_v6  ;;  %v4221_v23 = vadd.f32 %v2020_v8, %v4161_v7 }
 0x4b5   : > { %v1911_v41 = vpop.f32.mrb[72].mxu0  ;;  %v2024_v24 = vpop.f32.mrb[72].mxu1 }
 0x4b6   : > { %v4228_v58 = vadd.f32 %v1911_v41, %v4150_v45  ;;  %v4231_v59 = vadd.f32 %v2024_v24, %v4153_v5  ;;  %v1913_v20 = vpop.f32.mrb[73].mxu0  ;;  %v2026_v40 = vpop.f32.mrb[73].mxu1 }
 0x4b7   : > { %v4234_v8 = vadd.f32 %v1913_v20, %v4158_v6  ;;  %v4237_v17 = vadd.f32 %v2026_v40, %v4161_v7  ;;  %v1915_v25 = vpop.f32.mrb[74].mxu0  ;;  %v2028_v34 = vpop.f32.mrb[74].mxu1 }
 0x4b8   : > { %v4242_v41 = vadd.f32 %v1915_v25, %v4150_v45  ;;  %v4245_v24 = vadd.f32 %v2028_v34, %v4153_v5  ;;  %v1917_v9 = vpop.f32.mrb[75].mxu0  ;;  %v2030_v51 = vpop.f32.mrb[75].mxu1 }
 0x4b9   : > { %v4250_v40 = vadd.f32 %v1917_v9, %v4158_v6  ;;  %v4253_v50 = vadd.f32 %v2030_v51, %v4161_v7 }
 0x4ba   : > { %5492 = vst [vmem:[#allocation60_spill] sm:$0xff] %v4242_v41  ;;  %5493 = vst [vmem:[#allocation61_spill] sm:$0xff] %v4245_v24 }
 0x4bb   : > { %5494 = vst [vmem:[#allocation62_spill] sm:$0xff] %v4250_v40  ;;  %5495 = vst [vmem:[#allocation63_spill] sm:$0xff] %v4253_v50 }
 0x4bd   : > { %v1921_v2 = vpop.f32.mrb[76].mxu0  ;;  %v2034_v61 = vpop.f32.mrb[76].mxu1 }
 0x4be   : > { %v4260_v20 = vadd.f32 %v1921_v2, %v4150_v45  ;;  %v4263_v28 = vadd.f32 %v2034_v61, %v4153_v5  ;;  %v1923_v9 = vpop.f32.mrb[77].mxu0  ;;  %v2036_v3 = vpop.f32.mrb[77].mxu1 }
 0x4bf   : > { %v4266_v51 = vadd.f32 %v1923_v9, %v4158_v6  ;;  %v4269_v0 = vadd.f32 %v2036_v3, %v4161_v7  ;;  %v1925_v25 = vpop.f32.mrb[78].mxu0  ;;  %v2038_v1 = vpop.f32.mrb[78].mxu1 }
 0x4c0   : > { %5496 = vst [vmem:[#allocation64_spill] sm:$0xff] %v4260_v20  ;;  %5497 = vst [vmem:[#allocation65_spill] sm:$0xff] %v4263_v28  ;;  %v4274_v2 = vadd.f32 %v1925_v25, %v4150_v45  ;;  %v4277_v61 = vadd.f32 %v2038_v1, %v4153_v5  ;;  %v1927_v50 = vpop.f32.mrb[79].mxu0  ;;  %v2040_v24 = vpop.f32.mrb[79].mxu1 }
 0x4c1   : > { %5498 = vst [vmem:[#allocation66_spill] sm:$0xff] %v4266_v51  ;;  %5499 = vst [vmem:[#allocation67_spill] sm:$0xff] %v4269_v0  ;;  %v4282_v3 = vadd.f32 %v1927_v50, %v4158_v6  ;;  %v4285_v41 = vadd.f32 %v2040_v24, %v4161_v7 }
 0x4c2   : > { %5500 = vst [vmem:[#allocation68_spill] sm:$0xff] %v4274_v2  ;;  %5501 = vst [vmem:[#allocation69_spill] sm:$0xff] %v4277_v61 }
 0x4c3   : > { %5502 = vst [vmem:[#allocation70_spill] sm:$0xff] %v4282_v3  ;;  %5503 = vst [vmem:[#allocation71_spill] sm:$0xff] %v4285_v41 }
 0x4c5   : > { %v1931_v28 = vpop.f32.mrb[80].mxu0  ;;  %v2044_v20 = vpop.f32.mrb[80].mxu1 }
 0x4c6   : > { %v4292_v9 = vadd.f32 %v1931_v28, %v4150_v45  ;;  %v4295_v40 = vadd.f32 %v2044_v20, %v4153_v5  ;;  %v1933_v50 = vpop.f32.mrb[81].mxu0  ;;  %v2046_v0 = vpop.f32.mrb[81].mxu1 }
 0x4c7   : > { %v4298_v24 = vadd.f32 %v1933_v50, %v4158_v6  ;;  %v4301_v60 = vadd.f32 %v2046_v0, %v4161_v7  ;;  %v1935_v25 = vpop.f32.mrb[82].mxu0  ;;  %v2048_v34 = vpop.f32.mrb[82].mxu1 }
 0x4c8   : > { %5504 = vst [vmem:[#allocation72_spill] sm:$0xff] %v4292_v9  ;;  %5505 = vst [vmem:[#allocation73_spill] sm:$0xff] %v4295_v40  ;;  %v4306_v28 = vadd.f32 %v1935_v25, %v4150_v45  ;;  %v4309_v20 = vadd.f32 %v2048_v34, %v4153_v5  ;;  %v1937_v61 = vpop.f32.mrb[83].mxu0  ;;  %v2050_v3 = vpop.f32.mrb[83].mxu1 }
 0x4c9   : > { %5506 = vst [vmem:[#allocation74_spill] sm:$0xff] %v4298_v24  ;;  %5507 = vst [vmem:[#allocation75_spill] sm:$0xff] %v4301_v60  ;;  %v4314_v0 = vadd.f32 %v1937_v61, %v4158_v6  ;;  %v4317_v51 = vadd.f32 %v2050_v3, %v4161_v7 }
 0x4ca   : > { %5508 = vst [vmem:[#allocation76_spill] sm:$0xff] %v4306_v28  ;;  %5509 = vst [vmem:[#allocation77_spill] sm:$0xff] %v4309_v20 }
 0x4cb   : > { %5510 = vst [vmem:[#allocation78_spill] sm:$0xff] %v4314_v0  ;;  %5511 = vst [vmem:[#allocation79_spill] sm:$0xff] %v4317_v51 }
 0x4cd   : > { %v1941_v40 = vpop.f32.mrb[84].mxu0  ;;  %v2054_v9 = vpop.f32.mrb[84].mxu1 }
 0x4ce   : > { %v4324_v50 = vadd.f32 %v1941_v40, %v4150_v45  ;;  %v4327_v2 = vadd.f32 %v2054_v9, %v4153_v5  ;;  %v1943_v61 = vpop.f32.mrb[85].mxu0  ;;  %v2056_v60 = vpop.f32.mrb[85].mxu1 }
 0x4cf   : > { %v4330_v3 = vadd.f32 %v1943_v61, %v4158_v6  ;;  %v4333_v41 = vadd.f32 %v2056_v60, %v4161_v7  ;;  %v1945_v25 = vpop.f32.mrb[86].mxu0  ;;  %v2058_v1 = vpop.f32.mrb[86].mxu1 }
 0x4d0   : > { %5512 = vst [vmem:[#allocation80_spill] sm:$0xff] %v4324_v50  ;;  %5513 = vst [vmem:[#allocation81_spill] sm:$0xff] %v4327_v2  ;;  %v4338_v40 = vadd.f32 %v1945_v25, %v4150_v45  ;;  %v4341_v9 = vadd.f32 %v2058_v1, %v4153_v5  ;;  %v1947_v20 = vpop.f32.mrb[87].mxu0  ;;  %v2060_v0 = vpop.f32.mrb[87].mxu1 }
 0x4d1   : > { %5514 = vst [vmem:[#allocation82_spill] sm:$0xff] %v4330_v3  ;;  %5515 = vst [vmem:[#allocation83_spill] sm:$0xff] %v4333_v41  ;;  %v4346_v60 = vadd.f32 %v1947_v20, %v4158_v6  ;;  %v4349_v24 = vadd.f32 %v2060_v0, %v4161_v7 }
 0x4d2   : > { %5516 = vst [vmem:[#allocation84_spill] sm:$0xff] %v4338_v40  ;;  %5517 = vst [vmem:[#allocation85_spill] sm:$0xff] %v4341_v9 }
 0x4d3   : > { %5518 = vst [vmem:[#allocation86_spill] sm:$0xff] %v4346_v60  ;;  %5519 = vst [vmem:[#allocation87_spill] sm:$0xff] %v4349_v24 }
 0x4d5   : > { %v1951_v2 = vpop.f32.mrb[88].mxu0  ;;  %v2064_v50 = vpop.f32.mrb[88].mxu1 }
 0x4d6   : > { %v4356_v61 = vadd.f32 %v1951_v2, %v4150_v45  ;;  %v4359_v28 = vadd.f32 %v2064_v50, %v4153_v5  ;;  %v1953_v20 = vpop.f32.mrb[89].mxu0  ;;  %v2066_v41 = vpop.f32.mrb[89].mxu1 }
 0x4d7   : > { %v4362_v0 = vadd.f32 %v1953_v20, %v4158_v6  ;;  %v4365_v51 = vadd.f32 %v2066_v41, %v4161_v7  ;;  %v1955_v25 = vpop.f32.mrb[90].mxu0  ;;  %v2068_v34 = vpop.f32.mrb[90].mxu1 }
 0x4d8   : > { %5520 = vst [vmem:[#allocation88_spill] sm:$0xff] %v4356_v61  ;;  %5521 = vst [vmem:[#allocation89_spill] sm:$0xff] %v4359_v28  ;;  %v4370_v2 = vadd.f32 %v1955_v25, %v4150_v45  ;;  %v4373_v50 = vadd.f32 %v2068_v34, %v4153_v5  ;;  %v1957_v9 = vpop.f32.mrb[91].mxu0  ;;  %v2070_v60 = vpop.f32.mrb[91].mxu1 }
 0x4d9   : > { %5522 = vst [vmem:[#allocation90_spill] sm:$0xff] %v4362_v0  ;;  %5523 = vst [vmem:[#allocation91_spill] sm:$0xff] %v4365_v51  ;;  %v4378_v41 = vadd.f32 %v1957_v9, %v4158_v6  ;;  %v4381_v3 = vadd.f32 %v2070_v60, %v4161_v7 }
 0x4da   : > { %5524 = vst [vmem:[#allocation92_spill] sm:$0xff] %v4370_v2  ;;  %5525 = vst [vmem:[#allocation93_spill] sm:$0xff] %v4373_v50  ;;  %v5536_v2 = vmax.f32 (!%p3115_p8), %v3892_v10, 0.0  ;;  %v5544_v10 = vmax.f32 (!%p3115_p8), %v4164_v4, 0.0  ;;  %v5591_v4 = vld [vmem:[#allocation13_spill] sm:$0xff] (!%p3115_p8) }
 0x4db   : > { %5526 = vst [vmem:[#allocation94_spill] sm:$0xff] %v4378_v41  ;;  %5527 = vst [vmem:[#allocation95_spill] sm:$0xff] %v4381_v3  ;;  %v5539_v3 = vmax.f32 (!%p3115_p8), %v3909_v22, 0.0  ;;  %v5548_v22 = vmax.f32 (!%p3115_p8), %v4167_v26, 0.0  ;;  %v5589_v26 = vld [vmem:[#allocation14_spill] sm:$0xff] (!%p3115_p8) }
 0x4dd   : > { %v1961_v28 = vpop.f32.mrb[92].mxu0  ;;  %v2074_v61 = vpop.f32.mrb[92].mxu1  ;;  %2222 = sbr.rel (%p3115_p8) target bundleno = 1339 (0x53b), region = 72 }
 0x4de   : > { %v4388_v20 = vadd.f32 %v1961_v28, %v4150_v45  ;;  %v4391_v40 = vadd.f32 %v2074_v61, %v4153_v5  ;;  %v1963_v9 = vpop.f32.mrb[93].mxu0  ;;  %v2076_v51 = vpop.f32.mrb[93].mxu1 }
 0x4df   : > { %v4394_v60 = vadd.f32 %v1963_v9, %v4158_v6  ;;  %v4397_v24 = vadd.f32 %v2076_v51, %v4161_v7  ;;  %v1965_v25 = vpop.f32.mrb[94].mxu0  ;;  %v2078_v1 = vpop.f32.mrb[94].mxu1  ;;  %v5542_v9 = vmax.f32 (!%p3115_p8), %v3901_v16, 0.0 }
 0x4e0   : > { %5528 = vst [vmem:[#allocation96_spill] sm:$0xff] %v4391_v40  ;;  %v4402_v28 = vadd.f32 %v1965_v25, %v4150_v45  ;;  %v4405_v61 = vadd.f32 %v2078_v1, %v4153_v5  ;;  %v1967_v50 = vpop.f32.mrb[95].mxu0  ;;  %v2080_v41 = vpop.f32.mrb[95].mxu1  ;;  %v5535_v1 = vmax.f32 (!%p3115_p8), %v3906_v21, 0.0  ;;  %v5540_v45 = vmax.f32 (!%p3115_p8), %v3895_v11, 0.0 }
 0x4e1   : > { %5529 = vst [vmem:[#allocation97_spill] sm:$0xff] %v4394_v60  ;;  %5530 = vst [vmem:[#allocation98_spill] sm:$0xff] %v4397_v24  ;;  %v4410_v51 = vadd.f32 %v1967_v50, %v4158_v6  ;;  %v4413_v0 = vadd.f32 %v2080_v41, %v4161_v7  ;;  %v5537_v50 = vmax.f32 (!%p3115_p8), %v3914_v27, 0.0  ;;  %v5538_v7 = vmax.f32 (!%p3115_p8), %v3898_v15, 0.0 }
 0x4e2   : > { %5531 = vst [vmem:[#allocation99_spill] sm:$0xff] %v4402_v28  ;;  %5532 = vst [vmem:[#allocation100_spill] sm:$0xff] %v4405_v61  ;;  %v2224_v6 = vmax.f32 (!%p3115_p8), %v5536_v2, %v5535_v1  ;;  %v2266_v25 = vmax.f32 (!%p3115_p8), %v5540_v45, %v5539_v3  ;;  %v5541_v5 = vmax.f32 (!%p3115_p8), %v3917_v30, 0.0  ;;  %v5543_v21 = vmax.f32 (!%p3115_p8), %v4178_v54, 0.0 }
 0x4e3   : > { %5533 = vst [vmem:[#allocation101_spill] sm:$0xff] %v4410_v51  ;;  %5534 = vst [vmem:[#allocation102_spill] sm:$0xff] %v4413_v0  ;;  %v2245_v41 = vmax.f32 (!%p3115_p8), %v5538_v7, %v5537_v50  ;;  %v5545_v1 = vmax.f32 (!%p3115_p8), %v4186_v55, 0.0  ;;  %v5546_v27 = vmax.f32 (!%p3115_p8), %v4170_v52, 0.0  ;;  %v5547_v7 = vmax.f32 (!%p3115_p8), %v4181_v46, 0.0 }
 0x4e4   : > { %v2287_v34 = vmax.f32 %v5542_v9, %v5541_v5  ;;  %v2308_v2 = vmax.f32 %v5544_v10, %v5543_v21  ;;  %v5549_v45 = vmax.f32 %v4189_v47, 0.0  ;;  %v5550_v30 = vmax.f32 %v4173_v44, 0.0  ;;  %v5587_v44 = vld [vmem:[#allocation12_spill] sm:$0xff] }
 0x4e5   : > { %v2329_v50 = vmax.f32 %v5546_v27, %v5545_v1  ;;  %v2350_v3 = vmax.f32 %v5548_v22, %v5547_v7  ;;  %v5551_v5 = vmax.f32 %v3924_v38, 0.0  ;;  %v5552_v10 = vmax.f32 %v3930_v42, 0.0  ;;  %v5583_v38 = vld [vmem:[#allocation61_spill] sm:$0xff] }
 0x4e6   : > { %v2371_v9 = vmax.f32 %v5550_v30, %v5549_v45  ;;  %v5553_v55 = vmax.f32 %v3927_v39, 0.0  ;;  %v5554_v27 = vmax.f32 %v3933_v43, 0.0  ;;  %v5555_v46 = vmax.f32 %v4196_v33, 0.0 }
 0x4e7   : > { %v2225_v54 = vmax.f32 %v2224_v6, %v5551_v5  ;;  %v2246_v21 = vmax.f32 %v2245_v41, %v5552_v10  ;;  %v5556_v7 = vmax.f32 %v4202_v29, 0.0  ;;  %v5557_v30 = vmax.f32 %v4199_v32, 0.0 }
 0x4e8   : > { %v2267_v52 = vmax.f32 %v2266_v25, %v5553_v55  ;;  %v2288_v1 = vmax.f32 %v2287_v34, %v5554_v27  ;;  %v2309_v22 = vmax.f32 %v2308_v2, %v5555_v46  ;;  %v5558_v6 = vmax.f32 %v4205_v31, 0.0 }
 0x4e9   : > { %v2330_v47 = vmax.f32 %v2329_v50, %v5556_v7  ;;  %v2351_v45 = vmax.f32 %v2350_v3, %v5557_v30  ;;  %v5559_v41 = vmax.f32 %v3938_v48, 0.0  ;;  %v5560_v55 = vmax.f32 %v3946_v53, 0.0  ;;  %v5581_v48 = vld [vmem:[#allocation62_spill] sm:$0xff] }
 0x4ea   : > { %v2372_v5 = vmax.f32 %v2371_v9, %v5558_v6  ;;  %v5561_v34 = vmax.f32 %v3941_v49, 0.0  ;;  %v5562_v46 = vmax.f32 %v3949_v12, 0.0  ;;  %v5563_v50 = vmax.f32 %v4210_v19, 0.0 }
 0x4eb   : > { %v2226_v10 = vmax.f32 %v2225_v54, %v5559_v41  ;;  %v2247_v25 = vmax.f32 %v2246_v21, %v5560_v55  ;;  %v5564_v3 = vmax.f32 %v4218_v37, 0.0  ;;  %v5565_v9 = vmax.f32 %v4213_v18, 0.0 }
 0x4ec   : > { %v2268_v27 = vmax.f32 %v2267_v52, %v5561_v34  ;;  %v2289_v2 = vmax.f32 %v2288_v1, %v5562_v46  ;;  %v2310_v7 = vmax.f32 %v2309_v22, %v5563_v50  ;;  %v5566_v54 = vmax.f32 %v4221_v23, 0.0 }
 0x4ed   : > { %v2331_v30 = vmax.f32 %v2330_v47, %v5564_v3  ;;  %v2352_v6 = vmax.f32 %v2351_v45, %v5565_v9  ;;  %v5567_v21 = vmax.f32 %v3956_v62, 0.0  ;;  %v5568_v52 = vmax.f32 %v3962_v56, 0.0  ;;  %v5579_v62 = vld [vmem:[#allocation60_spill] sm:$0xff] }
 0x4ee   : > { %v2373_v41 = vmax.f32 %v2372_v5, %v5566_v54  ;;  %v5569_v1 = vmax.f32 %v3959_v63, 0.0  ;;  %v5570_v22 = vmax.f32 %v3965_v57, 0.0  ;;  %v5571_v47 = vmax.f32 %v4228_v58, 0.0 }
 0x4ef   : > { %v2227_v55 = vmax.f32 %v2226_v10, %v5567_v21  ;;  %v2248_v34 = vmax.f32 %v2247_v25, %v5568_v52  ;;  %v5572_v45 = vmax.f32 %v4234_v8, 0.0  ;;  %v5573_v5 = vmax.f32 %v4231_v59, 0.0 }
 0x4f0   : > { %v2269_v46 = vmax.f32 %v2268_v27, %v5569_v1  ;;  %v2290_v50 = vmax.f32 %v2289_v2, %v5570_v22  ;;  %v2311_v3 = vmax.f32 %v2310_v7, %v5571_v47  ;;  %v5574_v10 = vmax.f32 %v4237_v17, 0.0 }
 0x4f1   : > { %v2332_v9 = vmax.f32 %v2331_v30, %v5572_v45  ;;  %v2353_v54 = vmax.f32 %v2352_v6, %v5573_v5  ;;  %v5575_v25 = vmax.f32 %v3970_v13, 0.0  ;;  %v5576_v27 = vmax.f32 %v3978_v35, 0.0  ;;  %v5585_v13 = vld [vmem:[#allocation63_spill] sm:$0xff] }
 0x4f2   : > { %v2374_v21 = vmax.f32 %v2373_v41, %v5574_v10  ;;  %v5577_v2 = vmax.f32 %v3973_v14, 0.0  ;;  %v5578_v7 = vmax.f32 %v3981_v36, 0.0  ;;  %v5580_v30 = vmax.f32 %v5579_v62, 0.0  ;;  %v5593_v62 = vld [vmem:[#allocation15_spill] sm:$0xff] }
 0x4f3   : > { %v2228_v52 = vmax.f32 %v2227_v55, %v5575_v25  ;;  %v2249_v1 = vmax.f32 %v2248_v34, %v5576_v27  ;;  %v5582_v6 = vmax.f32 %v5581_v48, 0.0  ;;  %v5584_v41 = vmax.f32 %v5583_v38, 0.0  ;;  %v5595_v48 = vld [vmem:[#allocation64_spill] sm:$0xff]  ;;  %v5597_v38 = vld [vmem:[#allocation66_spill] sm:$0xff] }
 0x4f4   : > { %v2270_v22 = vmax.f32 %v2269_v46, %v5577_v2  ;;  %v2291_v47 = vmax.f32 %v2290_v50, %v5578_v7  ;;  %v2312_v45 = vmax.f32 %v2311_v3, %v5580_v30  ;;  %v5586_v55 = vmax.f32 %v5585_v13, 0.0  ;;  %v5599_v13 = vld [vmem:[#allocation65_spill] sm:$0xff] }
 0x4f5   : > { %v2333_v5 = vmax.f32 %v2332_v9, %v5582_v6  ;;  %v2354_v10 = vmax.f32 %v2353_v54, %v5584_v41  ;;  %v5588_v34 = vmax.f32 %v5587_v44, 0.0  ;;  %v5590_v46 = vmax.f32 %v5589_v26, 0.0  ;;  %v5601_v44 = vld [vmem:[#allocation67_spill] sm:$0xff]  ;;  %v5603_v26 = vld [vmem:[#allocation16_spill] sm:$0xff] }
 0x4f6   : > { %v2375_v25 = vmax.f32 %v2374_v21, %v5586_v55  ;;  %v5592_v50 = vmax.f32 %v5591_v4, 0.0  ;;  %v5594_v3 = vmax.f32 %v5593_v62, 0.0  ;;  %v5596_v9 = vmax.f32 %v5595_v48, 0.0  ;;  %v5605_v4 = vld [vmem:[#allocation18_spill] sm:$0xff]  ;;  %v5607_v62 = vld [vmem:[#allocation17_spill] sm:$0xff]  ;;  %v5609_v48 = vld [vmem:[#allocation19_spill] sm:$0xff] }
 0x4f7   : > { %v2229_v27 = vmax.f32 %v2228_v52, %v5588_v34  ;;  %v2250_v2 = vmax.f32 %v2249_v1, %v5590_v46  ;;  %v5598_v54 = vmax.f32 %v5597_v38, 0.0  ;;  %v5600_v21 = vmax.f32 %v5599_v13, 0.0  ;;  %v5611_v38 = vld [vmem:[#allocation68_spill] sm:$0xff]  ;;  %v5613_v13 = vld [vmem:[#allocation70_spill] sm:$0xff] }
 0x4f8   : > { %v2271_v7 = vmax.f32 %v2270_v22, %v5592_v50  ;;  %v2292_v30 = vmax.f32 %v2291_v47, %v5594_v3  ;;  %v2313_v6 = vmax.f32 %v2312_v45, %v5596_v9  ;;  %v5602_v52 = vmax.f32 %v5601_v44, 0.0  ;;  %v5615_v44 = vld [vmem:[#allocation69_spill] sm:$0xff] }
 0x4f9   : > { %v2334_v41 = vmax.f32 %v2333_v5, %v5598_v54  ;;  %v2355_v55 = vmax.f32 %v2354_v10, %v5600_v21  ;;  %v5604_v1 = vmax.f32 %v5603_v26, 0.0  ;;  %v5606_v22 = vmax.f32 %v5605_v4, 0.0  ;;  %v5617_v26 = vld [vmem:[#allocation71_spill] sm:$0xff]  ;;  %v5619_v4 = vld [vmem:[#allocation20_spill] sm:$0xff] }
 0x4fa   : > { %v2376_v34 = vmax.f32 %v2375_v25, %v5602_v52  ;;  %v5608_v47 = vmax.f32 %v5607_v62, 0.0  ;;  %v5610_v45 = vmax.f32 %v5609_v48, 0.0  ;;  %v5612_v5 = vmax.f32 %v5611_v38, 0.0  ;;  %v5621_v62 = vld [vmem:[#allocation22_spill] sm:$0xff]  ;;  %v5623_v48 = vld [vmem:[#allocation21_spill] sm:$0xff]  ;;  %v5625_v38 = vld [vmem:[#allocation23_spill] sm:$0xff] }
 0x4fb   : > { %v2230_v46 = vmax.f32 %v2229_v27, %v5604_v1  ;;  %v2251_v50 = vmax.f32 %v2250_v2, %v5606_v22  ;;  %v5614_v10 = vmax.f32 %v5613_v13, 0.0  ;;  %v5616_v25 = vmax.f32 %v5615_v44, 0.0  ;;  %v5627_v13 = vld [vmem:[#allocation72_spill] sm:$0xff]  ;;  %v5629_v44 = vld [vmem:[#allocation74_spill] sm:$0xff] }
 0x4fc   : > { %v2272_v3 = vmax.f32 %v2271_v7, %v5608_v47  ;;  %v2293_v9 = vmax.f32 %v2292_v30, %v5610_v45  ;;  %v2314_v54 = vmax.f32 %v2313_v6, %v5612_v5  ;;  %v5618_v27 = vmax.f32 %v5617_v26, 0.0  ;;  %v5631_v26 = vld [vmem:[#allocation73_spill] sm:$0xff] }
 0x4fd   : > { %v2335_v21 = vmax.f32 %v2334_v41, %v5614_v10  ;;  %v2356_v52 = vmax.f32 %v2355_v55, %v5616_v25  ;;  %v5620_v2 = vmax.f32 %v5619_v4, 0.0  ;;  %v5622_v7 = vmax.f32 %v5621_v62, 0.0  ;;  %v5633_v4 = vld [vmem:[#allocation75_spill] sm:$0xff]  ;;  %v5635_v62 = vld [vmem:[#allocation24_spill] sm:$0xff] }
 0x4fe   : > { %v2377_v1 = vmax.f32 %v2376_v34, %v5618_v27  ;;  %v5624_v30 = vmax.f32 %v5623_v48, 0.0  ;;  %v5626_v6 = vmax.f32 %v5625_v38, 0.0  ;;  %v5628_v41 = vmax.f32 %v5627_v13, 0.0  ;;  %v5637_v48 = vld [vmem:[#allocation26_spill] sm:$0xff]  ;;  %v5639_v38 = vld [vmem:[#allocation25_spill] sm:$0xff]  ;;  %v5641_v13 = vld [vmem:[#allocation27_spill] sm:$0xff] }
 0x4ff   : > { %v2231_v22 = vmax.f32 %v2230_v46, %v5620_v2  ;;  %v2252_v47 = vmax.f32 %v2251_v50, %v5622_v7  ;;  %v5630_v55 = vmax.f32 %v5629_v44, 0.0  ;;  %v5632_v34 = vmax.f32 %v5631_v26, 0.0  ;;  %v5643_v44 = vld [vmem:[#allocation76_spill] sm:$0xff]  ;;  %v5645_v26 = vld [vmem:[#allocation78_spill] sm:$0xff] }
 0x500   : > { %v2273_v45 = vmax.f32 %v2272_v3, %v5624_v30  ;;  %v2294_v5 = vmax.f32 %v2293_v9, %v5626_v6  ;;  %v2315_v10 = vmax.f32 %v2314_v54, %v5628_v41  ;;  %v5634_v46 = vmax.f32 %v5633_v4, 0.0  ;;  %v5647_v4 = vld [vmem:[#allocation77_spill] sm:$0xff] }
 0x501   : > { %v2336_v25 = vmax.f32 %v2335_v21, %v5630_v55  ;;  %v2357_v27 = vmax.f32 %v2356_v52, %v5632_v34  ;;  %v5636_v50 = vmax.f32 %v5635_v62, 0.0  ;;  %v5638_v3 = vmax.f32 %v5637_v48, 0.0  ;;  %v5649_v62 = vld [vmem:[#allocation79_spill] sm:$0xff]  ;;  %v5651_v48 = vld [vmem:[#allocation28_spill] sm:$0xff] }
 0x502   : > { %v2378_v2 = vmax.f32 %v2377_v1, %v5634_v46  ;;  %v5640_v9 = vmax.f32 %v5639_v38, 0.0  ;;  %v5642_v54 = vmax.f32 %v5641_v13, 0.0  ;;  %v5644_v21 = vmax.f32 %v5643_v44, 0.0  ;;  %v5653_v38 = vld [vmem:[#allocation30_spill] sm:$0xff]  ;;  %v5655_v13 = vld [vmem:[#allocation29_spill] sm:$0xff]  ;;  %v5657_v44 = vld [vmem:[#allocation31_spill] sm:$0xff] }
 0x503   : > { %v2232_v7 = vmax.f32 %v2231_v22, %v5636_v50  ;;  %v2253_v30 = vmax.f32 %v2252_v47, %v5638_v3  ;;  %v5646_v52 = vmax.f32 %v5645_v26, 0.0  ;;  %v5648_v1 = vmax.f32 %v5647_v4, 0.0  ;;  %v5659_v26 = vld [vmem:[#allocation80_spill] sm:$0xff]  ;;  %v5661_v4 = vld [vmem:[#allocation82_spill] sm:$0xff] }
 0x504   : > { %v2274_v6 = vmax.f32 %v2273_v45, %v5640_v9  ;;  %v2295_v41 = vmax.f32 %v2294_v5, %v5642_v54  ;;  %v2316_v55 = vmax.f32 %v2315_v10, %v5644_v21  ;;  %v5650_v22 = vmax.f32 %v5649_v62, 0.0  ;;  %v5663_v62 = vld [vmem:[#allocation81_spill] sm:$0xff] }
 0x505   : > { %v2337_v34 = vmax.f32 %v2336_v25, %v5646_v52  ;;  %v2358_v46 = vmax.f32 %v2357_v27, %v5648_v1  ;;  %v5652_v47 = vmax.f32 %v5651_v48, 0.0  ;;  %v5654_v45 = vmax.f32 %v5653_v38, 0.0  ;;  %v5665_v48 = vld [vmem:[#allocation83_spill] sm:$0xff]  ;;  %v5667_v38 = vld [vmem:[#allocation32_spill] sm:$0xff] }
 0x506   : > { %v2379_v50 = vmax.f32 %v2378_v2, %v5650_v22  ;;  %v5656_v5 = vmax.f32 %v5655_v13, 0.0  ;;  %v5658_v10 = vmax.f32 %v5657_v44, 0.0  ;;  %v5660_v25 = vmax.f32 %v5659_v26, 0.0  ;;  %v5669_v13 = vld [vmem:[#allocation34_spill] sm:$0xff]  ;;  %v5671_v44 = vld [vmem:[#allocation33_spill] sm:$0xff]  ;;  %v5673_v26 = vld [vmem:[#allocation35_spill] sm:$0xff] }
 0x507   : > { %v2233_v3 = vmax.f32 %v2232_v7, %v5652_v47  ;;  %v2254_v9 = vmax.f32 %v2253_v30, %v5654_v45  ;;  %v5662_v27 = vmax.f32 %v5661_v4, 0.0  ;;  %v5664_v2 = vmax.f32 %v5663_v62, 0.0  ;;  %v5675_v4 = vld [vmem:[#allocation84_spill] sm:$0xff]  ;;  %v5677_v62 = vld [vmem:[#allocation86_spill] sm:$0xff] }
 0x508   : > { %v2275_v54 = vmax.f32 %v2274_v6, %v5656_v5  ;;  %v2296_v21 = vmax.f32 %v2295_v41, %v5658_v10  ;;  %v2317_v52 = vmax.f32 %v2316_v55, %v5660_v25  ;;  %v5666_v7 = vmax.f32 %v5665_v48, 0.0  ;;  %v5679_v48 = vld [vmem:[#allocation85_spill] sm:$0xff] }
 0x509   : > { %v2338_v1 = vmax.f32 %v2337_v34, %v5662_v27  ;;  %v2359_v22 = vmax.f32 %v2358_v46, %v5664_v2  ;;  %v5668_v30 = vmax.f32 %v5667_v38, 0.0  ;;  %v5670_v6 = vmax.f32 %v5669_v13, 0.0  ;;  %v5681_v38 = vld [vmem:[#allocation87_spill] sm:$0xff]  ;;  %v5683_v13 = vld [vmem:[#allocation36_spill] sm:$0xff] }
 0x50a   : > { %v2380_v47 = vmax.f32 %v2379_v50, %v5666_v7  ;;  %v5672_v41 = vmax.f32 %v5671_v44, 0.0  ;;  %v5674_v55 = vmax.f32 %v5673_v26, 0.0  ;;  %v5676_v34 = vmax.f32 %v5675_v4, 0.0  ;;  %v5685_v44 = vld [vmem:[#allocation38_spill] sm:$0xff]  ;;  %v5687_v26 = vld [vmem:[#allocation37_spill] sm:$0xff]  ;;  %v5689_v4 = vld [vmem:[#allocation39_spill] sm:$0xff] }
 0x50b   : > { %v2234_v45 = vmax.f32 %v2233_v3, %v5668_v30  ;;  %v2255_v5 = vmax.f32 %v2254_v9, %v5670_v6  ;;  %v5678_v46 = vmax.f32 %v5677_v62, 0.0  ;;  %v5680_v50 = vmax.f32 %v5679_v48, 0.0  ;;  %v5691_v62 = vld [vmem:[#allocation88_spill] sm:$0xff]  ;;  %v5693_v48 = vld [vmem:[#allocation90_spill] sm:$0xff] }
 0x50c   : > { %v2276_v10 = vmax.f32 %v2275_v54, %v5672_v41  ;;  %v2297_v25 = vmax.f32 %v2296_v21, %v5674_v55  ;;  %v2318_v27 = vmax.f32 %v2317_v52, %v5676_v34  ;;  %v5682_v3 = vmax.f32 %v5681_v38, 0.0  ;;  %v5695_v38 = vld [vmem:[#allocation89_spill] sm:$0xff] }
 0x50d   : > { %v2339_v2 = vmax.f32 %v2338_v1, %v5678_v46  ;;  %v2360_v7 = vmax.f32 %v2359_v22, %v5680_v50  ;;  %v5684_v9 = vmax.f32 %v5683_v13, 0.0  ;;  %v5686_v54 = vmax.f32 %v5685_v44, 0.0  ;;  %v5697_v13 = vld [vmem:[#allocation91_spill] sm:$0xff]  ;;  %v5699_v44 = vld [vmem:[#allocation40_spill] sm:$0xff] }
 0x50e   : > { %v2381_v30 = vmax.f32 %v2380_v47, %v5682_v3  ;;  %v5688_v21 = vmax.f32 %v5687_v26, 0.0  ;;  %v5690_v52 = vmax.f32 %v5689_v4, 0.0  ;;  %v5692_v1 = vmax.f32 %v5691_v62, 0.0  ;;  %v5701_v26 = vld [vmem:[#allocation42_spill] sm:$0xff]  ;;  %v5703_v4 = vld [vmem:[#allocation41_spill] sm:$0xff]  ;;  %v5705_v62 = vld [vmem:[#allocation43_spill] sm:$0xff] }
 0x50f   : > { %v2235_v6 = vmax.f32 %v2234_v45, %v5684_v9  ;;  %v2256_v41 = vmax.f32 %v2255_v5, %v5686_v54  ;;  %v5694_v22 = vmax.f32 %v5693_v48, 0.0  ;;  %v5696_v47 = vmax.f32 %v5695_v38, 0.0  ;;  %v5707_v48 = vld [vmem:[#allocation92_spill] sm:$0xff]  ;;  %v5709_v38 = vld [vmem:[#allocation94_spill] sm:$0xff] }
 0x510   : > { %v2277_v55 = vmax.f32 %v2276_v10, %v5688_v21  ;;  %v2298_v34 = vmax.f32 %v2297_v25, %v5690_v52  ;;  %v2319_v46 = vmax.f32 %v2318_v27, %v5692_v1  ;;  %v5698_v45 = vmax.f32 %v5697_v13, 0.0  ;;  %v5711_v13 = vld [vmem:[#allocation93_spill] sm:$0xff] }
 0x511   : > { %v2340_v50 = vmax.f32 %v2339_v2, %v5694_v22  ;;  %v2361_v3 = vmax.f32 %v2360_v7, %v5696_v47  ;;  %v5700_v5 = vmax.f32 %v5699_v44, 0.0  ;;  %v5702_v10 = vmax.f32 %v5701_v26, 0.0  ;;  %v5713_v44 = vld [vmem:[#allocation95_spill] sm:$0xff]  ;;  %v5715_v26 = vld [vmem:[#allocation44_spill] sm:$0xff] }
 0x512   : > { %v2382_v9 = vmax.f32 %v2381_v30, %v5698_v45  ;;  %v5704_v25 = vmax.f32 %v5703_v4, 0.0  ;;  %v5706_v27 = vmax.f32 %v5705_v62, 0.0  ;;  %v5708_v2 = vmax.f32 %v5707_v48, 0.0  ;;  %v5717_v4 = vld [vmem:[#allocation46_spill] sm:$0xff]  ;;  %v5719_v62 = vld [vmem:[#allocation45_spill] sm:$0xff]  ;;  %v5721_v48 = vld [vmem:[#allocation47_spill] sm:$0xff] }
 0x513   : > { %v2236_v54 = vmax.f32 %v2235_v6, %v5700_v5  ;;  %v2257_v21 = vmax.f32 %v2256_v41, %v5702_v10  ;;  %v5710_v7 = vmax.f32 %v5709_v38, 0.0  ;;  %v5712_v30 = vmax.f32 %v5711_v13, 0.0 }
 0x514   : > { %v2278_v52 = vmax.f32 %v2277_v55, %v5704_v25  ;;  %v2299_v1 = vmax.f32 %v2298_v34, %v5706_v27  ;;  %v2320_v22 = vmax.f32 %v2319_v46, %v5708_v2  ;;  %v5714_v6 = vmax.f32 %v5713_v44, 0.0  ;;  %v5727_v44 = vld [vmem:[#allocation48_spill] sm:$0xff] }
 0x515   : > { %v2341_v47 = vmax.f32 %v2340_v50, %v5710_v7  ;;  %v2362_v45 = vmax.f32 %v2361_v3, %v5712_v30  ;;  %v5716_v41 = vmax.f32 %v5715_v26, 0.0  ;;  %v5718_v55 = vmax.f32 %v5717_v4, 0.0  ;;  %v5729_v26 = vld [vmem:[#allocation50_spill] sm:$0xff]  ;;  %v5731_v4 = vld [vmem:[#allocation49_spill] sm:$0xff] }
 0x516   : > { %v2383_v5 = vmax.f32 %v2382_v9, %v5714_v6  ;;  %v5720_v34 = vmax.f32 %v5719_v62, 0.0  ;;  %v5722_v46 = vmax.f32 %v5721_v48, 0.0  ;;  %v5723_v50 = vmax.f32 %v4388_v20, 0.0  ;;  %v5733_v62 = vld [vmem:[#allocation51_spill] sm:$0xff] }
 0x517   : > { %v2237_v10 = vmax.f32 %v2236_v54, %v5716_v41  ;;  %v2258_v25 = vmax.f32 %v2257_v21, %v5718_v55  ;;  %v5724_v3 = vmax.f32 %v4394_v60, 0.0  ;;  %v5725_v9 = vmax.f32 %v4391_v40, 0.0 }
 0x518   : > { %v2279_v27 = vmax.f32 %v2278_v52, %v5720_v34  ;;  %v2300_v2 = vmax.f32 %v2299_v1, %v5722_v46  ;;  %v2321_v38 = vmax.f32 %v2320_v22, %v5723_v50  ;;  %v5726_v54 = vmax.f32 %v4397_v24, 0.0 }
 0x519   : > { %v2342_v7 = vmax.f32 %v2341_v47, %v5724_v3  ;;  %v2363_v13 = vmax.f32 %v2362_v45, %v5725_v9  ;;  %v5728_v21 = vmax.f32 %v5727_v44, 0.0  ;;  %v5730_v52 = vmax.f32 %v5729_v26, 0.0 }
 0x51a   : > { %v2384_v30 = vmax.f32 %v2383_v5, %v5726_v54  ;;  %v5732_v1 = vmax.f32 %v5731_v4, 0.0  ;;  %v5734_v22 = vmax.f32 %v5733_v62, 0.0  ;;  %v5735_v47 = vmax.f32 %v4402_v28, 0.0 }
 0x51b   : > { %v2238_v6 = vmax.f32 %v2237_v10, %v5728_v21  ;;  %v2259_v41 = vmax.f32 %v2258_v25, %v5730_v52  ;;  %v5736_v45 = vmax.f32 %v4410_v51, 0.0  ;;  %v5737_v5 = vmax.f32 %v4405_v61, 0.0 }
 0x51c   : > { %v2280_v55 = vmax.f32 %v2279_v27, %v5732_v1  ;;  %v2301_v34 = vmax.f32 %v2300_v2, %v5734_v22  ;;  %v2322_v48 = vmax.f32 %v2321_v38, %v5735_v47  ;;  %v5738_v10 = vmax.f32 %v4413_v0, 0.0 }
 0x51d   : > { %v2343_v46 = vmax.f32 %v2342_v7, %v5736_v45  ;;  %v2364_v50 = vmax.f32 %v2363_v13, %v5737_v5  ;;  %v2239_v9 = vrot.slane %v2238_v6, 4  ;;  %v2260_v25 = vrot.slane %v2259_v41, 4 }
 0x51e   : > { %v2385_v3 = vmax.f32 %v2384_v30, %v5738_v10  ;;  %v2281_v54 = vrot.slane %v2280_v55, 4  ;;  %v2302_v44 = vrot.slane %v2301_v34, 4  ;;  %v2323_v27 = vrot.slane %v2322_v48, 4 }
 0x51f   : > { %v2344_v21 = vrot.slane %v2343_v46, 4  ;;  %v2365_v26 = vrot.slane %v2364_v50, 4  ;;  %v2240_v52 = vmax.f32 %v2238_v6, %v2239_v9  ;;  %v2261_v4 = vmax.f32 %v2259_v41, %v2260_v25 }
 0x520   : > { %v2386_v2 = vrot.slane %v2385_v3, 4  ;;  %v2282_v38 = vmax.f32 %v2280_v55, %v2281_v54  ;;  %v2303_v1 = vmax.f32 %v2301_v34, %v2302_v44  ;;  %v2324_v62 = vmax.f32 %v2322_v48, %v2323_v27 }
 0x521   : > { %v2345_v7 = vmax.f32 %v2343_v46, %v2344_v21  ;;  %v2366_v22 = vmax.f32 %v2364_v50, %v2365_v26  ;;  %v2241_v13 = vrot.slane %v2240_v52, 2  ;;  %v2262_v45 = vrot.slane %v2261_v4, 2 }
 0x522   : > { %v2387_v47 = vmax.f32 %v2385_v3, %v2386_v2  ;;  %v2283_v5 = vrot.slane %v2282_v38, 2  ;;  %v2304_v30 = vrot.slane %v2303_v1, 2  ;;  %v2325_v10 = vrot.slane %v2324_v62, 2 }
 0x523   : > { %v2346_v0 = vrot.slane %v2345_v7, 2  ;;  %v2367_v61 = vrot.slane %v2366_v22, 2  ;;  %v2242_v28 = vmax.f32 %v2240_v52, %v2241_v13  ;;  %v2263_v24 = vmax.f32 %v2261_v4, %v2262_v45  ;;  %v5739_v13 = vld [vmem:[#allocation2_spill] sm:$0xff] }
 0x524   : > { %v2388_v51 = vrot.slane %v2387_v47, 2  ;;  %v2284_v40 = vmax.f32 %v2282_v38, %v2283_v5  ;;  %v2305_v60 = vmax.f32 %v2303_v1, %v2304_v30  ;;  %v2326_v6 = vmax.f32 %v2324_v62, %v2325_v10 }
 0x525   : > { %v2347_v41 = vmax.f32 %v2345_v7, %v2346_v0  ;;  %v2368_v55 = vmax.f32 %v2366_v22, %v2367_v61  ;;  %v2243_v48 = vrot.slane %v2242_v28, 1  ;;  %v2264_v46 = vrot.slane %v2263_v24, 1 }
 0x526   : > { %v2389_v34 = vmax.f32 %v2387_v47, %v2388_v51  ;;  %v2285_v50 = vrot.slane %v2284_v40, 1  ;;  %v2306_v3 = vrot.slane %v2305_v60, 1  ;;  %v2327_v9 = vrot.slane %v2326_v6, 1 }
 0x527   : > { %v2348_v25 = vrot.slane %v2347_v41, 1  ;;  %v2369_v54 = vrot.slane %v2368_v55, 1  ;;  %v2244_v27 = vmax.f32 %v2242_v28, %v2243_v48  ;;  %v2265_v21 = vmax.f32 %v2263_v24, %v2264_v46 }
 0x528   : > { %v2390_v44 = vrot.slane %v2389_v34, 1  ;;  %v2286_v26 = vmax.f32 %v2284_v40, %v2285_v50  ;;  %v2307_v2 = vmax.f32 %v2305_v60, %v2306_v3  ;;  %v2328_v52 = vmax.f32 %v2326_v6, %v2327_v9 }
 0x529   : > { %v2349_v4 = vmax.f32 %v2347_v41, %v2348_v25  ;;  %v2370_v38 = vmax.f32 %v2368_v55, %v2369_v54  ;;  %v3361_v62 = vmov 1966171168   ;;  %v2400_v61 = vcombine.low %v2244_v27, %v2265_v21  ;;  %v2223_v41 = vld [vmem:[%s3475_s18] sm:$0xff] }
 0x52a   : > { %v2391_v1 = vmax.f32 %v2389_v34, %v2390_v44  ;;  %v2405_v0 = vunpack.c.l.s4 %v3361_v62  ;;  %v2401_v51 = vcombine.low %v2286_v26, %v2307_v2 }
 0x52b   : > { %v2402_v7 = vcombine.low %v2328_v52, %v2349_v4 }
 0x52c   : > { %v2403_v22 = vcombine.low %v2370_v38, %v2391_v1  ;;  %v2406_v47 = vunpack.c.0.s8 %v2405_v0 }
 0x52e   : > { %v2409_v45 = vsub.s32 %v2406_v47, %v5739_v13 }
 0x530   : > { %v2410_v5 = vrot.slane %v2400_v61, %v2409_v45  ;;  %v2417_v28 = vrot.slane %v2401_v51, %v2409_v45  ;;  %v2424_v24 = vrot.slane %v2402_v7, %v2409_v45  ;;  %v2431_v40 = vrot.slane %v2403_v22, %v2409_v45 }
 0x532   : > { %v2432_v60 = vcombine.low %v2410_v5, %v2417_v28  ;;  %v2433_v30 = vcombine.low %v2424_v24, %v2431_v40 }
 0x534   : > { %v2440_v10 = vrot.slane %v2432_v60, %v2409_v45  ;;  %v2447_v6 = vrot.slane %v2433_v30, %v2409_v45 }
 0x536   : > { %v2448_v55 = vcombine.low %v2440_v10, %v2447_v6 }
 0x538   : > { %v2450_v34 = vmax.f32 %v2223_v41, %v2448_v55 }
 0x53a   : > { %2451 = vst [vmem:[%s3475_s18] sm:$0xff] %v2450_v34 }
 0x53b PF: > { %p3116_p9 = scmp.le.s32.totalorder %s3889_s13, 200 }
 0x53c   : > { %v5740_v48 = vld [vmem:[#allocation2_spill] sm:$0xff] (!%p3116_p9)  ;;  %v2473_v25 = vstv (!%p3116_p9), %s3114_s12  ;;  %v5741_v41 = vmax.f32 (!%p3116_p9), %v3927_v39, 0.0  ;;  %v5742_v34 = vmax.f32 (!%p3116_p9), %v3933_v43, 0.0 }
 0x53d   : > { %2455 = sbr.rel (%p3116_p9) target bundleno = 1485 (0x5cd), region = 76  ;;  %v2459_v46 = vadd.s32 (!%p3116_p9), 16, %v5740_v48  ;;  %v2460_v50 = vadd.s32 (!%p3116_p9), 24, %v5740_v48  ;;  %v2458_v3 = vadd.s32 (!%p3116_p9), 8, %v5740_v48  ;;  %v2461_v9 = vadd.s32 (!%p3116_p9), 32, %v5740_v48 }
 0x53e   : > { %v2462_v54 = vadd.s32 (!%p3116_p9), 40, %v5740_v48  ;;  %v2463_v44 = vadd.s32 (!%p3116_p9), 48, %v5740_v48  ;;  %v2464_v27 = vadd.s32 (!%p3116_p9), 56, %v5740_v48  ;;  %v2465_v26 = vadd.s32 (!%p3116_p9), 64, %v5740_v48 }
 0x53f   : > { %v4689_v21 = vadd.s32 (!%p3116_p9), %v2473_v25, %v2459_v46  ;;  %v2466_v2 = vadd.s32 (!%p3116_p9), 72, %v5740_v48  ;;  %v2467_v52 = vadd.s32 (!%p3116_p9), 80, %v5740_v48  ;;  %v2468_v4 = vadd.s32 (!%p3116_p9), 88, %v5740_v48 }
 0x540   : > { %v2469_v38 = vadd.s32 (!%p3116_p9), 96, %v5740_v48  ;;  %v2470_v1 = vadd.s32 (!%p3116_p9), 104, %v5740_v48  ;;  %v2471_v62 = vadd.s32 (!%p3116_p9), 112, %v5740_v48  ;;  %v4698_v0 = vadd.s32 (!%p3116_p9), %v2473_v25, %v2460_v50 }
 0x541   : > { %v2472_v61 = vadd.s32 (!%p3116_p9), 120, %v5740_v48  ;;  %v4702_v51 = vadd.s32 (!%p3116_p9), %v2473_v25, %v5740_v48  ;;  %v4704_v7 = vadd.s32 (!%p3116_p9), %v2473_v25, %v2458_v3  ;;  %v4706_v22 = vadd.s32 (!%p3116_p9), %v2473_v25, %v2461_v9 }
 0x542   : > { %v4708_v47 = vadd.s32 (!%p3116_p9), %v2473_v25, %v2462_v54  ;;  %v4710_v13 = vadd.s32 (!%p3116_p9), %v2473_v25, %v2463_v44  ;;  %v4712_v45 = vadd.s32 (!%p3116_p9), %v2473_v25, %v2464_v27  ;;  %vm2492_vm3 = vcmp.lt.s32.totalorder (!%p3116_p9), %v4689_v21, 200 }
 0x543   : > { %v4715_v5 = vadd.s32 (!%p3116_p9), %v2473_v25, %v2465_v26  ;;  %v4717_v28 = vadd.s32 (!%p3116_p9), %v2473_v25, %v2466_v2  ;;  %v4719_v24 = vadd.s32 (!%p3116_p9), %v2473_v25, %v2467_v52  ;;  %v4721_v40 = vadd.s32 (!%p3116_p9), %v2473_v25, %v2468_v4 }
 0x544   : > { %v4723_v60 = vadd.s32 %v2473_v25, %v2469_v38  ;;  %v4725_v30 = vadd.s32 %v2473_v25, %v2470_v1  ;;  %v4727_v10 = vadd.s32 %v2473_v25, %v2471_v62  ;;  %vm2493_vm4 = vcmp.lt.s32.totalorder %v4698_v0, 200 }
 0x545   : > { %v4730_v6 = vadd.s32 %v2473_v25, %v2472_v61  ;;  %vm2490_vm5 = vcmp.lt.s32.totalorder %v4702_v51, 200  ;;  %vm2494_vm6 = vcmp.lt.s32.totalorder %v4706_v22, 200  ;;  %v2556_v55 = vsel %vm2492_vm3, %v5741_v41, 0.0 }
 0x546   : > { %vm2495_vm7 = vcmp.lt.s32.totalorder %v4708_v47, 200  ;;  %v2557_v46 = vsel %vm2492_vm3, %v5742_v34, 0.0  ;;  %v5743_v50 = vmax.f32 %v4196_v33, 0.0  ;;  %v5744_v9 = vmax.f32 %v4202_v29, 0.0 }
 0x547   : > { %vm2496_vm8 = vcmp.lt.s32.totalorder %v4710_v13, 200  ;;  %v5745_v25 = vmax.f32 %v4199_v32, 0.0  ;;  %v5746_v54 = vmax.f32 %v4205_v31, 0.0  ;;  %v5747_v44 = vmax.f32 %v3941_v49, 0.0 }
 0x548   : > { %v2558_v3 = vsel %vm2492_vm3, %v5743_v50, 0.0  ;;  %v2559_v39 = vsel %vm2492_vm3, %v5744_v9, 0.0  ;;  %v5748_v27 = vmax.f32 %v3949_v12, 0.0  ;;  %v5749_v32 = vmax.f32 %v3930_v42, 0.0 }
 0x549   : > { %v2560_v43 = vsel %vm2492_vm3, %v5745_v25, 0.0  ;;  %v2561_v33 = vsel %vm2492_vm3, %v5746_v54, 0.0  ;;  %v2564_v29 = vsel %vm2493_vm4, %v5747_v44, 0.0  ;;  %v5750_v31 = vmax.f32 %v3946_v53, 0.0 }
 0x54a   : > { %v2565_v26 = vsel %vm2493_vm4, %v5748_v27, 0.0  ;;  %v2555_v2 = vsel %vm2492_vm3, %v5749_v32, 0.0  ;;  %v2710_v4 = vmax.f32 %v2564_v29, %v2556_v55  ;;  %v5751_v49 = vmax.f32 %v4210_v19, 0.0 }
 0x54b   : > { %v2563_v52 = vsel %vm2493_vm4, %v5750_v31, 0.0  ;;  %v5752_v1 = vmax.f32 %v4218_v37, 0.0  ;;  %v5753_v62 = vmax.f32 %v4213_v18, 0.0  ;;  %v5754_v61 = vmax.f32 %v4221_v23, 0.0 }
 0x54c   : > { %v2566_v38 = vsel %vm2493_vm4, %v5751_v49, 0.0  ;;  %v2731_v19 = vmax.f32 %v2565_v26, %v2557_v46  ;;  %v5755_v37 = vmax.f32 %v3959_v63, 0.0  ;;  %v5756_v18 = vmax.f32 %v3965_v57, 0.0  ;;  %v5758_v46 = vld [vmem:[#allocation3_spill] sm:$0xff] }
 0x54d   : > { %v2752_v12 = vmax.f32 %v2566_v38, %v2558_v3  ;;  %v2567_v42 = vsel %vm2493_vm4, %v5752_v1, 0.0  ;;  %v2568_v53 = vsel %vm2493_vm4, %v5753_v62, 0.0  ;;  %v2569_v41 = vsel %vm2493_vm4, %v5754_v61, 0.0 }
 0x54e   : > { %v2773_v55 = vmax.f32 %v2567_v42, %v2559_v39  ;;  %v2794_v34 = vmax.f32 %v2568_v53, %v2560_v43  ;;  %v2815_v50 = vmax.f32 %v2569_v41, %v2561_v33  ;;  %v2689_v3 = vmax.f32 %v2563_v52, %v2555_v2  ;;  %v5770_v41 = vld [vmem:[#allocation62_spill] sm:$0xff] }
 0x54f   : > { %v2572_v9 = vsel %vm2494_vm6, %v5755_v37, 0.0  ;;  %v2573_v25 = vsel %vm2494_vm6, %v5756_v18, 0.0  ;;  %v5757_v23 = vmax.f32 %v4228_v58, 0.0  ;;  %vm2497_vm9 = vcmp.lt.s32.totalorder %v4712_v45, 200 }
 0x550   : > { %v5759_v39 = vmax.f32 %v5758_v46, 0.0  ;;  %v5760_v43 = vmax.f32 %v3962_v56, 0.0  ;;  %v2711_v44 = vmax.f32 %v2710_v4, %v2572_v9  ;;  %v5761_v58 = vmax.f32 %v4234_v8, 0.0  ;;  %v5774_v9 = vld [vmem:[#allocation63_spill] sm:$0xff]  ;;  %v5776_v46 = vld [vmem:[#allocation13_spill] sm:$0xff] }
 0x551   : > { %v2574_v54 = vsel %vm2494_vm6, %v5757_v23, 0.0  ;;  %v5762_v27 = vmax.f32 %v4231_v59, 0.0  ;;  %v5763_v32 = vmax.f32 %v4237_v17, 0.0  ;;  %v2732_v2 = vmax.f32 %v2731_v19, %v2573_v25 }
 0x552   : > { %v4809_v63 = vsel %vm2490_vm5, %v5759_v39, 0.0  ;;  %v2571_v57 = vsel %vm2494_vm6, %v5760_v43, 0.0  ;;  %v2753_v33 = vmax.f32 %v2752_v12, %v2574_v54  ;;  %v2575_v29 = vsel %vm2494_vm6, %v5761_v58, 0.0  ;;  %v5766_v12 = vld [vmem:[#allocation60_spill] sm:$0xff]  ;;  %v5779_v58 = vld [vmem:[#allocation15_spill] sm:$0xff] }
 0x553   : > { %v2576_v26 = vsel %vm2494_vm6, %v5762_v27, 0.0  ;;  %v2577_v56 = vsel %vm2494_vm6, %v5763_v32, 0.0  ;;  %v2774_v31 = vmax.f32 %v2773_v55, %v2575_v29  ;;  %vm2498_vm10 = vcmp.lt.s32.totalorder %v4715_v5, 200 }
 0x554   : > { %v2795_v52 = vmax.f32 %v2794_v34, %v2576_v26  ;;  %v2816_v49 = vmax.f32 %v2815_v50, %v2577_v56  ;;  %v2690_v8 = vmax.f32 %v2689_v3, %v2571_v57  ;;  %v5764_v4 = vmax.f32 %v3973_v14, 0.0  ;;  %v5772_v3 = vld [vmem:[#allocation61_spill] sm:$0xff]  ;;  %v5781_v26 = vld [vmem:[#allocation64_spill] sm:$0xff] }
 0x555   : > { %v5765_v38 = vmax.f32 %v3981_v36, 0.0  ;;  %v5767_v1 = vmax.f32 %v5766_v12, 0.0  ;;  %v5768_v62 = vmax.f32 %v3898_v15, 0.0  ;;  %v5769_v14 = vmax.f32 %v3978_v35, 0.0 }
 0x556   : > { %v2580_v59 = vsel %vm2495_vm7, %v5764_v4, 0.0  ;;  %v5771_v19 = vmax.f32 %v5770_v41, 0.0  ;;  %v5773_v37 = vmax.f32 %v5772_v3, 0.0  ;;  %v5775_v18 = vmax.f32 %v5774_v9, 0.0  ;;  %v5792_v3 = vld [vmem:[#allocation17_spill] sm:$0xff] }
 0x557   : > { %v2581_v17 = vsel %vm2495_vm7, %v5765_v38, 0.0  ;;  %v2582_v42 = vsel %vm2495_vm7, %v5767_v1, 0.0  ;;  %v4844_v53 = vsel %vm2490_vm5, %v5768_v62, 0.0  ;;  %v2579_v61 = vsel %vm2495_vm7, %v5769_v14, 0.0  ;;  %v5789_v62 = vld [vmem:[#allocation67_spill] sm:$0xff] }
 0x558   : > { %v2754_v36 = vmax.f32 %v2753_v33, %v2582_v42  ;;  %v2583_v55 = vsel %vm2495_vm7, %v5771_v19, 0.0  ;;  %v2712_v34 = vmax.f32 %v2711_v44, %v2580_v59  ;;  %v2584_v15 = vsel %vm2495_vm7, %v5773_v37, 0.0  ;;  %v5787_v59 = vld [vmem:[#allocation65_spill] sm:$0xff] }
 0x559   : > { %v2775_v50 = vmax.f32 %v2774_v31, %v2583_v55  ;;  %v2585_v35 = vsel %vm2495_vm7, %v5775_v18, 0.0  ;;  %v2733_v25 = vmax.f32 %v2732_v2, %v2581_v17  ;;  %v2796_v23 = vmax.f32 %v2795_v52, %v2584_v15  ;;  %v5783_v2 = vld [vmem:[#allocation14_spill] sm:$0xff] }
 0x55a   : > { %v2817_v54 = vmax.f32 %v2816_v49, %v2585_v35  ;;  %v5777_v39 = vmax.f32 %v5776_v46, 0.0  ;;  %vm2499_vm11 = vcmp.lt.s32.totalorder %v4717_v28, 200  ;;  %v5778_v57 = vmax.f32 %v3895_v11, 0.0  ;;  %v5785_v49 = vld [vmem:[#allocation66_spill] sm:$0xff] }
 0x55b   : > { %v2691_v44 = vmax.f32 %v2690_v8, %v2579_v61  ;;  %v5780_v29 = vmax.f32 %v5779_v58, 0.0  ;;  %v5782_v32 = vmax.f32 %v5781_v26, 0.0  ;;  %v5784_v31 = vmax.f32 %v5783_v2, 0.0  ;;  %v5794_v15 = vld [vmem:[#allocation18_spill] sm:$0xff]  ;;  %v5802_v58 = vld [vmem:[#allocation69_spill] sm:$0xff]  ;;  %v5804_v26 = vld [vmem:[#allocation71_spill] sm:$0xff] }
 0x55c   : > { %v2588_v43 = vsel %vm2496_vm8, %v5777_v39, 0.0  ;;  %v4871_v33 = vsel %vm2490_vm5, %v5778_v57, 0.0  ;;  %v5786_v4 = vmax.f32 %v5785_v49, 0.0  ;;  %v5788_v38 = vmax.f32 %v5787_v59, 0.0 }
 0x55d   : > { %v2589_v27 = vsel %vm2496_vm8, %v5780_v29, 0.0  ;;  %v2590_v56 = vsel %vm2496_vm8, %v5782_v32, 0.0  ;;  %v2587_v11 = vsel %vm2496_vm8, %v5784_v31, 0.0  ;;  %vm2491_vm12 = vcmp.lt.s32.totalorder %v4704_v7, 200 }
 0x55e   : > { %v2755_v52 = vmax.f32 %v2754_v36, %v2590_v56  ;;  %v2591_v8 = vsel %vm2496_vm8, %v5786_v4, 0.0  ;;  %v2592_v17 = vsel %vm2496_vm8, %v5788_v38, 0.0  ;;  %v2713_v12 = vmax.f32 %v2712_v34, %v2588_v43  ;;  %v5800_v43 = vld [vmem:[#allocation70_spill] sm:$0xff]  ;;  %v5808_v38 = vld [vmem:[#allocation21_spill] sm:$0xff] }
 0x55f   : > { %v2776_v1 = vmax.f32 %v2775_v50, %v2591_v8  ;;  %v2797_v42 = vmax.f32 %v2796_v23, %v2592_v17  ;;  %v5790_v14 = vmax.f32 %v5789_v62, 0.0  ;;  %v5791_v36 = vmax.f32 %v3901_v16, 0.0  ;;  %v5796_v16 = vld [vmem:[#allocation19_spill] sm:$0xff] }
 0x560   : > { %v2734_v19 = vmax.f32 %v2733_v25, %v2589_v27  ;;  %v5793_v37 = vmax.f32 %v5792_v3, 0.0  ;;  %vm2500_vm13 = vcmp.lt.s32.totalorder %v4719_v24, 200  ;;  %v2692_v50 = vmax.f32 %v2691_v44, %v2587_v11  ;;  %v5798_v25 = vld [vmem:[#allocation68_spill] sm:$0xff] }
 0x561   : > { %v2593_v61 = vsel %vm2496_vm8, %v5790_v14, 0.0  ;;  %v4902_v41 = vsel %vm2490_vm5, %v5791_v36, 0.0  ;;  %v5795_v9 = vmax.f32 %v5794_v15, 0.0  ;;  %v5797_v35 = vmax.f32 %v5796_v16, 0.0  ;;  %v5810_v14 = vld [vmem:[#allocation72_spill] sm:$0xff] }
 0x562   : > { %v2818_v55 = vmax.f32 %v2817_v54, %v2593_v61  ;;  %v2596_v34 = vsel %vm2497_vm9, %v5793_v37, 0.0  ;;  %v5799_v54 = vmax.f32 %v5798_v25, 0.0  ;;  %v5801_v57 = vmax.f32 %v5800_v43, 0.0  ;;  %v5816_v37 = vld [vmem:[#allocation23_spill] sm:$0xff] }
 0x563   : > { %v2595_v18 = vsel %vm2497_vm9, %v5795_v9, 0.0  ;;  %v2597_v23 = vsel %vm2497_vm9, %v5797_v35, 0.0  ;;  %v5803_v29 = vmax.f32 %v5802_v58, 0.0  ;;  %v5805_v32 = vmax.f32 %v5804_v26, 0.0  ;;  %v5818_v35 = vld [vmem:[#allocation74_spill] sm:$0xff] }
 0x564   : > { %v2598_v46 = vsel %vm2497_vm9, %v5799_v54, 0.0  ;;  %v2599_v44 = vsel %vm2497_vm9, %v5801_v57, 0.0  ;;  %v2714_v2 = vmax.f32 %v2713_v12, %v2596_v34  ;;  %v2735_v59 = vmax.f32 %v2734_v19, %v2597_v23  ;;  %v5820_v54 = vld [vmem:[#allocation73_spill] sm:$0xff]  ;;  %v5822_v57 = vld [vmem:[#allocation75_spill] sm:$0xff] }
 0x565   : > { %v2756_v39 = vmax.f32 %v2755_v52, %v2598_v46  ;;  %v2600_v27 = vsel %vm2497_vm9, %v5803_v29, 0.0  ;;  %v2601_v56 = vsel %vm2497_vm9, %v5805_v32, 0.0  ;;  %v2777_v31 = vmax.f32 %v2776_v1, %v2599_v44  ;;  %v5806_v52 = vld [vmem:[#allocation52_spill] sm:$0xff]  ;;  %v5812_v1 = vld [vmem:[#allocation54_spill] sm:$0xff] }
 0x566   : > { %v2798_v11 = vmax.f32 %v2797_v42, %v2600_v27  ;;  %v2819_v49 = vmax.f32 %v2818_v55, %v2601_v56  ;;  %v5807_v4 = vmax.f32 %v5806_v52, 0.0  ;;  %v5809_v17 = vmax.f32 %v5808_v38, 0.0  ;;  %v5814_v55 = vld [vmem:[#allocation53_spill] sm:$0xff] }
 0x567   : > { %v5811_v61 = vmax.f32 %v5810_v14, 0.0  ;;  %vm2501_vm14 = vcmp.lt.s32.totalorder %v4721_v40, 200  ;;  %v5813_v42 = vmax.f32 %v5812_v1, 0.0  ;;  %v5815_v19 = vmax.f32 %v5814_v55, 0.0  ;;  %v5826_v52 = vld [vmem:[#allocation25_spill] sm:$0xff]  ;;  %v5834_v1 = vld [vmem:[#allocation78_spill] sm:$0xff] }
 0x568   : > { %v4937_v8 = vsel %vm2490_vm5, %v5807_v4, 0.0  ;;  %v2604_v62 = vsel %vm2498_vm10, %v5809_v17, 0.0  ;;  %v5817_v34 = vmax.f32 %v5816_v37, 0.0  ;;  %v2693_v16 = vmax.f32 %v2692_v50, %v2595_v18  ;;  %v5824_v50 = vld [vmem:[#allocation22_spill] sm:$0xff]  ;;  %v5828_v17 = vld [vmem:[#allocation76_spill] sm:$0xff] }
 0x569   : > { %v2606_v12 = vsel %vm2498_vm10, %v5811_v61, 0.0  ;;  %v4952_v36 = vsel %vm2490_vm5, %v5813_v42, 0.0  ;;  %v4958_v3 = vsel %vm2490_vm5, %v5815_v19, 0.0  ;;  %v5819_v23 = vmax.f32 %v5818_v35, 0.0  ;;  %v5836_v19 = vld [vmem:[#allocation4_spill] sm:$0xff] }
 0x56a   : > { %v2605_v15 = vsel %vm2498_vm10, %v5817_v34, 0.0  ;;  %v2757_v9 = vmax.f32 %v2756_v39, %v2606_v12  ;;  %v5821_v46 = vmax.f32 %v5820_v54, 0.0  ;;  %v5823_v44 = vmax.f32 %v5822_v57, 0.0 }
 0x56b   : > { %v2607_v25 = vsel %vm2498_vm10, %v5819_v23, 0.0  ;;  %v2715_v29 = vmax.f32 %v2714_v2, %v2604_v62  ;;  %vm2502_vm15 = vcmp.lt.s32.totalorder %v4723_v60, 200  ;;  %v5825_v18 = vmax.f32 %v5824_v50, 0.0  ;;  %v5832_v62 = vld [vmem:[#allocation27_spill] sm:$0xff] }
 0x56c   : > { %v2608_v43 = vsel %vm2498_vm10, %v5821_v46, 0.0  ;;  %v2609_v58 = vsel %vm2498_vm10, %v5823_v44, 0.0  ;;  %v2778_v27 = vmax.f32 %v2777_v31, %v2607_v25  ;;  %v2736_v56 = vmax.f32 %v2735_v59, %v2605_v15  ;;  %v5830_v31 = vld [vmem:[#allocation55_spill] sm:$0xff]  ;;  %v5838_v15 = vld [vmem:[#allocation77_spill] sm:$0xff] }
 0x56d   : > { %v2799_v26 = vmax.f32 %v2798_v11, %v2608_v43  ;;  %v2820_v39 = vmax.f32 %v2819_v49, %v2609_v58  ;;  %v2603_v32 = vsel %vm2498_vm10, %v5825_v18, 0.0  ;;  %v5827_v4 = vmax.f32 %v5826_v52, 0.0  ;;  %v5840_v25 = vld [vmem:[#allocation79_spill] sm:$0xff]  ;;  %v5842_v58 = vld [vmem:[#allocation26_spill] sm:$0xff]  ;;  %v5844_v52 = vld [vmem:[#allocation29_spill] sm:$0xff] }
 0x56e   : > { %v5829_v14 = vmax.f32 %v5828_v17, 0.0  ;;  %v5831_v11 = vmax.f32 %v5830_v31, 0.0  ;;  %v5833_v61 = vmax.f32 %v5832_v62, 0.0  ;;  %v5835_v42 = vmax.f32 %v5834_v1, 0.0 }
 0x56f   : > { %v2612_v38 = vsel %vm2499_vm11, %v5827_v4, 0.0  ;;  %v5837_v37 = vmax.f32 %v5836_v19, 0.0  ;;  %v5839_v35 = vmax.f32 %v5838_v15, 0.0  ;;  %v5841_v54 = vmax.f32 %v5840_v25, 0.0 }
 0x570   : > { %v2614_v2 = vsel %vm2499_vm11, %v5829_v14, 0.0  ;;  %v4993_v49 = vsel %vm2490_vm5, %v5831_v11, 0.0  ;;  %v2613_v59 = vsel %vm2499_vm11, %v5833_v61, 0.0  ;;  %v2615_v55 = vsel %vm2499_vm11, %v5835_v42, 0.0  ;;  %v5846_v14 = vld [vmem:[#allocation80_spill] sm:$0xff]  ;;  %v5852_v11 = vld [vmem:[#allocation81_spill] sm:$0xff] }
 0x571   : > { %v2758_v12 = vmax.f32 %v2757_v9, %v2614_v2  ;;  %v5007_v34 = vsel %vm2491_vm12, %v5837_v37, 0.0  ;;  %v2779_v51 = vmax.f32 %v2778_v27, %v2615_v55  ;;  %v2616_v23 = vsel %vm2499_vm11, %v5839_v35, 0.0  ;;  %v5856_v37 = vld [vmem:[#allocation83_spill] sm:$0xff] }
 0x572   : > { %v2617_v9 = vsel %vm2499_vm11, %v5841_v54, 0.0  ;;  %v2694_v46 = vmax.f32 %v2693_v16, %v2603_v32  ;;  %v2716_v43 = vmax.f32 %v2715_v29, %v2612_v38  ;;  %v2800_v57 = vmax.f32 %v2799_v26, %v2616_v23  ;;  %v5848_v29 = vld [vmem:[#allocation31_spill] sm:$0xff]  ;;  %v5850_v38 = vld [vmem:[#allocation82_spill] sm:$0xff] }
 0x573   : > { %v2821_v44 = vmax.f32 %v2820_v39, %v2617_v9  ;;  %vm2503_vm0 = vcmp.lt.s32.totalorder %v4725_v30, 200  ;;  %v5843_v50 = vmax.f32 %v5842_v58, 0.0  ;;  %v2737_v18 = vmax.f32 %v2736_v56, %v2613_v59  ;;  %v5854_v59 = vld [vmem:[#allocation5_spill] sm:$0xff]  ;;  %v5858_v23 = vld [vmem:[#allocation30_spill] sm:$0xff] }
 0x574   : > { %v5845_v4 = vmax.f32 %v5844_v52, 0.0  ;;  %v5847_v2 = vmax.f32 %v5846_v14, 0.0  ;;  %v5849_v26 = vmax.f32 %v5848_v29, 0.0  ;;  %v5851_v31 = vmax.f32 %v5850_v38, 0.0  ;;  %v5860_v52 = vld [vmem:[#allocation33_spill] sm:$0xff]  ;;  %v5870_v38 = vld [vmem:[#allocation87_spill] sm:$0xff] }
 0x575   : > { %v2611_v27 = vsel %vm2499_vm11, %v5843_v50, 0.0  ;;  %v5853_v62 = vmax.f32 %v5852_v11, 0.0  ;;  %v5855_v1 = vmax.f32 %v5854_v59, 0.0  ;;  %v5859_v25 = vmax.f32 %v5858_v23, 0.0  ;;  %v5868_v29 = vld [vmem:[#allocation85_spill] sm:$0xff]  ;;  %v5872_v11 = vld [vmem:[#allocation7_spill] sm:$0xff] }
 0x576   : > { %v2620_v17 = vsel %vm2500_vm13, %v5845_v4, 0.0  ;;  %v2622_v16 = vsel %vm2500_vm13, %v5847_v2, 0.0  ;;  %v2621_v39 = vsel %vm2500_vm13, %v5849_v26, 0.0  ;;  %v2623_v56 = vsel %vm2500_vm13, %v5851_v31, 0.0 }
 0x577   : > { %v2759_v32 = vmax.f32 %v2758_v12, %v2622_v16  ;;  %v2624_v61 = vsel %vm2500_vm13, %v5853_v62, 0.0  ;;  %v5046_v42 = vsel %vm2491_vm12, %v5855_v1, 0.0  ;;  %v2780_v55 = vmax.f32 %v2779_v51, %v2623_v56 }
 0x578   : > { %v2801_v19 = vmax.f32 %v2800_v57, %v2624_v61  ;;  %v5857_v12 = vmax.f32 %v5856_v37, 0.0  ;;  %v2695_v35 = vmax.f32 %v2694_v46, %v2611_v27  ;;  %v2619_v54 = vsel %vm2500_vm13, %v5859_v25, 0.0  ;;  %v5862_v57 = vld [vmem:[#allocation35_spill] sm:$0xff]  ;;  %v5864_v27 = vld [vmem:[#allocation84_spill] sm:$0xff] }
 0x579   : > { %v2717_v9 = vmax.f32 %v2716_v43, %v2620_v17  ;;  %vm2504_vm1 = vcmp.lt.s32.totalorder %v4727_v10, 200  ;;  %v2738_v50 = vmax.f32 %v2737_v18, %v2621_v39  ;;  %v5861_v4 = vmax.f32 %v5860_v52, 0.0  ;;  %v5874_v37 = vld [vmem:[#allocation56_spill] sm:$0xff] }
 0x57a   : > { %v2625_v15 = vsel %vm2500_vm13, %v5857_v12, 0.0  ;;  %v5863_v14 = vmax.f32 %v5862_v57, 0.0  ;;  %v5865_v2 = vmax.f32 %v5864_v27, 0.0  ;;  %v5869_v26 = vmax.f32 %v5868_v29, 0.0  ;;  %v5876_v52 = vld [vmem:[#allocation88_spill] sm:$0xff]  ;;  %v5886_v29 = vld [vmem:[#allocation89_spill] sm:$0xff] }
 0x57b   : > { %v2822_v58 = vmax.f32 %v2821_v44, %v2625_v15  ;;  %v2628_v51 = vsel %vm2501_vm14, %v5861_v4, 0.0  ;;  %v5866_v44 = vld [vmem:[#allocation86_spill] sm:$0xff]  ;;  %v5871_v31 = vmax.f32 %v5870_v38, 0.0  ;;  %v5873_v62 = vmax.f32 %v5872_v11, 0.0 }
 0x57c   : > { %v2629_v46 = vsel %vm2501_vm14, %v5863_v14, 0.0  ;;  %v2630_v16 = vsel %vm2501_vm14, %v5865_v2, 0.0  ;;  %v5867_v17 = vmax.f32 %v5866_v44, 0.0  ;;  %v2632_v39 = vsel %vm2501_vm14, %v5869_v26, 0.0  ;;  %v5878_v14 = vld [vmem:[#allocation34_spill] sm:$0xff] }
 0x57d   : > { %v2760_v43 = vmax.f32 %v2759_v32, %v2630_v16  ;;  %v2633_v56 = vsel %vm2501_vm14, %v5871_v31, 0.0  ;;  %v5085_v32 = vsel %vm2491_vm12, %v5873_v62, 0.0  ;;  %v2802_v59 = vmax.f32 %v2801_v19, %v2632_v39  ;;  %v5884_v44 = vld [vmem:[#allocation90_spill] sm:$0xff] }
 0x57e   : > { %v2631_v18 = vsel %vm2501_vm14, %v5867_v17, 0.0  ;;  %v2823_v1 = vmax.f32 %v2822_v58, %v2633_v56  ;;  %v5875_v12 = vmax.f32 %v5874_v37, 0.0  ;;  %v2696_v23 = vmax.f32 %v2695_v35, %v2619_v54  ;;  %v5880_v58 = vld [vmem:[#allocation37_spill] sm:$0xff]  ;;  %v5882_v35 = vld [vmem:[#allocation39_spill] sm:$0xff]  ;;  %v5890_v31 = vld [vmem:[#allocation58_spill] sm:$0xff] }
 0x57f   : > { %v2781_v61 = vmax.f32 %v2780_v55, %v2631_v18  ;;  %v2718_v25 = vmax.f32 %v2717_v9, %v2628_v51  ;;  %v5877_v4 = vmax.f32 %v5876_v52, 0.0  ;;  %vm2505_vm2 = vcmp.lt.s32.totalorder %v4730_v6, 200 }
 0x580   : > { %v5091_v15 = vsel %vm2491_vm12, %v5875_v12, 0.0  ;;  %v5879_v27 = vmax.f32 %v5878_v14, 0.0  ;;  %v2739_v19 = vmax.f32 %v2738_v50, %v2629_v46  ;;  %v5881_v2 = vmax.f32 %v5880_v58, 0.0  ;;  %v5888_v46 = vld [vmem:[#allocation91_spill] sm:$0xff]  ;;  %v5892_v12 = vld [vmem:[#allocation57_spill] sm:$0xff] }
 0x581   : > { %v2638_v57 = vsel %vm2502_vm15, %v5877_v4, 0.0  ;;  %v5883_v54 = vmax.f32 %v5882_v35, 0.0  ;;  %v5885_v17 = vmax.f32 %v5884_v44, 0.0  ;;  %v5887_v26 = vmax.f32 %v5886_v29, 0.0  ;;  %v5896_v35 = vld [vmem:[#allocation38_spill] sm:$0xff] }
 0x582   : > { %v2627_v55 = vsel %vm2501_vm14, %v5879_v27, 0.0  ;;  %v2636_v16 = vsel %vm2502_vm15, %v5881_v2, 0.0  ;;  %v2761_v51 = vmax.f32 %v2760_v43, %v2638_v57  ;;  %v5889_v39 = vmax.f32 %v5888_v46, 0.0  ;;  %v5894_v27 = vld [vmem:[#allocation92_spill] sm:$0xff] }
 0x583   : > { %v2637_v9 = vsel %vm2502_vm15, %v5883_v54, 0.0  ;;  %v2639_v18 = vsel %vm2502_vm15, %v5885_v17, 0.0  ;;  %v2640_v50 = vsel %vm2502_vm15, %v5887_v26, 0.0  ;;  %v5891_v56 = vmax.f32 %v5890_v31, 0.0  ;;  %v5908_v31 = vld [vmem:[#allocation59_spill] sm:$0xff] }
 0x584   : > { %v2641_v38 = vsel %vm2502_vm15, %v5889_v39, 0.0  ;;  %v2782_v11 = vmax.f32 %v2781_v61, %v2639_v18  ;;  %v2803_v62 = vmax.f32 %v2802_v59, %v2640_v50  ;;  %v5893_v52 = vmax.f32 %v5892_v12, 0.0  ;;  %v5900_v18 = vld [vmem:[#allocation94_spill] sm:$0xff]  ;;  %v5904_v50 = vld [vmem:[#allocation93_spill] sm:$0xff] }
 0x585   : > { %v5126_v43 = vsel %vm2491_vm12, %v5891_v56, 0.0  ;;  %v2824_v37 = vmax.f32 %v2823_v1, %v2641_v38  ;;  %v2697_v57 = vmax.f32 %v2696_v23, %v2627_v55  ;;  %v2719_v14 = vmax.f32 %v2718_v25, %v2636_v16  ;;  %v5898_v1 = vld [vmem:[#allocation41_spill] sm:$0xff]  ;;  %v5902_v25 = vld [vmem:[#allocation43_spill] sm:$0xff] }
 0x586   : > { %v5132_v4 = vsel %vm2491_vm12, %v5893_v52, 0.0  ;;  %v5895_v58 = vmax.f32 %v5894_v27, 0.0  ;;  %v5897_v54 = vmax.f32 %v5896_v35, 0.0  ;;  %v2740_v59 = vmax.f32 %v2739_v19, %v2637_v9  ;;  %v5906_v9 = vld [vmem:[#allocation95_spill] sm:$0xff] }
 0x587   : > { %v5899_v44 = vmax.f32 %v5898_v1, 0.0  ;;  %v5901_v29 = vmax.f32 %v5900_v18, 0.0  ;;  %v5903_v55 = vmax.f32 %v5902_v25, 0.0  ;;  %v5905_v46 = vmax.f32 %v5904_v50, 0.0  ;;  %v5913_v25 = vld [vmem:[#allocation45_spill] sm:$0xff] }
 0x588   : > { %v2646_v2 = vsel %vm2503_vm0, %v5895_v58, 0.0  ;;  %v2635_v61 = vsel %vm2502_vm15, %v5897_v54, 0.0  ;;  %v5907_v39 = vmax.f32 %v5906_v9, 0.0  ;;  %v5909_v56 = vmax.f32 %v5908_v31, 0.0  ;;  %v5923_v9 = vld [vmem:[#allocation98_spill] sm:$0xff]  ;;  %v5925_v31 = vld [vmem:[#allocation9_spill] sm:$0xff] }
 0x589   : > { %v2644_v17 = vsel %vm2503_vm0, %v5899_v44, 0.0  ;;  %v2647_v23 = vsel %vm2503_vm0, %v5901_v29, 0.0  ;;  %v2645_v16 = vsel %vm2503_vm0, %v5903_v55, 0.0  ;;  %v2762_v26 = vmax.f32 %v2761_v51, %v2646_v2  ;;  %v5910_v51 = vld [vmem:[#allocation42_spill] sm:$0xff] }
 0x58a   : > { %v2648_v19 = vsel %vm2503_vm0, %v5905_v46, 0.0  ;;  %v2649_v38 = vsel %vm2503_vm0, %v5907_v39, 0.0  ;;  %v2553_v12 = vsel %vm2491_vm12, %v5909_v56, 0.0  ;;  %v2783_v52 = vmax.f32 %v2782_v11, %v2647_v23 }
 0x58b   : > { %v2804_v27 = vmax.f32 %v2803_v62, %v2648_v19  ;;  %v2825_v58 = vmax.f32 %v2824_v37, %v2649_v38  ;;  %v2698_v35 = vmax.f32 %v2697_v57, %v2635_v61  ;;  %v5911_v2 = vmax.f32 %v5910_v51, 0.0  ;;  %v5915_v62 = vld [vmem:[#allocation97_spill] sm:$0xff]  ;;  %v5917_v61 = vld [vmem:[#allocation96_spill] sm:$0xff] }
 0x58c   : > { %v2720_v1 = vmax.f32 %v2719_v14, %v2644_v17  ;;  %v5912_v44 = vmax.f32 %v4388_v20, 0.0  ;;  %v2741_v29 = vmax.f32 %v2740_v59, %v2645_v16  ;;  %v5914_v55 = vmax.f32 %v5913_v25, 0.0  ;;  %v5919_v20 = vld [vmem:[#allocation8_spill] sm:$0xff]  ;;  %v5921_v16 = vld [vmem:[#allocation47_spill] sm:$0xff] }
 0x58d   : > { %v2643_v54 = vsel %vm2503_vm0, %v5911_v2, 0.0  ;;  %v5916_v37 = vmax.f32 %v5915_v62, 0.0  ;;  %v5918_v23 = vmax.f32 %v5917_v61, 0.0  ;;  %v5920_v17 = vmax.f32 %v5919_v20, 0.0 }
 0x58e   : > { %v2654_v18 = vsel %vm2504_vm1, %v5912_v44, 0.0  ;;  %v2652_v11 = vsel %vm2504_vm1, %v5914_v55, 0.0  ;;  %v5922_v50 = vmax.f32 %v5921_v16, 0.0  ;;  %v5924_v39 = vmax.f32 %v5923_v9, 0.0  ;;  %v5927_v55 = vld [vmem:[#allocation46_spill] sm:$0xff] }
 0x58f   : > { %v2655_v57 = vsel %vm2504_vm1, %v5916_v37, 0.0  ;;  %v2656_v14 = vsel %vm2504_vm1, %v5918_v23, 0.0  ;;  %v2554_v59 = vsel %vm2492_vm3, %v5920_v17, 0.0  ;;  %v2763_v19 = vmax.f32 %v2762_v26, %v2654_v18  ;;  %v5929_v18 = vld [vmem:[#allocation99_spill] sm:$0xff]  ;;  %v5931_v17 = vld [vmem:[#allocation101_spill] sm:$0xff] }
 0x590   : > { %v2653_v46 = vsel %vm2504_vm1, %v5922_v50, 0.0  ;;  %v2657_v38 = vsel %vm2504_vm1, %v5924_v39, 0.0  ;;  %v5926_v56 = vmax.f32 %v5925_v31, 0.0  ;;  %v2784_v2 = vmax.f32 %v2783_v52, %v2655_v57  ;;  %v5933_v52 = vld [vmem:[#allocation100_spill] sm:$0xff] }
 0x591   : > { %v2805_v44 = vmax.f32 %v2804_v27, %v2656_v14  ;;  %v2826_v21 = vmax.f32 %v2825_v58, %v2657_v38  ;;  %v2699_v25 = vmax.f32 %v2698_v35, %v2643_v54  ;;  %v5928_v62 = vmax.f32 %v5927_v55, 0.0  ;;  %v5935_v35 = vld [vmem:[#allocation102_spill] sm:$0xff]  ;;  %v5939_v14 = vld [vmem:[#allocation51_spill] sm:$0xff] }
 0x592   : > { %v2562_v51 = vsel %vm2493_vm4, %v5926_v56, 0.0  ;;  %v2721_v26 = vmax.f32 %v2720_v1, %v2652_v11  ;;  %v5930_v61 = vmax.f32 %v5929_v18, 0.0  ;;  %v2742_v20 = vmax.f32 %v2741_v29, %v2653_v46  ;;  %v5937_v11 = vld [vmem:[#allocation49_spill] sm:$0xff] }
 0x593   : > { %v2651_v37 = vsel %vm2504_vm1, %v5928_v62, 0.0  ;;  %v5932_v16 = vmax.f32 %v5931_v17, 0.0  ;;  %v5934_v27 = vmax.f32 %v5933_v52, 0.0  ;;  %v5936_v54 = vmax.f32 %v5935_v35, 0.0  ;;  %v5951_v35 = vld [vmem:[#allocation16_spill] sm:$0xff] }
 0x594   : > { %v2662_v23 = vsel %vm2505_vm2, %v5930_v61, 0.0  ;;  %v5938_v57 = vmax.f32 %v5937_v11, 0.0  ;;  %v5940_v50 = vmax.f32 %v5939_v14, 0.0  ;;  %v2667_v39 = vmax.f32 %v4809_v63, %v5007_v34  ;;  %v5943_v34 = vld [vmem:[#allocation10_spill] sm:$0xff]  ;;  %v5953_v14 = vld [vmem:[#allocation20_spill] sm:$0xff] }
 0x595   : > { %v2663_v0 = vsel %vm2505_vm2, %v5932_v16, 0.0  ;;  %v2664_v58 = vsel %vm2505_vm2, %v5934_v27, 0.0  ;;  %v2665_v1 = vsel %vm2505_vm2, %v5936_v54, 0.0  ;;  %v2764_v9 = vmax.f32 %v2763_v19, %v2662_v23  ;;  %v5941_v16 = vld [vmem:[#allocation6_spill] sm:$0xff] }
 0x596   : > { %v2660_v29 = vsel %vm2505_vm2, %v5938_v57, 0.0  ;;  %v2661_v46 = vsel %vm2505_vm2, %v5940_v50, 0.0  ;;  %v2785_v38 = vmax.f32 %v2784_v2, %v2663_v0  ;;  %v2806_v31 = vmax.f32 %v2805_v44, %v2664_v58 }
 0x597   : > { %v2827_v56 = vmax.f32 %v2826_v21, %v2665_v1  ;;  %v2751_v55 = vmax.f32 %v4937_v8, %v5091_v15  ;;  %v2668_v62 = vmax.f32 %v2667_v39, %v2554_v59  ;;  %v2772_v18 = vmax.f32 %v4952_v36, %v5126_v43  ;;  %v5945_v8 = vld [vmem:[#allocation11_spill] sm:$0xff]  ;;  %v5947_v59 = vld [vmem:[#allocation50_spill] sm:$0xff] }
 0x598   : > { %v2793_v61 = vmax.f32 %v4958_v3, %v5132_v4  ;;  %v2814_v17 = vmax.f32 %v4993_v49, %v2553_v12  ;;  %v5942_v19 = vmax.f32 %v5941_v16, 0.0  ;;  %v5944_v2 = vmax.f32 %v5943_v34, 0.0 }
 0x599   : > { %v5946_v15 = vmax.f32 %v5945_v8, 0.0  ;;  %v2700_v43 = vmax.f32 %v2699_v25, %v2651_v37  ;;  %v5948_v3 = vmax.f32 %v5947_v59, 0.0  ;;  %v2722_v4 = vmax.f32 %v2721_v26, %v2660_v29  ;;  %v5949_v25 = vld [vmem:[#allocation12_spill] sm:$0xff] }
 0x59a   : > { %v2547_v63 = vsel %vm2491_vm12, %v5942_v19, 0.0  ;;  %v2570_v44 = vsel %vm2494_vm6, %v5944_v2, 0.0  ;;  %v2743_v12 = vmax.f32 %v2742_v20, %v2661_v46  ;;  %v2669_v7 = vmax.f32 %v2668_v62, %v2562_v51  ;;  %v5955_v46 = vld [vmem:[#allocation24_spill] sm:$0xff] }
 0x59b   : > { %v2578_v36 = vsel %vm2495_vm7, %v5946_v15, 0.0  ;;  %v2659_v49 = vsel %vm2505_vm2, %v5948_v3, 0.0  ;;  %v2709_v21 = vmax.f32 %v4871_v33, %v5046_v42  ;;  %v2730_v22 = vmax.f32 %v4902_v41, %v5085_v32  ;;  %v5959_v19 = vld [vmem:[#allocation32_spill] sm:$0xff] }
 0x59c   : > { %v2765_v23 = vmax.f32 %v2764_v9, %v2751_v55  ;;  %v2786_v0 = vmax.f32 %v2785_v38, %v2772_v18  ;;  %v2670_v52 = vmax.f32 %v2669_v7, %v2570_v44  ;;  %v2807_v47 = vmax.f32 %v2806_v31, %v2793_v61 }
 0x59d   : > { %v2828_v27 = vmax.f32 %v2827_v56, %v2814_v17  ;;  %v5950_v37 = vmax.f32 %v5949_v25, 0.0  ;;  %v5952_v26 = vmax.f32 %v5951_v35, 0.0  ;;  %v2701_v20 = vmax.f32 %v2700_v43, %v2659_v49  ;;  %v5957_v17 = vld [vmem:[#allocation28_spill] sm:$0xff] }
 0x59e   : > { %v2671_v33 = vmax.f32 %v2670_v52, %v2578_v36  ;;  %v2688_v42 = vmax.f32 %v4844_v53, %v2547_v63  ;;  %v2723_v41 = vmax.f32 %v2722_v4, %v2709_v21  ;;  %v2744_v32 = vmax.f32 %v2743_v12, %v2730_v22  ;;  %v5961_v49 = vld [vmem:[#allocation36_spill] sm:$0xff] }
 0x59f   : > { %v2586_v58 = vsel %vm2496_vm8, %v5950_v37, 0.0  ;;  %v2594_v51 = vsel %vm2497_vm9, %v5952_v26, 0.0  ;;  %v2766_v54 = vrot.slane %v2765_v23, 4  ;;  %v2787_v1 = vrot.slane %v2786_v0, 4  ;;  %v5963_v12 = vld [vmem:[#allocation40_spill] sm:$0xff] }
 0x5a0   : > { %v2672_v11 = vmax.f32 %v2671_v33, %v2586_v58  ;;  %v2808_v57 = vrot.slane %v2807_v47, 4  ;;  %v2829_v29 = vrot.slane %v2828_v27, 4  ;;  %v5954_v50 = vmax.f32 %v5953_v14, 0.0  ;;  %v5965_v58 = vld [vmem:[#allocation44_spill] sm:$0xff] }
 0x5a1   : > { %v5956_v9 = vmax.f32 %v5955_v46, 0.0  ;;  %v2702_v38 = vmax.f32 %v2701_v20, %v2688_v42  ;;  %v2724_v53 = vrot.slane %v2723_v41, 4  ;;  %v2745_v31 = vrot.slane %v2744_v32, 4  ;;  %v5967_v26 = vld [vmem:[#allocation48_spill] sm:$0xff] }
 0x5a2   : > { %v2602_v13 = vsel %vm2498_vm10, %v5954_v50, 0.0  ;;  %v2673_v39 = vmax.f32 %v2672_v11, %v2594_v51  ;;  %v2767_v56 = vmax.f32 %v2765_v23, %v2766_v54  ;;  %v2788_v55 = vmax.f32 %v2786_v0, %v2787_v1 }
 0x5a3   : > { %v2610_v45 = vsel %vm2499_vm11, %v5956_v9, 0.0  ;;  %v2809_v18 = vmax.f32 %v2807_v47, %v2808_v57  ;;  %v2830_v61 = vmax.f32 %v2828_v27, %v2829_v29  ;;  %v5958_v16 = vmax.f32 %v5957_v17, 0.0 }
 0x5a4   : > { %v2674_v62 = vmax.f32 %v2673_v39, %v2602_v13  ;;  %v5960_v63 = vmax.f32 %v5959_v19, 0.0  ;;  %v2703_v2 = vrot.slane %v2702_v38, 4  ;;  %v2725_v44 = vmax.f32 %v2723_v41, %v2724_v53 }
 0x5a5   : > { %v2618_v5 = vsel %vm2500_vm13, %v5958_v16, 0.0  ;;  %v2746_v8 = vmax.f32 %v2744_v32, %v2745_v31  ;;  %v2768_v15 = vrot.slane %v2767_v56, 2  ;;  %v2789_v36 = vrot.slane %v2788_v55, 2 }
 0x5a6   : > { %v2626_v28 = vsel %vm2501_vm14, %v5960_v63, 0.0  ;;  %v2675_v34 = vmax.f32 %v2674_v62, %v2610_v45  ;;  %v2810_v59 = vrot.slane %v2809_v18, 2  ;;  %v2831_v3 = vrot.slane %v2830_v61, 2 }
 0x5a7   : > { %v5962_v4 = vmax.f32 %v5961_v49, 0.0  ;;  %v5964_v7 = vmax.f32 %v5963_v12, 0.0  ;;  %v2704_v22 = vmax.f32 %v2702_v38, %v2703_v2  ;;  %v2726_v23 = vrot.slane %v2725_v44, 2 }
 0x5a8   : > { %v2676_v43 = vmax.f32 %v2675_v34, %v2618_v5  ;;  %v2747_v0 = vrot.slane %v2746_v8, 2  ;;  %v2769_v52 = vmax.f32 %v2767_v56, %v2768_v15  ;;  %v2790_v47 = vmax.f32 %v2788_v55, %v2789_v36 }
 0x5a9   : > { %v2634_v24 = vsel %vm2502_vm15, %v5962_v4, 0.0  ;;  %v2642_v40 = vsel %vm2503_vm0, %v5964_v7, 0.0  ;;  %v2811_v25 = vmax.f32 %v2809_v18, %v2810_v59  ;;  %v2832_v37 = vmax.f32 %v2830_v61, %v2831_v3  ;;  %v2666_v4 = vld [vmem:[%s3475_s18] sm:$0xff] }
 0x5aa   : > { %v2677_v21 = vmax.f32 %v2676_v43, %v2626_v28  ;;  %v5966_v35 = vmax.f32 %v5965_v58, 0.0  ;;  %v5968_v51 = vmax.f32 %v5967_v26, 0.0  ;;  %v2705_v33 = vrot.slane %v2704_v22, 2 }
 0x5ab   : > { %v2727_v42 = vmax.f32 %v2725_v44, %v2726_v23  ;;  %v2748_v41 = vmax.f32 %v2746_v8, %v2747_v0  ;;  %v2770_v32 = vrot.slane %v2769_v52, 1  ;;  %v2791_v54 = vrot.slane %v2790_v47, 1 }
 0x5ac   : > { %v2678_v27 = vmax.f32 %v2677_v21, %v2634_v24  ;;  %v2650_v60 = vsel %vm2504_vm1, %v5966_v35, 0.0  ;;  %v2658_v30 = vsel %vm2505_vm2, %v5968_v51, 0.0  ;;  %v2812_v11 = vrot.slane %v2811_v25, 1 }
 0x5ad   : > { %v2833_v57 = vrot.slane %v2832_v37, 1  ;;  %v3362_v29 = vmov 1966171168   ;;  %v2706_v13 = vmax.f32 %v2704_v22, %v2705_v33  ;;  %v2728_v10 = vrot.slane %v2727_v42, 1 }
 0x5ae   : > { %v2679_v20 = vmax.f32 %v2678_v27, %v2642_v40  ;;  %v2848_v14 = vunpack.c.l.s4 %v3362_v29  ;;  %v2749_v46 = vrot.slane %v2748_v41, 1  ;;  %v2771_v9 = vmax.f32 %v2769_v52, %v2770_v32 }
 0x5af   : > { %v2792_v45 = vmax.f32 %v2790_v47, %v2791_v54  ;;  %v2813_v6 = vmax.f32 %v2811_v25, %v2812_v11  ;;  %v2834_v38 = vmax.f32 %v2832_v37, %v2833_v57  ;;  %v2707_v56 = vrot.slane %v2706_v13, 1 }
 0x5b0   : > { %v2680_v1 = vmax.f32 %v2679_v20, %v2650_v60  ;;  %v2849_v53 = vunpack.c.0.s8 %v2848_v14  ;;  %v2729_v55 = vmax.f32 %v2727_v42, %v2728_v10  ;;  %v2750_v62 = vmax.f32 %v2748_v41, %v2749_v46 }
 0x5b1   : > { %v2845_v61 = vcombine.low %v2771_v9, %v2792_v45  ;;  %v2846_v17 = vcombine.low %v2813_v6, %v2834_v38  ;;  %v2708_v19 = vmax.f32 %v2706_v13, %v2707_v56 }
 0x5b2   : > { %v2681_v50 = vmax.f32 %v2680_v1, %v2658_v30  ;;  %v2852_v16 = vsub.s32 %v2849_v53, %v5740_v48  ;;  %v2844_v28 = vcombine.low %v2729_v55, %v2750_v62 }
 0x5b4   : > { %v2682_v39 = vrot.slane %v2681_v50, 4  ;;  %v2867_v34 = vrot.slane %v2845_v61, %v2852_v16  ;;  %v2874_v2 = vrot.slane %v2846_v17, %v2852_v16  ;;  %v2860_v15 = vrot.slane %v2844_v28, %v2852_v16 }
 0x5b6   : > { %v2683_v31 = vmax.f32 %v2681_v50, %v2682_v39  ;;  %v2876_v36 = vcombine.low %v2867_v34, %v2874_v2 }
 0x5b8   : > { %v2684_v18 = vrot.slane %v2683_v31, 2  ;;  %v2890_v3 = vrot.slane %v2876_v36, %v2852_v16 }
 0x5ba   : > { %v2685_v5 = vmax.f32 %v2683_v31, %v2684_v18 }
 0x5bc   : > { %v2686_v63 = vrot.slane %v2685_v5, 1 }
 0x5be   : > { %v2687_v44 = vmax.f32 %v2685_v5, %v2686_v63 }
 0x5c0   : > { %v2843_v8 = vcombine.low %v2687_v44, %v2708_v19 }
 0x5c2   : > { %v2853_v43 = vrot.slane %v2843_v8, %v2852_v16 }
 0x5c4   : > { %v2875_v59 = vcombine.low %v2853_v43, %v2860_v15 }
 0x5c6   : > { %v2883_v49 = vrot.slane %v2875_v59, %v2852_v16 }
 0x5c8   : > { %v2891_v24 = vcombine.low %v2883_v49, %v2890_v3 }
 0x5ca   : > { %v2893_v12 = vmax.f32 %v2666_v4, %v2891_v24 }
 0x5cc   : > { %2894 = vst [vmem:[%s3475_s18] sm:$0xff] %v2893_v12 }
 0x5cd PF: > { %s21_s21 = sadd.s32 1, %s3357_s21   ;;  %s5969_s17 = smov %s3349_s19 }
 0x5ce   : > { %p18_p10 = scmp.ge.s32.totalorder %s21_s21, 6   ;;  %s5970_s18 = smov %s3353_s20 }
 0x5cf   : > { %s5971_s19 = smov %s5974_s22  ;;  %s5972_s20 = smov %s5978_s23 }
 0x5d0   :  { %20 = sbr.rel (!%p18_p10) target bundleno = 3 (0x3), region = 106 }

</bundles_post_ra>
